<compile_context>
chip_gen: v6e
topology: v6e:2x2x1
jax: 0.10.0
libtpu: 0.0.40
codegen_flags: <defaults>
</compile_context>

<pallas_src>
import functools
import math

import jax
import jax.numpy as jnp
from jax.experimental import pallas as pl
from jax.experimental.pallas import tpu as pltpu


def _conv_ps_prelu_kernel(x_ref, w_ref, b_ref, alpha_ref, o_ref, col_ref,
                          *, tile_h, W, C):
    """One (batch, row-tile) step: fused im2col -> single K=9C dot -> bias -> PReLU.

    x_ref:     (H_pad + 2, W + 2, C)  bf16  whole padded image of this batch element
    w_ref:     (9*C, O)               bf16  rows ordered (dh, dw, cin)
    b_ref:     (1, O)                 f32
    alpha_ref: (1,)                   f32   SMEM scalar (PReLU, num_parameters=1)
    o_ref:     (tile_m, O)            f32   flattened (row-major h*W + w) output tile
    col_ref:   (tile_m, 9*C)          bf16  VMEM im2col scratch
    """
    i = pl.program_id(1)
    row0 = pl.multiple_of(i * tile_h, tile_h)
    tile_m = tile_h * W

    # Fused im2col: pack the 9 shifted taps into one (tile_m, 9C) bf16 operand.
    for dh in range(3):
        for dw in range(3):
            k = dh * 3 + dw
            tap = x_ref[pl.ds(row0 + dh, tile_h), pl.ds(dw, W), :]   # (tile_h, W, C)
            col_ref[:, k * C:(k + 1) * C] = tap.reshape(tile_m, C)

    # Single MXU dot with K = 9C, f32 accumulation; no accumulator scratch.
    acc = jnp.dot(col_ref[...], w_ref[...], preferred_element_type=jnp.float32)
    y = acc + b_ref[...]                       # f32 bias epilogue (one VPU pass)
    alpha = alpha_ref[0]
    # Scalar PReLU commutes with PixelShuffle, so apply it pre-shuffle.
    # TODO(synk): per-channel PReLU would need alpha indexed by o // 4.
    o_ref[...] = jnp.where(y >= 0, y, alpha * y).astype(o_ref.dtype)


def _vmem_cap_bytes():
    """Generation-aware VMEM request ceiling (v7x: 64 MiB/TC, v5e/v6e: 128 MiB)."""
    kind = ""
    try:
        kind = jax.devices()[0].device_kind.lower()
    except Exception:
        pass
    return (48 << 20) if "v7" in kind else (100 << 20)


def _pick_tile_h(B, H, W):
    """Row-tile height: ~1024 GEMM rows, prefer divisors of H, keep tile_m % 8 == 0."""
    cap = max(1, min(H, 1024 // max(W, 1)))
    divs = [t for t in range(1, cap + 1) if H % t == 0]
    tile_h = divs[-1] if (divs and 2 * divs[-1] >= cap) else cap
    if B == 1 and tile_h >= H and H > 1:
        tile_h = (H + 1) // 2            # give both TensorCores a row tile when B == 1
    m = 8 // math.gcd(W, 8)              # force tile_m = tile_h*W to a multiple of 8
    return -(-tile_h // m) * m


def upsample_block(x_nchw, weight, bias, alpha):
    """Forward of UpsampleBLock.  x: (B,C,H,W) f32, weight: (4C,C,3,3) OIHW,
    bias: (4C,), alpha: scalar.  Returns (B, C, 2H, 2W) f32 (PyTorch NCHW semantics)."""
    B, C, H, W = x_nchw.shape
    O = 4 * C
    r = 2

    tile_h = _pick_tile_h(B, H, W)
    H_pad = -(-H // tile_h) * tile_h
    nH = H_pad // tile_h
    tile_m = tile_h * W
    Hp, Wp = H_pad + 2, W + 2

    # ---- glue: NCHW -> NHWC, spatial zero-pad (conv pad=1 + row-tile remainder),
    #      bf16 operands (f32 accumulation inside the kernel) ----
    x = jnp.transpose(x_nchw, (0, 2, 3, 1))                                 # NHWC
    xp = jnp.pad(x, ((0, 0), (1, 1 + (H_pad - H)), (1, 1), (0, 0)))
    xp = xp.astype(jnp.bfloat16)                                            # (B,Hp,Wp,C)

    # torch OIHW -> (kh, kw, cin, O) -> (9C, O); rows ordered (dh, dw, cin) to match
    # the kernel's im2col packing.  No O padding: output stays lane-exact.
    w9 = jnp.transpose(weight, (2, 3, 1, 0)).reshape(9 * C, O).astype(jnp.bfloat16)
    bvec = bias.reshape(1, O).astype(jnp.float32)
    avec = jnp.asarray(alpha, jnp.float32).reshape(1)

    kernel = functools.partial(_conv_ps_prelu_kernel, tile_h=tile_h, W=W, C=C)

    flops = 2 * B * H_pad * W * 9 * C * O
    bytes_accessed = (xp.size * 2 + w9.size * 2 + bvec.size * 4
                      + B * H_pad * W * O * 4)

    # VMEM budget: double-buffered image/weights/bias/output block + im2col scratch
    # + live f32 accumulator; clamp to the per-generation ceiling.
    est = (2 * Hp * Wp * C * 2 + 2 * 9 * C * O * 2 + 2 * 8 * 128 * 4
           + 2 * tile_m * O * 4 + tile_m * 9 * C * 2 + tile_m * O * 4)
    vmem_limit = int(min(max(2 * est + (8 << 20), 32 << 20), _vmem_cap_bytes()))

    y = pl.pallas_call(
        kernel,
        out_shape=jax.ShapeDtypeStruct((B, H_pad * W, O), jnp.float32),
        grid=(B, nH),
        in_specs=[
            pl.BlockSpec((None, Hp, Wp, C), lambda b, i: (b, 0, 0, 0)),
            pl.BlockSpec((9 * C, O), lambda b, i: (0, 0)),
            pl.BlockSpec((1, O), lambda b, i: (0, 0)),
            pl.BlockSpec(memory_space=pltpu.MemorySpace.SMEM),
        ],
        out_specs=pl.BlockSpec((None, tile_m, O), lambda b, i: (b, i, 0)),
        scratch_shapes=[pltpu.VMEM((tile_m, 9 * C), jnp.bfloat16)],
        compiler_params=pltpu.CompilerParams(
            dimension_semantics=("parallel", "parallel"),
            vmem_limit_bytes=vmem_limit),
        cost_estimate=pl.CostEstimate(flops=flops, transcendentals=0,
                                      bytes_accessed=bytes_accessed),
    )(xp, w9, bvec, avec)

    # ---- glue: drop remainder rows; PixelShuffle(2) + NCHW in ONE exact-size transpose ----
    y = y.reshape(B, H_pad, W, O)[:, :H]                  # (B, H, W, 4C)
    y = y.reshape(B, H, W, C, r, r)                       # (b, h, w, c, dy, dx)
    y = jnp.transpose(y, (0, 3, 1, 4, 2, 5))              # (b, c, h, dy, w, dx)
    return y.reshape(B, C, H * r, W * r)                  # NCHW, upsampled


def _upsample_block_ref(x, weight, bias, alpha):
    """Pure-JAX reference (Conv2d -> PixelShuffle -> PReLU).  Operands rounded to bf16
    so both paths multiply identical values (products exact in f32 either way)."""
    B, C, H, W = x.shape
    xb = x.astype(jnp.bfloat16).astype(jnp.float32)
    wb = weight.astype(jnp.bfloat16).astype(jnp.float32)
    y = jax.lax.conv_general_dilated(
        xb, wb, window_strides=(1, 1), padding=((1, 1), (1, 1)),
        dimension_numbers=("NCHW", "OIHW", "NCHW"),
        precision=jax.lax.Precision.HIGHEST,
    ) + bias[None, :, None, None]
    y = y.reshape(B, C, 2, 2, H, W).transpose(0, 1, 4, 2, 5, 3)
    y = y.reshape(B, C, 2 * H, 2 * W)
    return jnp.where(y >= 0, y, alpha * y)


if __name__ == "__main__":
    key = jax.random.PRNGKey(0)
    fwd = jax.jit(upsample_block)

    # (B, C, H, W): primary case + lane-dense O=128 / B==1 split + remainder-row case.
    cases = [(2, 4, 16, 16), (1, 32, 16, 16), (1, 8, 7, 20)]
    for (B, C, H, W) in cases:
        key, kx, kw, kb = jax.random.split(key, 4)
        x = jax.random.normal(kx, (B, C, H, W), dtype=jnp.float32)
        weight = jax.random.normal(kw, (4 * C, C, 3, 3), dtype=jnp.float32)
        weight = weight * (1.0 / math.sqrt(9 * C))
        bias = jax.random.normal(kb, (4 * C,), dtype=jnp.float32) * 0.1
        alpha = 0.25  # PReLU default init

        out = jax.block_until_ready(fwd(x, weight, bias, alpha))
        assert out.shape == (B, C, 2 * H, 2 * W)

        ref = _upsample_block_ref(x, weight, bias, alpha)
        err = float(jnp.max(jnp.abs(out - ref)))
        assert jnp.allclose(out, ref, atol=2e-3, rtol=2e-3), ((B, C, H, W), err)

    print("KERNEL_OK")
</pallas_src>

<mosaic_0001>
module attributes {stable_mosaic.version = 11 : i64} {
  func.func @_conv_ps_prelu_kernel(%arg0: i32, %arg1: i32, %arg2: memref<1x18x18x4xbf16, #tpu.memory_space<vmem>>, %arg3: memref<36x16xbf16, #tpu.memory_space<vmem>>, %arg4: memref<1x16xf32, #tpu.memory_space<vmem>>, %arg5: memref<1xf32, #tpu.memory_space<smem>>, %arg6: memref<1x256x16xf32, #tpu.memory_space<vmem>>, %arg7: memref<256x36xbf16, #tpu.memory_space<vmem>>) attributes {dimension_semantics = [#tpu.dimension_semantics<parallel>, #tpu.dimension_semantics<parallel>], iteration_bounds = array<i64: 2, 1>, scalar_prefetch = 0 : i64, scratch_operands = 1 : i64, tpu.core_type = #tpu.core_type<tc>, window_params = [{transform_indices = @transform_0, window_bounds = array<i64: 1, 18, 18, 4>}, {pipeline_mode = #tpu.pipeline_mode<synchronous>, transform_indices = @transform_1, window_bounds = array<i64: 36, 16>}, {pipeline_mode = #tpu.pipeline_mode<synchronous>, transform_indices = @transform_2, window_bounds = array<i64: 1, 16>}, {transform_indices = @transform_3, window_bounds = array<i64: 1>}, {transform_indices = @transform_4, window_bounds = array<i64: 1, 256, 16>}]} {
    %c16_i32 = arith.constant 16 : i32
    %0 = arith.muli %arg1, %c16_i32 : i32
    %1 = tpu.assume_multiple %0, 16 : i32
    %c0_i32 = arith.constant 0 : i32
    %2 = arith.addi %1, %c0_i32 : i32
    %c0 = arith.constant 0 : index
    %3 = arith.index_cast %2 : i32 to index
    %c0_0 = arith.constant 0 : index
    %c0_1 = arith.constant 0 : index
    %4 = vector.load %arg2[%c0, %3, %c0_0, %c0_1] : memref<1x18x18x4xbf16, #tpu.memory_space<vmem>>, vector<1x16x16x4xbf16>
    %5 = vector.shape_cast %4 : vector<1x16x16x4xbf16> to vector<16x16x4xbf16>
    %6 = vector.shape_cast %5 : vector<16x16x4xbf16> to vector<256x4xbf16>
    %c0_2 = arith.constant 0 : index
    %c0_3 = arith.constant 0 : index
    %7 = vector.load %arg7[%c0_2, %c0_3] : memref<256x36xbf16, #tpu.memory_space<vmem>>, vector<256x4xbf16>
    tpu.vector_store %arg7[%c0_2, %c0_3], %6 {strides = array<i32>} : memref<256x36xbf16, #tpu.memory_space<vmem>>, vector<256x4xbf16>,
    %c0_i32_4 = arith.constant 0 : i32
    %8 = arith.addi %1, %c0_i32_4 : i32
    %c0_5 = arith.constant 0 : index
    %9 = arith.index_cast %8 : i32 to index
    %c1 = arith.constant 1 : index
    %c0_6 = arith.constant 0 : index
    %10 = vector.load %arg2[%c0_5, %9, %c1, %c0_6] : memref<1x18x18x4xbf16, #tpu.memory_space<vmem>>, vector<1x16x16x4xbf16>
    %11 = vector.shape_cast %10 : vector<1x16x16x4xbf16> to vector<16x16x4xbf16>
    %12 = vector.shape_cast %11 : vector<16x16x4xbf16> to vector<256x4xbf16>
    %c0_7 = arith.constant 0 : index
    %c4 = arith.constant 4 : index
    %13 = vector.load %arg7[%c0_7, %c4] : memref<256x36xbf16, #tpu.memory_space<vmem>>, vector<256x4xbf16>
    tpu.vector_store %arg7[%c0_7, %c4], %12 {strides = array<i32>} : memref<256x36xbf16, #tpu.memory_space<vmem>>, vector<256x4xbf16>,
    %c0_i32_8 = arith.constant 0 : i32
    %14 = arith.addi %1, %c0_i32_8 : i32
    %c0_9 = arith.constant 0 : index
    %15 = arith.index_cast %14 : i32 to index
    %c2 = arith.constant 2 : index
    %c0_10 = arith.constant 0 : index
    %16 = vector.load %arg2[%c0_9, %15, %c2, %c0_10] : memref<1x18x18x4xbf16, #tpu.memory_space<vmem>>, vector<1x16x16x4xbf16>
    %17 = vector.shape_cast %16 : vector<1x16x16x4xbf16> to vector<16x16x4xbf16>
    %18 = vector.shape_cast %17 : vector<16x16x4xbf16> to vector<256x4xbf16>
    %c0_11 = arith.constant 0 : index
    %c8 = arith.constant 8 : index
    %19 = vector.load %arg7[%c0_11, %c8] : memref<256x36xbf16, #tpu.memory_space<vmem>>, vector<256x4xbf16>
    tpu.vector_store %arg7[%c0_11, %c8], %18 {strides = array<i32>} : memref<256x36xbf16, #tpu.memory_space<vmem>>, vector<256x4xbf16>,
    %c1_i32 = arith.constant 1 : i32
    %20 = arith.addi %1, %c1_i32 : i32
    %c0_12 = arith.constant 0 : index
    %21 = arith.index_cast %20 : i32 to index
    %c0_13 = arith.constant 0 : index
    %c0_14 = arith.constant 0 : index
    %22 = vector.load %arg2[%c0_12, %21, %c0_13, %c0_14] : memref<1x18x18x4xbf16, #tpu.memory_space<vmem>>, vector<1x16x16x4xbf16>
    %23 = vector.shape_cast %22 : vector<1x16x16x4xbf16> to vector<16x16x4xbf16>
    %24 = vector.shape_cast %23 : vector<16x16x4xbf16> to vector<256x4xbf16>
    %c0_15 = arith.constant 0 : index
    %c12 = arith.constant 12 : index
    %25 = vector.load %arg7[%c0_15, %c12] : memref<256x36xbf16, #tpu.memory_space<vmem>>, vector<256x4xbf16>
    tpu.vector_store %arg7[%c0_15, %c12], %24 {strides = array<i32>} : memref<256x36xbf16, #tpu.memory_space<vmem>>, vector<256x4xbf16>,
    %c1_i32_16 = arith.constant 1 : i32
    %26 = arith.addi %1, %c1_i32_16 : i32
    %c0_17 = arith.constant 0 : index
    %27 = arith.index_cast %26 : i32 to index
    %c1_18 = arith.constant 1 : index
    %c0_19 = arith.constant 0 : index
    %28 = vector.load %arg2[%c0_17, %27, %c1_18, %c0_19] : memref<1x18x18x4xbf16, #tpu.memory_space<vmem>>, vector<1x16x16x4xbf16>
    %29 = vector.shape_cast %28 : vector<1x16x16x4xbf16> to vector<16x16x4xbf16>
    %30 = vector.shape_cast %29 : vector<16x16x4xbf16> to vector<256x4xbf16>
    %c0_20 = arith.constant 0 : index
    %c16 = arith.constant 16 : index
    %31 = vector.load %arg7[%c0_20, %c16] : memref<256x36xbf16, #tpu.memory_space<vmem>>, vector<256x4xbf16>
    tpu.vector_store %arg7[%c0_20, %c16], %30 {strides = array<i32>} : memref<256x36xbf16, #tpu.memory_space<vmem>>, vector<256x4xbf16>,
    %c1_i32_21 = arith.constant 1 : i32
    %32 = arith.addi %1, %c1_i32_21 : i32
    %c0_22 = arith.constant 0 : index
    %33 = arith.index_cast %32 : i32 to index
    %c2_23 = arith.constant 2 : index
    %c0_24 = arith.constant 0 : index
    %34 = vector.load %arg2[%c0_22, %33, %c2_23, %c0_24] : memref<1x18x18x4xbf16, #tpu.memory_space<vmem>>, vector<1x16x16x4xbf16>
    %35 = vector.shape_cast %34 : vector<1x16x16x4xbf16> to vector<16x16x4xbf16>
    %36 = vector.shape_cast %35 : vector<16x16x4xbf16> to vector<256x4xbf16>
    %c0_25 = arith.constant 0 : index
    %c20 = arith.constant 20 : index
    %37 = vector.load %arg7[%c0_25, %c20] : memref<256x36xbf16, #tpu.memory_space<vmem>>, vector<256x4xbf16>
    tpu.vector_store %arg7[%c0_25, %c20], %36 {strides = array<i32>} : memref<256x36xbf16, #tpu.memory_space<vmem>>, vector<256x4xbf16>,
    %c2_i32 = arith.constant 2 : i32
    %38 = arith.addi %1, %c2_i32 : i32
    %c0_26 = arith.constant 0 : index
    %39 = arith.index_cast %38 : i32 to index
    %c0_27 = arith.constant 0 : index
    %c0_28 = arith.constant 0 : index
    %40 = vector.load %arg2[%c0_26, %39, %c0_27, %c0_28] : memref<1x18x18x4xbf16, #tpu.memory_space<vmem>>, vector<1x16x16x4xbf16>
    %41 = vector.shape_cast %40 : vector<1x16x16x4xbf16> to vector<16x16x4xbf16>
    %42 = vector.shape_cast %41 : vector<16x16x4xbf16> to vector<256x4xbf16>
    %c0_29 = arith.constant 0 : index
    %c24 = arith.constant 24 : index
    %43 = vector.load %arg7[%c0_29, %c24] : memref<256x36xbf16, #tpu.memory_space<vmem>>, vector<256x4xbf16>
    tpu.vector_store %arg7[%c0_29, %c24], %42 {strides = array<i32>} : memref<256x36xbf16, #tpu.memory_space<vmem>>, vector<256x4xbf16>,
    %c2_i32_30 = arith.constant 2 : i32
    %44 = arith.addi %1, %c2_i32_30 : i32
    %c0_31 = arith.constant 0 : index
    %45 = arith.index_cast %44 : i32 to index
    %c1_32 = arith.constant 1 : index
    %c0_33 = arith.constant 0 : index
    %46 = vector.load %arg2[%c0_31, %45, %c1_32, %c0_33] : memref<1x18x18x4xbf16, #tpu.memory_space<vmem>>, vector<1x16x16x4xbf16>
    %47 = vector.shape_cast %46 : vector<1x16x16x4xbf16> to vector<16x16x4xbf16>
    %48 = vector.shape_cast %47 : vector<16x16x4xbf16> to vector<256x4xbf16>
    %c0_34 = arith.constant 0 : index
    %c28 = arith.constant 28 : index
    %49 = vector.load %arg7[%c0_34, %c28] : memref<256x36xbf16, #tpu.memory_space<vmem>>, vector<256x4xbf16>
    tpu.vector_store %arg7[%c0_34, %c28], %48 {strides = array<i32>} : memref<256x36xbf16, #tpu.memory_space<vmem>>, vector<256x4xbf16>,
    %c2_i32_35 = arith.constant 2 : i32
    %50 = arith.addi %1, %c2_i32_35 : i32
    %c0_36 = arith.constant 0 : index
    %51 = arith.index_cast %50 : i32 to index
    %c2_37 = arith.constant 2 : index
    %c0_38 = arith.constant 0 : index
    %52 = vector.load %arg2[%c0_36, %51, %c2_37, %c0_38] : memref<1x18x18x4xbf16, #tpu.memory_space<vmem>>, vector<1x16x16x4xbf16>
    %53 = vector.shape_cast %52 : vector<1x16x16x4xbf16> to vector<16x16x4xbf16>
    %54 = vector.shape_cast %53 : vector<16x16x4xbf16> to vector<256x4xbf16>
    %c0_39 = arith.constant 0 : index
    %c32 = arith.constant 32 : index
    %55 = vector.load %arg7[%c0_39, %c32] : memref<256x36xbf16, #tpu.memory_space<vmem>>, vector<256x4xbf16>
    tpu.vector_store %arg7[%c0_39, %c32], %54 {strides = array<i32>} : memref<256x36xbf16, #tpu.memory_space<vmem>>, vector<256x4xbf16>,
    %c0_40 = arith.constant 0 : index
    %c0_41 = arith.constant 0 : index
    %56 = vector.load %arg7[%c0_40, %c0_41] : memref<256x36xbf16, #tpu.memory_space<vmem>>, vector<256x36xbf16>
    %c0_42 = arith.constant 0 : index
    %c0_43 = arith.constant 0 : index
    %57 = vector.load %arg3[%c0_42, %c0_43] : memref<36x16xbf16, #tpu.memory_space<vmem>>, vector<36x16xbf16>
    %cst = arith.constant dense<0.000000e+00> : vector<256x16xf32>
    %58 = tpu.matmul %56, %57, %cst {dimension_numbers = #tpu.dot_dimension_numbers<[1], [0], [0], [1], [0, 0, 1, 1], [], []>} : vector<256x36xbf16>, vector<36x16xbf16>, vector<256x16xf32> -> vector<256x16xf32>
    %c0_44 = arith.constant 0 : index
    %c0_45 = arith.constant 0 : index
    %59 = vector.load %arg4[%c0_44, %c0_45] : memref<1x16xf32, #tpu.memory_space<vmem>>, vector<1x16xf32>
    %60 = vector.broadcast %59 : vector<1x16xf32> to vector<256x16xf32>
    %61 = arith.addf %58, %60 : vector<256x16xf32>
    %c0_46 = arith.constant 0 : index
    %62 = memref.load %arg5[%c0_46] : memref<1xf32, #tpu.memory_space<smem>>
    %cst_47 = arith.constant 0.000000e+00 : f32
    %63 = vector.broadcast %cst_47 : f32 to vector<256x16xf32>
    %64 = arith.cmpf oge, %61, %63 : vector<256x16xf32>
    %65 = vector.broadcast %62 : f32 to vector<256x16xf32>
    %66 = arith.mulf %65, %61 : vector<256x16xf32>
    %67 = arith.select %64, %61, %66 : vector<256x16xi1>, vector<256x16xf32>
    %c0_48 = arith.constant 0 : index
    %c0_49 = arith.constant 0 : index
    %c0_50 = arith.constant 0 : index
    %68 = vector.load %arg6[%c0_48, %c0_49, %c0_50] : memref<1x256x16xf32, #tpu.memory_space<vmem>>, vector<1x256x16xf32>
    %69 = vector.shape_cast %68 : vector<1x256x16xf32> to vector<256x16xf32>
    %70 = vector.shape_cast %67 : vector<256x16xf32> to vector<1x256x16xf32>
    tpu.vector_store %arg6[%c0_48, %c0_49, %c0_50], %70 {strides = array<i32>} : memref<1x256x16xf32, #tpu.memory_space<vmem>>, vector<1x256x16xf32>,
    return
  }
  func.func @transform_0(%arg0: i32, %arg1: i32) -> (i32, i32, i32, i32) {
    %c0_i32 = arith.constant 0 : i32
    %c0_i32_0 = arith.constant 0 : i32
    %c0_i32_1 = arith.constant 0 : i32
    %c0_i32_2 = arith.constant 0 : i32
    return %arg0, %c0_i32, %c0_i32_0, %c0_i32_1 : i32, i32, i32, i32
  }
  func.func @transform_1(%arg0: i32, %arg1: i32) -> (i32, i32) {
    %c0_i32 = arith.constant 0 : i32
    %c0_i32_0 = arith.constant 0 : i32
    %c0_i32_1 = arith.constant 0 : i32
    return %c0_i32, %c0_i32_0 : i32, i32
  }
  func.func @transform_2(%arg0: i32, %arg1: i32) -> (i32, i32) {
    %c0_i32 = arith.constant 0 : i32
    %c0_i32_0 = arith.constant 0 : i32
    %c0_i32_1 = arith.constant 0 : i32
    return %c0_i32, %c0_i32_0 : i32, i32
  }
  func.func @transform_3(%arg0: i32, %arg1: i32) -> i32 {
    %c0_i32 = arith.constant 0 : i32
    %c0_i32_0 = arith.constant 0 : i32
    return %c0_i32 : i32
  }
  func.func @transform_4(%arg0: i32, %arg1: i32) -> (i32, i32, i32) {
    %c0_i32 = arith.constant 0 : i32
    %c0_i32_0 = arith.constant 0 : i32
    return %arg0, %arg1, %c0_i32 : i32, i32, i32
  }
}

</mosaic_0001>

<bundles_post_ra>
// kernel: upsample_block.1
= control target key start
LH: loop header
LB: loop body
LE: loop exit
PB: predicated region body
PF: predicated region fallthrough
CT: control target
= control target key end

     0   :  { %s4489_s17 = smov 0   ;;  %s4491_s18 = smov 0   ;;  %s6140_s0 = inlined_call_operand.vmem [shape: bf16[2,18,18,4], index: 0, kind: input, shape index: {}]   ;;  %s6141_s1 = inlined_call_operand.vmem [shape: bf16[36,16], index: 1, kind: input, shape index: {}]   ;;  %s6142_s2 = inlined_call_operand.vmem [shape: f32[1,16], index: 2, kind: input, shape index: {}]   ;;  %s6143_s3 = inlined_call_operand.<no memory space> [shape: f32[1], index: 3, kind: input, shape index: {}]   ;;  %s6144_s4 = inlined_call_operand.vmem [shape: f32[2,256,16], index: 4, kind: output, shape index: {}]  }
   0x1   :  { %9 = sst [smem:[#allocation3]] %s6143_s3  ;;  %s4493_s19 = smov 0  }
   0x2 LB: > { %s27_s3 = sadd.s32 1, %s4447_s18  ;;  %p3965_p0 = scmp.ge.s32.totalorder %s4451_s19, 1  ;;  %s4451_s19 = sphi %s4493_s19, %s15_s19   ;;  %s4447_s18 = sphi %s4491_s18, %s6150_s18   ;;  %s4443_s17 = sphi %s4489_s17, %s6149_s17  }
   0x3   : > { %p29_p1 = scmp.ge.s32.totalorder %s27_s3, 2  ;;  %p177_p2 = scmp.lt.s32.totalorder %s4451_s19, 3 }
   0x5   : > { %s6152_s3 = smov (%p29_p1, %s27_s3), 0  ;;  %p178_p3 = pnand %p3965_p0, %p177_p2 }
   0x6   : > { %p207_p4 = scmp.lt.s32.totalorder (!%p178_p3), %s4443_s17, 1  ;;  %s4453_s24 = smov (!%p178_p3), 4  }
   0x7   : > { %181 = sbr.rel (%p178_p3) target bundleno = 863 (0x35f), region = 36  ;;  %s4454_s25 = smov (!%p178_p3), 8  }
   0x8   : > { %s4455_s26 = smov (!%p178_p3), 12   ;;  %s4456_s27 = smov (!%p178_p3), 16  }
   0x9   : > { %s4457_s28 = smov (!%p178_p3), 20   ;;  %s4458_s29 = smov (!%p178_p3), 24  }
   0xa   : > { %s4459_s30 = smov (!%p178_p3), 28   ;;  %s4460_s11 = smov (!%p178_p3), 32  }
   0xb   : > { %s3739_s12 = sld [smem:[#allocation3]] (!%p178_p3) }
   0xc   : > { %s6154_s17 = smov (!%p207_p4, %s4443_s17), 1  ;;  %vm340_vm0 = vsmask.f32 3328  ;;  %vm341_vm1 = vsmask.f32 7440  ;;  %vm259_vm3 = vcmask 27648  }
   0xd   : > { %s4377_s20 = smul.u32 216, %s6154_s17  ;;  %vm4524_vm2 = vmor %vm340_vm0, %vm341_vm1  ;;  %vm952_vm4 = vcmask 1042432   ;;  %vm953_vm5 = vcmask 1046532   ;;  %vm823_vm7 = vcmask 60448   ;;  %vm1163_vm8 = vcmask 93248   ;;  %s4311_s15 = sshll.u32 %s6154_s17, 8 }
   0xe   : > { %vm4668_vm6 = vmor %vm952_vm4, %vm953_vm5  ;;  %vm1360_vm9 = vcmask 126048   ;;  %vm3574_vm10 = vcmask 1041408   ;;  %vm1921_vm11 = vcmask 158848   ;;  %vm2258_vm12 = vcmask 191648   ;;  %s5983_s21 = scalar_lea.vmem %s6144_s4, %s4311_s15 }
   0xf   : > { %s4513_s23 = scalar_lea.vmem %s6140_s0, %s4377_s20  ;;  %vm2455_vm13 = vcmask 224448   ;;  %vm3016_vm14 = vcmask 257248   ;;  %vm3353_vm15 = vcmask 290048   ;;  %vm3525_vm0 = vcmask 293888  }
  0x10   : > { %v295_v0 = vld [vmem:[%s4513_s23 + $0xc] sm:$0xf]  ;;  %v296_v1 = vld [vmem:[%s4513_s23 + $0x10] sm:$0xf]  ;;  %v292_v2 = vld [vmem:[%s4513_s23] sm:$0xf] }
  0x11   : > { %v368_v3 = vshrl.u32 %v295_v0, 16  ;;  %v371_v4 = vshll.u32 %v295_v0, 16  ;;  %v377_v5 = vshll.u32 %v296_v1, 16  ;;  %v381_v6 = vshrl.u32 %v296_v1, 16  ;;  %v293_v7 = vld [vmem:[%s4513_s23 + $0x4] sm:$0xf] }
  0x12   : > { %v344_v8 = vshrl.u32 %v292_v2, 16  ;;  %v347_v9 = vshll.u32 %v292_v2, 16  ;;  %v353_v10 = vshll.u32 %v293_v7, 16  ;;  %v357_v11 = vshrl.u32 %v293_v7, 16  ;;  %v297_v12 = vld [vmem:[%s4513_s23 + $0x14] sm:$0x1] }
  0x13   : > { %v370_v13 = vrot.slane %v368_v3, 4  ;;  %v373_v14 = vrot.slane %v371_v4, 5  ;;  %v379_v15 = vrot.slane %v377_v5, 5  ;;  %v383_v16 = vrot.slane %v381_v6, 4  ;;  %v294_v17 = vld [vmem:[%s4513_s23 + $0x8] sm:$0x1] }
  0x14   : > { %v346_v18 = vrot.slane %v344_v8, 4  ;;  %v349_v19 = vrot.slane %v347_v9, 5  ;;  %v355_v20 = vrot.slane %v353_v10, 5  ;;  %v359_v21 = vrot.slane %v357_v11, 4  ;;  %v299_v22 = vld [vmem:[%s4513_s23 + $0x1c] sm:$0xf] }
  0x15   : > { %v374_v23 = vor.u32 %v373_v14, %v370_v13  ;;  %v384_v24 = vor.u32 %v383_v16, %v379_v15  ;;  %v387_v25 = vshll.u32 %v297_v12, 16  ;;  %v363_v26 = vshll.u32 %v294_v17, 16  ;;  %v300_v30 = vld [vmem:[%s4513_s23 + $0x20] sm:$0x1]  ;;  %v298_v33 = vld [vmem:[%s4513_s23 + $0x18] sm:$0xf] }
  0x16   : > { %v350_v28 = vor.u32 %v349_v19, %v346_v18  ;;  %v360_v29 = vor.u32 %v359_v21, %v355_v20  ;;  %v401_v31 = vshll.u32 %v299_v22, 16  ;;  %v405_v32 = vshrl.u32 %v299_v22, 16  ;;  %v302_v42 = vld [vmem:[%s4513_s23 + $0x28] sm:$0xf]  ;;  %v303_v47 = vld [vmem:[%s4513_s23 + $0x2c] sm:$0x1] }
  0x17   : > { %v375_v34 = vrot.slane %v374_v23, 4  ;;  %v385_v35 = vrot.slane %v384_v24, 4  ;;  %v389_v36 = vrot.slane %v387_v25, 5  ;;  %v365_v37 = vrot.slane %v363_v26, 5  ;;  %v301_v48 = vld [vmem:[%s4513_s23 + $0x24] sm:$0xf] }
  0x18   : > { %v351_v38 = vrot.slane %v350_v28, 4  ;;  %v361_v39 = vrot.slane %v360_v29, 4  ;;  %v403_v40 = vrot.slane %v401_v31, 5  ;;  %v407_v41 = vrot.slane %v405_v32, 4  ;;  %v305_v53 = vld [vmem:[%s4513_s23 + $0x34] sm:$0xf] }
  0x19   : > { %v380_v43 = vsel %vm4524_vm2, %v375_v34, %v379_v15  ;;  %v390_v44 = vsel %vm4524_vm2, %v385_v35, %v389_v36  ;;  %v411_v45 = vshll.u32 %v300_v30, 16  ;;  %v392_v46 = vshrl.u32 %v298_v33, 16  ;;  %v306_v62 = vld [vmem:[%s4513_s23 + $0x38] sm:$0x1]  ;;  %v304_v3 = vld [vmem:[%s4513_s23 + $0x30] sm:$0xf] }
  0x1a   : > { %731 = vrot.lane.b32.xlu1 %v380_v43, %s4453_s24  ;;  %v356_v49 = vsel %vm4524_vm2, %v351_v38, %v355_v20  ;;  %v366_v50 = vsel %vm4524_vm2, %v361_v39, %v365_v37  ;;  %v408_v51 = vor.u32 %v407_v41, %v403_v40  ;;  %v395_v52 = vshll.u32 %v298_v33, 16  ;;  %v308_v8 = vld [vmem:[%s4513_s23 + $0x40] sm:$0xf]  ;;  %v309_v17 = vld [vmem:[%s4513_s23 + $0x44] sm:$0x1] }
  0x1b   : > { %727 = vrot.lane.b32.xlu0 %v356_v49, %s4453_s24  ;;  %v413_v54 = vrot.slane %v411_v45, 5  ;;  %v394_v55 = vrot.slane %v392_v46, 4  ;;  %v425_v56 = vshll.u32 %v302_v42, 16  ;;  %v429_v57 = vshrl.u32 %v302_v42, 16  ;;  %v307_v22 = vld [vmem:[%s4513_s23 + $0x3c] sm:$0xf] }
  0x1c   : > { %v409_v58 = vrot.slane %v408_v51, 4  ;;  %v397_v59 = vrot.slane %v395_v52, 5  ;;  %v435_v60 = vshll.u32 %v303_v47, 16  ;;  %v416_v61 = vshrl.u32 %v301_v48, 16  ;;  %v311_v28 = vld [vmem:[%s4513_s23 + $0x4c] sm:$0xf] }
  0x1d   : > { %v427_v63 = vrot.slane %v425_v56, 5  ;;  %v431_v0 = vrot.slane %v429_v57, 4  ;;  %v419_v1 = vshll.u32 %v301_v48, 16  ;;  %v449_v2 = vshll.u32 %v305_v53, 16  ;;  %v312_v37 = vld [vmem:[%s4513_s23 + $0x50] sm:$0x1] }
  0x1e   : > { %733 = vrot.lane.b32.xlu1 %v390_v44, %s4453_s24  ;;  %v414_v4 = vsel %vm4524_vm2, %v409_v58, %v413_v54  ;;  %v398_v5 = vor.u32 %v397_v59, %v394_v55  ;;  %v437_v6 = vrot.slane %v435_v60, 5  ;;  %v418_v7 = vrot.slane %v416_v61, 4  ;;  %v310_v42 = vld [vmem:[%s4513_s23 + $0x48] sm:$0xf]  ;;  %v314_v47 = vld [vmem:[%s4513_s23 + $0x58] sm:$0xf] }
  0x1f   : > { %729 = vrot.lane.b32.xlu0 %v366_v50, %s4453_s24  ;;  %v432_v9 = vor.u32 %v431_v0, %v427_v63  ;;  %v421_v10 = vrot.slane %v419_v1, 5  ;;  %v451_v11 = vrot.slane %v449_v2, 5  ;;  %v453_v12 = vshrl.u32 %v305_v53, 16  ;;  %v315_v56 = vld [vmem:[%s4513_s23 + $0x5c] sm:$0x1] }
  0x20   : > { %v399_v13 = vrot.slane %v398_v5, 4  ;;  %v459_v14 = vshll.u32 %v306_v62, 16  ;;  %v440_v15 = vshrl.u32 %v304_v3, 16  ;;  %v443_v16 = vshll.u32 %v304_v3, 16  ;;  %v313_v61 = vld [vmem:[%s4513_s23 + $0x54] sm:$0xf] }
  0x21   : > { %v433_v18 = vrot.slane %v432_v9, 4  ;;  %v422_v19 = vor.u32 %v421_v10, %v418_v7  ;;  %v455_v20 = vrot.slane %v453_v12, 4  ;;  %v473_v21 = vshll.u32 %v308_v8, 16 }
  0x22   : > { %737 = vrot.lane.b32.xlu1 %v414_v4, %s4453_s24  ;;  %v404_v23 = vsel %vm4524_vm2, %v399_v13, %v403_v40  ;;  %v461_v24 = vrot.slane %v459_v14, 5  ;;  %v442_v25 = vrot.slane %v440_v15, 4  ;;  %v445_v26 = vrot.slane %v443_v16, 5  ;;  %v318_v15 = vld [vmem:[%s4513_s23 + $0x68] sm:$0x1] }
  0x23   : > { %735 = vrot.lane.b32.xlu0 %v404_v23, %s4453_s24  ;;  %v438_v29 = vsel %vm4524_vm2, %v433_v18, %v437_v6  ;;  %v423_v30 = vrot.slane %v422_v19, 4  ;;  %v456_v31 = vor.u32 %v455_v20, %v451_v11  ;;  %v475_v32 = vrot.slane %v473_v21, 5  ;;  %v317_v6 = vld [vmem:[%s4513_s23 + $0x64] sm:$0xf]  ;;  %v316_v16 = vld [vmem:[%s4513_s23 + $0x60] sm:$0xf] }
  0x24   : > { %v446_v33 = vor.u32 %v445_v26, %v442_v25  ;;  %v477_v34 = vshrl.u32 %v308_v8, 16  ;;  %v483_v35 = vshll.u32 %v309_v17, 16  ;;  %v464_v36 = vshrl.u32 %v307_v22, 16  ;;  %v320_v25 = vld [vmem:[%s4513_s23 + $0x70] sm:$0xf] }
  0x25   : > { %v428_v38 = vsel %vm4524_vm2, %v423_v30, %v427_v63  ;;  %v457_v39 = vrot.slane %v456_v31, 4  ;;  %v467_v40 = vshll.u32 %v307_v22, 16  ;;  %v497_v41 = vshll.u32 %v311_v28, 16 }
  0x26   : > { %741 = vrot.lane.b32.xlu1 %v438_v29, %s4453_s24  ;;  %v447_v43 = vrot.slane %v446_v33, 4  ;;  %v479_v44 = vrot.slane %v477_v34, 4  ;;  %v485_v45 = vrot.slane %v483_v35, 5  ;;  %v466_v46 = vrot.slane %v464_v36, 4  ;;  %v321_v35 = vld [vmem:[%s4513_s23 + $0x74] sm:$0x1] }
  0x27   : > { %739 = vrot.lane.b32.xlu0 %v428_v38, %s4453_s24  ;;  %v462_v48 = vsel %vm4524_vm2, %v457_v39, %v461_v24  ;;  %v469_v49 = vrot.slane %v467_v40, 5  ;;  %v499_v50 = vrot.slane %v497_v41, 5  ;;  %v501_v51 = vshrl.u32 %v311_v28, 16  ;;  %v319_v36 = vld [vmem:[%s4513_s23 + $0x6c] sm:$0xf] }
  0x28   : > { %v452_v52 = vsel %vm4524_vm2, %v447_v43, %v451_v11  ;;  %v480_v53 = vor.u32 %v479_v44, %v475_v32  ;;  %v507_v54 = vshll.u32 %v312_v37, 16  ;;  %v488_v55 = vshrl.u32 %v310_v42, 16 }
  0x29   : > { %v470_v57 = vor.u32 %v469_v49, %v466_v46  ;;  %v503_v58 = vrot.slane %v501_v51, 4  ;;  %v491_v59 = vshll.u32 %v310_v42, 16  ;;  %v521_v60 = vshll.u32 %v314_v47, 16 }
  0x2a   : > { %745 = vrot.lane.b32.xlu1 %v462_v48, %s4453_s24  ;;  %v481_v62 = vrot.slane %v480_v53, 4  ;;  %v509_v63 = vrot.slane %v507_v54, 5  ;;  %v490_v0 = vrot.slane %v488_v55, 4  ;;  %v525_v1 = vshrl.u32 %v314_v47, 16  ;;  %v324_v54 = vld [vmem:[%s4513_s23 + $0x80] sm:$0x1] }
  0x2b   : > { %743 = vrot.lane.b32.xlu0 %v452_v52, %s4453_s24  ;;  %v471_v2 = vrot.slane %v470_v57, 4  ;;  %v504_v3 = vor.u32 %v503_v58, %v499_v50  ;;  %v493_v4 = vrot.slane %v491_v59, 5  ;;  %v523_v5 = vrot.slane %v521_v60, 5  ;;  %v322_v55 = vld [vmem:[%s4513_s23 + $0x78] sm:$0xf] }
  0x2c   : > { %v486_v7 = vsel %vm4524_vm2, %v481_v62, %v485_v45  ;;  %v527_v8 = vrot.slane %v525_v1, 4  ;;  %v531_v9 = vshll.u32 %v315_v56, 16  ;;  %v512_v10 = vshrl.u32 %v313_v61, 16  ;;  %v323_v45 = vld [vmem:[%s4513_s23 + $0x7c] sm:$0xf] }
  0x2d   : > { %v476_v11 = vsel %vm4524_vm2, %v471_v2, %v475_v32  ;;  %v505_v12 = vrot.slane %v504_v3, 4  ;;  %v494_v13 = vor.u32 %v493_v4, %v490_v0  ;;  %v515_v14 = vshll.u32 %v313_v61, 16  ;;  %v326_v0 = vld [vmem:[%s4513_s23 + $0x88] sm:$0xf] }
  0x2e   : > { %749 = vrot.lane.b32.xlu1 %v486_v7, %s4453_s24  ;;  %v528_v17 = vor.u32 %v527_v8, %v523_v5  ;;  %v533_v18 = vrot.slane %v531_v9, 5  ;;  %v514_v19 = vrot.slane %v512_v10, 4  ;;  %v545_v20 = vshll.u32 %v317_v6, 16  ;;  %v325_v10 = vld [vmem:[%s4513_s23 + $0x84] sm:$0xf] }
  0x2f   : > { %747 = vrot.lane.b32.xlu0 %v476_v11, %s4453_s24  ;;  %v510_v21 = vsel %vm4524_vm2, %v505_v12, %v509_v63  ;;  %v495_v22 = vrot.slane %v494_v13, 4  ;;  %v517_v23 = vrot.slane %v515_v14, 5  ;;  %v549_v24 = vshrl.u32 %v317_v6, 16 }
  0x30   : > { %v529_v26 = vrot.slane %v528_v17, 4  ;;  %v547_v28 = vrot.slane %v545_v20, 5  ;;  %v555_v29 = vshll.u32 %v318_v15, 16  ;;  %v536_v30 = vshrl.u32 %v316_v16, 16 }
  0x31   : > { %v500_v31 = vsel %vm4524_vm2, %v495_v22, %v499_v50  ;;  %v518_v32 = vor.u32 %v517_v23, %v514_v19  ;;  %v551_v33 = vrot.slane %v549_v24, 4  ;;  %v539_v34 = vshll.u32 %v316_v16, 16  ;;  %v329_v19 = vld [vmem:[%s4513_s23 + $0x94] sm:$0xf]  ;;  %v330_v24 = vld [vmem:[%s4513_s23 + $0x98] sm:$0x1] }
  0x32   : > { %753 = vrot.lane.b32.xlu1 %v510_v21, %s4453_s24  ;;  %v534_v37 = vsel %vm4524_vm2, %v529_v26, %v533_v18  ;;  %v557_v38 = vrot.slane %v555_v29, 5  ;;  %v538_v39 = vrot.slane %v536_v30, 4  ;;  %v569_v40 = vshll.u32 %v320_v25, 16  ;;  %v328_v30 = vld [vmem:[%s4513_s23 + $0x90] sm:$0xf] }
  0x33   : > { %751 = vrot.lane.b32.xlu0 %v500_v31, %s4453_s24  ;;  %v519_v41 = vrot.slane %v518_v32, 4  ;;  %v552_v42 = vor.u32 %v551_v33, %v547_v28  ;;  %v541_v43 = vrot.slane %v539_v34, 5  ;;  %v573_v44 = vshrl.u32 %v320_v25, 16 }
  0x34   : > { %v571_v46 = vrot.slane %v569_v40, 5  ;;  %v579_v47 = vshll.u32 %v321_v35, 16  ;;  %v560_v48 = vshrl.u32 %v319_v36, 16  ;;  %v563_v49 = vshll.u32 %v319_v36, 16 }
  0x35   : > { %v524_v50 = vsel %vm4524_vm2, %v519_v41, %v523_v5  ;;  %v553_v51 = vrot.slane %v552_v42, 4  ;;  %v542_v52 = vor.u32 %v541_v43, %v538_v39  ;;  %v575_v53 = vrot.slane %v573_v44, 4  ;;  %v327_v5 = vld [vmem:[%s4513_s23 + $0x8c] sm:$0x1]  ;;  %v332_v39 = vld [vmem:[%s4513_s23 + $0xa0] sm:$0xf] }
  0x36   : > { %757 = vrot.lane.b32.xlu1 %v534_v37, %s4453_s24  ;;  %v581_v56 = vrot.slane %v579_v47, 5  ;;  %v562_v57 = vrot.slane %v560_v48, 4  ;;  %v565_v58 = vrot.slane %v563_v49, 5  ;;  %v593_v59 = vshll.u32 %v323_v45, 16  ;;  %v333_v48 = vld [vmem:[%s4513_s23 + $0xa4] sm:$0x1] }
  0x37   : > { %755 = vrot.lane.b32.xlu0 %v524_v50, %s4453_s24  ;;  %v558_v60 = vsel %vm4524_vm2, %v553_v51, %v557_v38  ;;  %v543_v61 = vrot.slane %v542_v52, 4  ;;  %v576_v62 = vor.u32 %v575_v53, %v571_v46  ;;  %v597_v63 = vshrl.u32 %v323_v45, 16  ;;  %v331_v49 = vld [vmem:[%s4513_s23 + $0x9c] sm:$0xf] }
  0x38   : > { %v566_v1 = vor.u32 %v565_v58, %v562_v57  ;;  %v595_v2 = vrot.slane %v593_v59, 5  ;;  %v603_v3 = vshll.u32 %v324_v54, 16  ;;  %v584_v4 = vshrl.u32 %v322_v55, 16  ;;  %v335_v58 = vld [vmem:[%s4513_s23 + $0xac] sm:$0xf] }
  0x39   : > { %v548_v6 = vsel %vm4524_vm2, %v543_v61, %v547_v28  ;;  %v577_v7 = vrot.slane %v576_v62, 4  ;;  %v599_v8 = vrot.slane %v597_v63, 4  ;;  %v587_v9 = vshll.u32 %v322_v55, 16 }
  0x3a   : > { %761 = vrot.lane.b32.xlu1 %v558_v60, %s4453_s24  ;;  %v567_v11 = vrot.slane %v566_v1, 4  ;;  %v605_v12 = vrot.slane %v603_v3, 5  ;;  %v586_v13 = vrot.slane %v584_v4, 4  ;;  %v617_v14 = vshll.u32 %v326_v0, 16  ;;  %v336_v3 = vld [vmem:[%s4513_s23 + $0xb0] sm:$0x1] }
  0x3b   : > { %759 = vrot.lane.b32.xlu0 %v548_v6, %s4453_s24  ;;  %v582_v15 = vsel %vm4524_vm2, %v577_v7, %v581_v56  ;;  %v600_v16 = vor.u32 %v599_v8, %v595_v2  ;;  %v589_v17 = vrot.slane %v587_v9, 5  ;;  %v621_v18 = vshrl.u32 %v326_v0, 16  ;;  %v334_v4 = vld [vmem:[%s4513_s23 + $0xa8] sm:$0xf] }
  0x3c   : > { %v572_v20 = vsel %vm4524_vm2, %v567_v11, %v571_v46  ;;  %v619_v21 = vrot.slane %v617_v14, 5  ;;  %v627_v22 = vshll.u32 %v327_v5, 16  ;;  %v608_v23 = vshrl.u32 %v325_v10, 16 }
  0x3d   : > { %v601_v25 = vrot.slane %v600_v16, 4  ;;  %v590_v26 = vor.u32 %v589_v17, %v586_v13  ;;  %v623_v28 = vrot.slane %v621_v18, 4  ;;  %v611_v29 = vshll.u32 %v325_v10, 16  ;;  %v338_v13 = vld [vmem:[%s4513_s23 + $0xb8] sm:$0xf] }
  0x3e   : > { %765 = vrot.lane.b32.xlu1 %v582_v15, %s4453_s24  ;;  %v629_v31 = vrot.slane %v627_v22, 5  ;;  %v610_v32 = vrot.slane %v608_v23, 4  ;;  %v641_v33 = vshll.u32 %v329_v19, 16  ;;  %v645_v34 = vshrl.u32 %v329_v19, 16  ;;  %v339_v22 = vld [vmem:[%s4513_s23 + $0xbc] sm:$0x1] }
  0x3f   : > { %763 = vrot.lane.b32.xlu0 %v572_v20, %s4453_s24  ;;  %v606_v35 = vsel %vm4524_vm2, %v601_v25, %v605_v12  ;;  %v591_v36 = vrot.slane %v590_v26, 4  ;;  %v624_v37 = vor.u32 %v623_v28, %v619_v21  ;;  %v613_v38 = vrot.slane %v611_v29, 5  ;;  %v337_v23 = vld [vmem:[%s4513_s23 + $0xb4] sm:$0xf] }
  0x40   : > { %v643_v40 = vrot.slane %v641_v33, 5  ;;  %v647_v41 = vrot.slane %v645_v34, 4  ;;  %v651_v42 = vshll.u32 %v330_v24, 16  ;;  %v632_v43 = vshrl.u32 %v328_v30, 16 }
  0x41   : > { %v596_v44 = vsel %vm4524_vm2, %v591_v36, %v595_v2  ;;  %v625_v45 = vrot.slane %v624_v37, 4  ;;  %v614_v46 = vor.u32 %v613_v38, %v610_v32  ;;  %v635_v47 = vshll.u32 %v328_v30, 16  ;;  %v857_v37 = vld [vmem:[%s4513_s23 + $0x4] sm:$0xf] }
  0x42   : > { %769 = vrot.lane.b32.xlu1 %v606_v35, %s4453_s24  ;;  %v648_v50 = vor.u32 %v647_v41, %v643_v40  ;;  %v653_v51 = vrot.slane %v651_v42, 5  ;;  %v634_v52 = vrot.slane %v632_v43, 4  ;;  %v665_v53 = vshll.u32 %v332_v39, 16 }
  0x43   : > { %767 = vrot.lane.b32.xlu0 %v596_v44, %s4453_s24  ;;  %v630_v54 = vsel %vm4524_vm2, %v625_v45, %v629_v31  ;;  %v615_v55 = vrot.slane %v614_v46, 4  ;;  %v637_v56 = vrot.slane %v635_v47, 5  ;;  %v669_v57 = vshrl.u32 %v332_v39, 16 }
  0x44   : > { %v649_v59 = vrot.slane %v648_v50, 4  ;;  %v667_v60 = vrot.slane %v665_v53, 5  ;;  %v675_v61 = vshll.u32 %v333_v48, 16  ;;  %v656_v62 = vshrl.u32 %v331_v49, 16  ;;  %v858_v48 = vld [vmem:[%s4513_s23 + $0x8] sm:$0x1] }
  0x45   : > { %v620_v63 = vsel %vm4524_vm2, %v615_v55, %v619_v21  ;;  %v638_v0 = vor.u32 %v637_v56, %v634_v52  ;;  %v671_v1 = vrot.slane %v669_v57, 4  ;;  %v659_v2 = vshll.u32 %v331_v49, 16  ;;  %v229_v56 = vld [vmem:[%s4513_s23 + $0xc] sm:$0xf] }
  0x46   : > { %773 = vrot.lane.b32.xlu1 %v630_v54, %s4453_s24  ;;  %v654_v5 = vsel %vm4524_vm2, %v649_v59, %v653_v51  ;;  %v677_v6 = vrot.slane %v675_v61, 5  ;;  %v658_v7 = vrot.slane %v656_v62, 4  ;;  %v689_v8 = vshll.u32 %v335_v58, 16  ;;  %v860_v51 = vld [vmem:[%s4513_s23 + $0x10] sm:$0xf] }
  0x47   : > { %771 = vrot.lane.b32.xlu0 %v620_v63, %s4453_s24  ;;  %v639_v9 = vrot.slane %v638_v0, 4  ;;  %v672_v10 = vor.u32 %v671_v1, %v667_v60  ;;  %v661_v11 = vrot.slane %v659_v2, 5  ;;  %v693_v12 = vshrl.u32 %v335_v58, 16  ;;  %v856_v54 = vld [vmem:[%s4513_s23] sm:$0xe] }
  0x48   : > { %v691_v14 = vrot.slane %v689_v8, 5  ;;  %v699_v15 = vshll.u32 %v336_v3, 16  ;;  %v680_v16 = vshrl.u32 %v334_v4, 16  ;;  %v683_v17 = vshll.u32 %v334_v4, 16  ;;  %262 = vst.msk [vmem:[#allocation2 + $0x8] sm:$0xf] %vm259_vm3, %v229_v56 }
  0x49   : > { %v644_v18 = vsel %vm4524_vm2, %v639_v9, %v643_v40  ;;  %v673_v19 = vrot.slane %v672_v10, 4  ;;  %v662_v20 = vor.u32 %v661_v11, %v658_v7  ;;  %v695_v21 = vrot.slane %v693_v12, 4  ;;  %v227_v61 = vld [vmem:[%s4513_s23] sm:$0xf]  ;;  %v861_v0 = vld [vmem:[%s4513_s23 + $0x14] sm:$0x1] }
  0x4a   : > { %777 = vrot.lane.b32.xlu1 %v654_v5, %s4453_s24  ;;  %v701_v24 = vrot.slane %v699_v15, 5  ;;  %v682_v25 = vrot.slane %v680_v16, 4  ;;  %v685_v26 = vrot.slane %v683_v17, 5  ;;  %v713_v28 = vshll.u32 %v338_v13, 16  ;;  %v863_v1 = vld [vmem:[%s4513_s23 + $0x1c] sm:$0xf] }
  0x4b   : > { %775 = vrot.lane.b32.xlu0 %v644_v18, %s4453_s24  ;;  %v678_v29 = vsel %vm4524_vm2, %v673_v19, %v677_v6  ;;  %v663_v30 = vrot.slane %v662_v20, 4  ;;  %v696_v31 = vor.u32 %v695_v21, %v691_v14  ;;  %v717_v32 = vshrl.u32 %v338_v13, 16  ;;  %260 = vst.msk [vmem:[#allocation2] sm:$0xf] %vm259_vm3, %v227_v61  ;;  %v859_v3 = vld [vmem:[%s4513_s23 + $0xc] sm:$0xe] }
  0x4c   : > { %v686_v33 = vor.u32 %v685_v26, %v682_v25  ;;  %v715_v34 = vrot.slane %v713_v28, 5  ;;  %v723_v35 = vshll.u32 %v339_v22, 16  ;;  %v704_v36 = vshrl.u32 %v337_v23, 16  ;;  %v230_v4 = vld [vmem:[%s4513_s23 + $0x10] sm:$0xf] }
  0x4d   : > { %v668_v38 = vsel %vm4524_vm2, %v663_v30, %v667_v60  ;;  %v697_v39 = vrot.slane %v696_v31, 4  ;;  %v719_v40 = vrot.slane %v717_v32, 4  ;;  %v707_v41 = vshll.u32 %v337_v23, 16  ;;  %v228_v5 = vld [vmem:[%s4513_s23 + $0x4] sm:$0xf] }
  0x4e   : > { %781 = vrot.lane.b32.xlu1 %v678_v29, %s4453_s24  ;;  %v687_v42 = vrot.slane %v686_v33, 4  ;;  %v725_v43 = vrot.slane %v723_v35, 5  ;;  %v706_v44 = vrot.slane %v704_v36, 4  ;;  %v957_v49 = vrot.slane %v857_v37, 5  ;;  %263 = vst.msk [vmem:[#allocation2 + $0xc] sm:$0xf] %vm259_vm3, %v230_v4 }
  0x4f   : > { %779 = vrot.lane.b32.xlu0 %v668_v38, %s4453_s24  ;;  %v702_v45 = vsel %vm4524_vm2, %v697_v39, %v701_v24  ;;  %v720_v46 = vor.u32 %v719_v40, %v715_v34  ;;  %v709_v47 = vrot.slane %v707_v41, 5  ;;  %v960_v55 = vrot.slane %v858_v48, 5  ;;  %261 = vst.msk [vmem:[#allocation2 + $0x4] sm:$0xf] %vm259_vm3, %v228_v5  ;;  %v864_v12 = vld [vmem:[%s4513_s23 + $0x20] sm:$0x1] }
  0x50   : > { %v692_v50 = vsel %vm4524_vm2, %v687_v42, %v691_v14  ;;  %v959_v59 = vrot.slane %v957_v49, 4  ;;  %v964_v60 = vrot.slane %v860_v51, 5  ;;  %v3969_v63 = vrot.slane %v856_v54, 9  ;;  %v866_v13 = vld [vmem:[%s4513_s23 + $0x28] sm:$0xf] }
  0x51   : > { %v721_v52 = vrot.slane %v720_v46, 4  ;;  %v710_v53 = vor.u32 %v709_v47, %v706_v44  ;;  %v967_v8 = vrot.slane %v861_v0, 5  ;;  %v971_v9 = vrot.slane %v863_v1, 5  ;;  %v862_v14 = vld [vmem:[%s4513_s23 + $0x18] sm:$0xe] }
  0x52   : > { %785 = vrot.lane.b32.xlu1 %v702_v45, %s4453_s24  ;;  %v961_v6 = vsel %vm4668_vm6, %v959_v59, %v960_v55  ;;  %v966_v7 = vrot.slane %v964_v60, 4  ;;  %v958_v10 = vsel %vm4668_vm6, %v3969_v63, %v957_v49  ;;  %v3970_v11 = vrot.slane %v859_v3, 9  ;;  %v232_v15 = vld [vmem:[%s4513_s23 + $0x1c] sm:$0xf]  ;;  %v231_v16 = vld [vmem:[%s4513_s23 + $0x18] sm:$0xf] }
  0x53   : > { %783 = vrot.lane.b32.xlu0 %v692_v50, %s4453_s24  ;;  %v726_v57 = vsel %vm4524_vm2, %v721_v52, %v725_v43  ;;  %v711_v58 = vrot.slane %v710_v53, 4  ;;  %265 = vst.msk [vmem:[#allocation2 + $0x14] sm:$0xf] %vm259_vm3, %v232_v15  ;;  %v973_v18 = vrot.slane %v971_v9, 4  ;;  %v974_v19 = vrot.slane %v864_v12, 5 }
  0x54   : > { %v968_v17 = vsel %vm4668_vm6, %v966_v7, %v967_v8  ;;  %v978_v20 = vrot.slane %v866_v13, 5  ;;  %264 = vst.msk [vmem:[#allocation2 + $0x10] sm:$0xf] %vm259_vm3, %v231_v16  ;;  %v965_v21 = vsel %vm4668_vm6, %v3970_v11, %v964_v60  ;;  %v3971_v22 = vrot.slane %v862_v14, 9  ;;  %v867_v23 = vld [vmem:[%s4513_s23 + $0x2c] sm:$0x1] }
  0x55   : > { %v716_v2 = vsel %vm4524_vm2, %v711_v58, %v715_v34  ;;  %v869_v24 = vld [vmem:[%s4513_s23 + $0x34] sm:$0xf]  ;;  %v865_v25 = vld [vmem:[%s4513_s23 + $0x24] sm:$0xe]  ;;  %v234_v26 = vld [vmem:[%s4513_s23 + $0x28] sm:$0xf]  ;;  %v975_v29 = vsel %vm4668_vm6, %v973_v18, %v974_v19 }
  0x56   : > { %789 = vrot.lane.b32.xlu1 %v726_v57, %s4453_s24  ;;  %267 = vst.msk [vmem:[#allocation2 + $0x1c] sm:$0xf] %vm259_vm3, %v234_v26  ;;  %v233_v28 = vld [vmem:[%s4513_s23 + $0x24] sm:$0xf]  ;;  %v980_v30 = vrot.slane %v978_v20, 4  ;;  %v981_v31 = vrot.slane %v867_v23, 5  ;;  %v972_v34 = vsel %vm4668_vm6, %v3971_v22, %v971_v9 }
  0x57   : > { %787 = vrot.lane.b32.xlu0 %v716_v2, %s4453_s24  ;;  %v870_v32 = vld [vmem:[%s4513_s23 + $0x38] sm:$0x1]  ;;  %v985_v33 = vrot.slane %v869_v24, 5  ;;  %266 = vst.msk [vmem:[#allocation2 + $0x18] sm:$0xf] %vm259_vm3, %v233_v28  ;;  %v3972_v35 = vrot.slane %v865_v25, 9 }
  0x58   : > { %v872_v36 = vld [vmem:[%s4513_s23 + $0x40] sm:$0xf]  ;;  %v236_v37 = vld [vmem:[%s4513_s23 + $0x34] sm:$0xf]  ;;  %v868_v38 = vld [vmem:[%s4513_s23 + $0x30] sm:$0xe]  ;;  %v982_v41 = vsel %vm4668_vm6, %v980_v30, %v981_v31 }
  0x59   : > { %269 = vst.msk [vmem:[#allocation2 + $0x24] sm:$0xf] %vm259_vm3, %v236_v37  ;;  %v235_v39 = vld [vmem:[%s4513_s23 + $0x30] sm:$0xf]  ;;  %v873_v40 = vld [vmem:[%s4513_s23 + $0x44] sm:$0x1]  ;;  %v979_v46 = vsel %vm4668_vm6, %v3972_v35, %v978_v20 }
  0x5a   : > { %1069 = vrot.lane.b32.xlu1 %v961_v6, %s4454_s25  ;;  %268 = vst.msk [vmem:[#allocation2 + $0x20] sm:$0xf] %vm259_vm3, %v235_v39  ;;  %v987_v42 = vrot.slane %v985_v33, 4  ;;  %v988_v43 = vrot.slane %v870_v32, 5  ;;  %v992_v44 = vrot.slane %v872_v36, 5  ;;  %v3973_v47 = vrot.slane %v868_v38, 9 }
  0x5b   : > { %1067 = vrot.lane.b32.xlu0 %v958_v10, %s4454_s25  ;;  %v238_v45 = vld [vmem:[%s4513_s23 + $0x40] sm:$0xf]  ;;  %v875_v48 = vld [vmem:[%s4513_s23 + $0x4c] sm:$0xf]  ;;  %v237_v49 = vld [vmem:[%s4513_s23 + $0x3c] sm:$0xf] }
  0x5c   : > { %271 = vst.msk [vmem:[#allocation2 + $0x2c] sm:$0xf] %vm259_vm3, %v238_v45  ;;  %v871_v50 = vld [vmem:[%s4513_s23 + $0x3c] sm:$0xe]  ;;  %270 = vst.msk [vmem:[#allocation2 + $0x28] sm:$0xf] %vm259_vm3, %v237_v49  ;;  %v989_v53 = vsel %vm4668_vm6, %v987_v42, %v988_v43  ;;  %v986_v58 = vsel %vm4668_vm6, %v3973_v47, %v985_v33 }
  0x5d   : > { %v876_v51 = vld [vmem:[%s4513_s23 + $0x50] sm:$0x1]  ;;  %v240_v52 = vld [vmem:[%s4513_s23 + $0x4c] sm:$0xf]  ;;  %v994_v54 = vrot.slane %v992_v44, 4  ;;  %v995_v55 = vrot.slane %v873_v40, 5 }
  0x5e   : > { %1073 = vrot.lane.b32.xlu1 %v968_v17, %s4454_s25  ;;  %v999_v56 = vrot.slane %v875_v48, 5  ;;  %273 = vst.msk [vmem:[#allocation2 + $0x34] sm:$0xf] %vm259_vm3, %v240_v52  ;;  %v239_v57 = vld [vmem:[%s4513_s23 + $0x48] sm:$0xf]  ;;  %v3974_v59 = vrot.slane %v871_v50, 9 }
  0x5f   : > { %1071 = vrot.lane.b32.xlu0 %v965_v21, %s4454_s25  ;;  %v4745_v60 = vld [vmem:[%s4513_s23 + $0x58] sm:$0xf]  ;;  %272 = vst.msk [vmem:[#allocation2 + $0x30] sm:$0xf] %vm259_vm3, %v239_v57  ;;  %v874_v63 = vld [vmem:[%s4513_s23 + $0x48] sm:$0xe]  ;;  %v996_v5 = vsel %vm4668_vm6, %v994_v54, %v995_v55 }
  0x60   : > { %v242_v61 = vld [vmem:[%s4513_s23 + $0x58] sm:$0xf]  ;;  %v879_v0 = vld [vmem:[%s4513_s23 + $0x5c] sm:$0x1]  ;;  %v241_v1 = vld [vmem:[%s4513_s23 + $0x54] sm:$0xf]  ;;  %v993_v10 = vsel %vm4668_vm6, %v3974_v59, %v992_v44 }
  0x61   : > { %275 = vst.msk [vmem:[#allocation2 + $0x3c] sm:$0xf] %vm259_vm3, %v242_v61  ;;  %v1002_v2 = vrot.slane %v876_v51, 5  ;;  %274 = vst.msk [vmem:[#allocation2 + $0x38] sm:$0xf] %vm259_vm3, %v241_v1  ;;  %v1001_v6 = vrot.slane %v999_v56, 4 }
  0x62   : > { %1077 = vrot.lane.b32.xlu1 %v975_v29, %s4454_s25  ;;  %v244_v3 = vld [vmem:[%s4513_s23 + $0x64] sm:$0xf]  ;;  %v243_v4 = vld [vmem:[%s4513_s23 + $0x60] sm:$0xf]  ;;  %v1006_v7 = vrot.slane %v4745_v60, 5  ;;  %v3975_v11 = vrot.slane %v874_v63, 9 }
  0x63   : > { %1075 = vrot.lane.b32.xlu0 %v972_v34, %s4454_s25  ;;  %277 = vst.msk [vmem:[#allocation2 + $0x44] sm:$0xf] %vm259_vm3, %v244_v3  ;;  %276 = vst.msk [vmem:[#allocation2 + $0x40] sm:$0xf] %vm259_vm3, %v243_v4  ;;  %v246_v8 = vld [vmem:[%s4513_s23 + $0x70] sm:$0xf]  ;;  %v1003_v20 = vsel %vm4668_vm6, %v1001_v6, %v1002_v2 }
  0x64   : > { %v245_v9 = vld [vmem:[%s4513_s23 + $0x6c] sm:$0xf]  ;;  %v881_v12 = vld [vmem:[%s4513_s23 + $0x64] sm:$0xf]  ;;  %279 = vst.msk [vmem:[#allocation2 + $0x4c] sm:$0xf] %vm259_vm3, %v246_v8  ;;  %v1000_v25 = vsel %vm4668_vm6, %v3975_v11, %v999_v56 }
  0x65   : > { %278 = vst.msk [vmem:[#allocation2 + $0x48] sm:$0xf] %vm259_vm3, %v245_v9  ;;  %v248_v13 = vld [vmem:[%s4513_s23 + $0x7c] sm:$0xf]  ;;  %v877_v14 = vld [vmem:[%s4513_s23 + $0x54] sm:$0xe] }
  0x66   : > { %1081 = vrot.lane.b32.xlu1 %v982_v41, %s4454_s25  ;;  %v882_v15 = vld [vmem:[%s4513_s23 + $0x68] sm:$0x1]  ;;  %281 = vst.msk [vmem:[#allocation2 + $0x54] sm:$0xf] %vm259_vm3, %v248_v13  ;;  %v247_v16 = vld [vmem:[%s4513_s23 + $0x78] sm:$0xf] }
  0x67   : > { %1079 = vrot.lane.b32.xlu0 %v979_v46, %s4454_s25  ;;  %v1009_v17 = vrot.slane %v879_v0, 5  ;;  %280 = vst.msk [vmem:[#allocation2 + $0x50] sm:$0xf] %vm259_vm3, %v247_v16  ;;  %v250_v18 = vld [vmem:[%s4513_s23 + $0x88] sm:$0xf]  ;;  %v1008_v21 = vrot.slane %v1006_v7, 4 }
  0x68   : > { %v249_v19 = vld [vmem:[%s4513_s23 + $0x84] sm:$0xf]  ;;  %v1013_v22 = vrot.slane %v881_v12, 5  ;;  %283 = vst.msk [vmem:[#allocation2 + $0x5c] sm:$0xf] %vm259_vm3, %v250_v18  ;;  %v3976_v26 = vrot.slane %v877_v14, 9 }
  0x69   : > { %282 = vst.msk [vmem:[#allocation2 + $0x58] sm:$0xf] %vm259_vm3, %v249_v19  ;;  %v252_v23 = vld [vmem:[%s4513_s23 + $0x94] sm:$0xf]  ;;  %v251_v24 = vld [vmem:[%s4513_s23 + $0x90] sm:$0xf]  ;;  %v1010_v35 = vsel %vm4668_vm6, %v1008_v21, %v1009_v17 }
  0x6a   : > { %1085 = vrot.lane.b32.xlu1 %v989_v53, %s4454_s25  ;;  %v884_v28 = vld [vmem:[%s4513_s23 + $0x70] sm:$0xf]  ;;  %285 = vst.msk [vmem:[#allocation2 + $0x64] sm:$0xf] %vm259_vm3, %v252_v23  ;;  %284 = vst.msk [vmem:[#allocation2 + $0x60] sm:$0xf] %vm259_vm3, %v251_v24  ;;  %v1007_v40 = vsel %vm4668_vm6, %v3976_v26, %v1006_v7 }
  0x6b   : > { %1083 = vrot.lane.b32.xlu0 %v986_v58, %s4454_s25  ;;  %v254_v29 = vld [vmem:[%s4513_s23 + $0xa0] sm:$0xf]  ;;  %v253_v31 = vld [vmem:[%s4513_s23 + $0x9c] sm:$0xf]  ;;  %v1016_v32 = vrot.slane %v882_v15, 5  ;;  %v1015_v36 = vrot.slane %v1013_v22, 4 }
  0x6c   : > { %v880_v30 = vld [vmem:[%s4513_s23 + $0x60] sm:$0xe]  ;;  %287 = vst.msk [vmem:[#allocation2 + $0x6c] sm:$0xf] %vm259_vm3, %v254_v29  ;;  %286 = vst.msk [vmem:[#allocation2 + $0x68] sm:$0xf] %vm259_vm3, %v253_v31 }
  0x6d   : > { %v256_v33 = vld [vmem:[%s4513_s23 + $0xac] sm:$0xf]  ;;  %v255_v34 = vld [vmem:[%s4513_s23 + $0xa8] sm:$0xf]  ;;  %v1020_v37 = vrot.slane %v884_v28, 5  ;;  %v3977_v41 = vrot.slane %v880_v30, 9  ;;  %v1017_v45 = vsel %vm4668_vm6, %v1015_v36, %v1016_v32 }
  0x6e   : > { %1089 = vrot.lane.b32.xlu1 %v996_v5, %s4454_s25  ;;  %289 = vst.msk [vmem:[#allocation2 + $0x74] sm:$0xf] %vm259_vm3, %v256_v33  ;;  %288 = vst.msk [vmem:[#allocation2 + $0x70] sm:$0xf] %vm259_vm3, %v255_v34  ;;  %v258_v38 = vld [vmem:[%s4513_s23 + $0xb8] sm:$0xf] }
  0x6f   : > { %1087 = vrot.lane.b32.xlu0 %v993_v10, %s4454_s25  ;;  %v257_v39 = vld [vmem:[%s4513_s23 + $0xb4] sm:$0xf]  ;;  %v887_v43 = vld [vmem:[%s4513_s23 + $0x7c] sm:$0xf]  ;;  %291 = vst.msk [vmem:[#allocation2 + $0x7c] sm:$0xf] %vm259_vm3, %v258_v38  ;;  %v1014_v49 = vsel %vm4668_vm6, %v3977_v41, %v1013_v22 }
  0x70   : > { %v885_v42 = vld [vmem:[%s4513_s23 + $0x74] sm:$0x1]  ;;  %290 = vst.msk [vmem:[#allocation2 + $0x78] sm:$0xf] %vm259_vm3, %v257_v39  ;;  %v883_v44 = vld [vmem:[%s4513_s23 + $0x6c] sm:$0xe] }
  0x71   : > { %v1022_v46 = vrot.slane %v1020_v37, 4  ;;  %v1023_v47 = vrot.slane %v885_v42, 5  ;;  %v1027_v48 = vrot.slane %v887_v43, 5  ;;  %v3978_v50 = vrot.slane %v883_v44, 9  ;;  %v888_v51 = vld [vmem:[%s4513_s23 + $0x80] sm:$0x1] }
  0x72   : > { %1093 = vrot.lane.b32.xlu1 %v1003_v20, %s4454_s25  ;;  %v890_v52 = vld [vmem:[%s4513_s23 + $0x88] sm:$0xf]  ;;  %v886_v53 = vld [vmem:[%s4513_s23 + $0x78] sm:$0xe]  ;;  %v1030_v56 = vrot.slane %v888_v51, 5 }
  0x73   : > { %1091 = vrot.lane.b32.xlu0 %v1000_v25, %s4454_s25  ;;  %v1024_v54 = vsel %vm4668_vm6, %v1022_v46, %v1023_v47  ;;  %v1029_v55 = vrot.slane %v1027_v48, 4  ;;  %v1034_v57 = vrot.slane %v890_v52, 5  ;;  %v1021_v58 = vsel %vm4668_vm6, %v3978_v50, %v1020_v37  ;;  %v891_v60 = vld [vmem:[%s4513_s23 + $0x8c] sm:$0x1]  ;;  %v893_v61 = vld [vmem:[%s4513_s23 + $0x94] sm:$0xf] }
  0x74   : > { %v3979_v59 = vrot.slane %v886_v53, 9  ;;  %v889_v63 = vld [vmem:[%s4513_s23 + $0x84] sm:$0xe]  ;;  %v1037_v2 = vrot.slane %v891_v60, 5  ;;  %v1041_v3 = vrot.slane %v893_v61, 5 }
  0x75   : > { %v1031_v0 = vsel %vm4668_vm6, %v1029_v55, %v1030_v56  ;;  %v1036_v1 = vrot.slane %v1034_v57, 4  ;;  %v3980_v5 = vrot.slane %v889_v63, 9  ;;  %v894_v6 = vld [vmem:[%s4513_s23 + $0x98] sm:$0x1]  ;;  %v896_v7 = vld [vmem:[%s4513_s23 + $0xa0] sm:$0xf] }
  0x76   : > { %1097 = vrot.lane.b32.xlu1 %v1010_v35, %s4454_s25  ;;  %v1028_v4 = vsel %vm4668_vm6, %v3979_v59, %v1027_v48  ;;  %v892_v8 = vld [vmem:[%s4513_s23 + $0x90] sm:$0xe]  ;;  %v1043_v10 = vrot.slane %v1041_v3, 4  ;;  %v1044_v11 = vrot.slane %v894_v6, 5  ;;  %v1048_v12 = vrot.slane %v896_v7, 5 }
  0x77   : > { %1095 = vrot.lane.b32.xlu0 %v1007_v40, %s4454_s25  ;;  %v1038_v9 = vsel %vm4668_vm6, %v1036_v1, %v1037_v2  ;;  %v1035_v13 = vsel %vm4668_vm6, %v3980_v5, %v1034_v57  ;;  %v3981_v14 = vrot.slane %v892_v8, 9  ;;  %v897_v15 = vld [vmem:[%s4513_s23 + $0xa4] sm:$0x1]  ;;  %v899_v16 = vld [vmem:[%s4513_s23 + $0xac] sm:$0xf] }
  0x78   : > { %v895_v17 = vld [vmem:[%s4513_s23 + $0x9c] sm:$0xe]  ;;  %v1045_v18 = vsel %vm4668_vm6, %v1043_v10, %v1044_v11  ;;  %v1050_v19 = vrot.slane %v1048_v12, 4  ;;  %v1051_v20 = vrot.slane %v897_v15, 5  ;;  %v1055_v21 = vrot.slane %v899_v16, 5 }
  0x79   : > { %v1042_v22 = vsel %vm4668_vm6, %v3981_v14, %v1041_v3  ;;  %v3982_v23 = vrot.slane %v895_v17, 9  ;;  %v900_v24 = vld [vmem:[%s4513_s23 + $0xb0] sm:$0x1]  ;;  %v902_v25 = vld [vmem:[%s4513_s23 + $0xb8] sm:$0xf] }
  0x7a   : > { %1101 = vrot.lane.b32.xlu1 %v1017_v45, %s4454_s25  ;;  %v898_v26 = vld [vmem:[%s4513_s23 + $0xa8] sm:$0xe]  ;;  %v1052_v28 = vsel %vm4668_vm6, %v1050_v19, %v1051_v20  ;;  %v1057_v29 = vrot.slane %v1055_v21, 4  ;;  %v1058_v30 = vrot.slane %v900_v24, 5  ;;  %v1062_v31 = vrot.slane %v902_v25, 5 }
  0x7b   : > { %1099 = vrot.lane.b32.xlu0 %v1014_v49, %s4454_s25  ;;  %v1049_v33 = vsel %vm4668_vm6, %v3982_v23, %v1048_v12  ;;  %v3983_v34 = vrot.slane %v898_v26, 9  ;;  %v903_v35 = vld [vmem:[%s4513_s23 + $0xbc] sm:$0x1]  ;;  %v901_v37 = vld [vmem:[%s4513_s23 + $0xb4] sm:$0xe] }
  0x7c   : > { %v1059_v38 = vsel %vm4668_vm6, %v1057_v29, %v1058_v30  ;;  %v1064_v39 = vrot.slane %v1062_v31, 4  ;;  %v1065_v40 = vrot.slane %v903_v35, 5  ;;  %v3984_v43 = vrot.slane %v901_v37, 9  ;;  %v3986_v49 = vld [vmem:[%s4513_s23 + $0x10] sm:$0xf] }
  0x7d   : > { %v1056_v42 = vsel %vm4668_vm6, %v3983_v34, %v1055_v21  ;;  %v3985_v51 = vld [vmem:[%s4513_s23 + $0xc] sm:$0xf]  ;;  %v3988_v53 = vld [vmem:[%s4513_s23 + $0x1c] sm:$0xf]  ;;  %v3987_v55 = vld [vmem:[%s4513_s23 + $0x18] sm:$0xf] }
  0x7e   : > { %1105 = vrot.lane.b32.xlu1 %v1024_v54, %s4454_s25  ;;  %v1066_v45 = vsel %vm4668_vm6, %v1064_v39, %v1065_v40  ;;  %v1063_v47 = vsel %vm4668_vm6, %v3984_v43, %v1062_v31  ;;  %v3990_v57 = vld [vmem:[%s4513_s23 + $0x28] sm:$0xf]  ;;  %v3989_v59 = vld [vmem:[%s4513_s23 + $0x24] sm:$0xf]  ;;  %v3992_v61 = vld [vmem:[%s4513_s23 + $0x34] sm:$0xf] }
  0x7f   : > { %1103 = vrot.lane.b32.xlu0 %v1021_v58, %s4454_s25  ;;  %v3994_v2 = vld [vmem:[%s4513_s23 + $0x40] sm:$0xf]  ;;  %v3996_v6 = vld [vmem:[%s4513_s23 + $0x4c] sm:$0xf]  ;;  %v3995_v8 = vld [vmem:[%s4513_s23 + $0x48] sm:$0xf] }
  0x80   : > { %v3998_v10 = vld [vmem:[%s4513_s23 + $0x58] sm:$0xf]  ;;  %v3997_v12 = vld [vmem:[%s4513_s23 + $0x54] sm:$0xf]  ;;  %v4000_v14 = vld [vmem:[%s4513_s23 + $0x64] sm:$0xf] }
  0x81   : > { %v3999_v16 = vld [vmem:[%s4513_s23 + $0x60] sm:$0xf]  ;;  %v4001_v20 = vld [vmem:[%s4513_s23 + $0x6c] sm:$0xf]  ;;  %v4003_v24 = vld [vmem:[%s4513_s23 + $0x78] sm:$0xf] }
  0x82   : > { %1109 = vrot.lane.b32.xlu1 %v1031_v0, %s4454_s25  ;;  %v3991_v0 = vld [vmem:[%s4513_s23 + $0x30] sm:$0xf]  ;;  %v4006_v26 = vld [vmem:[%s4513_s23 + $0x88] sm:$0xf]  ;;  %v4005_v29 = vld [vmem:[%s4513_s23 + $0x84] sm:$0xf] }
  0x83   : > { %1107 = vrot.lane.b32.xlu0 %v1028_v4, %s4454_s25  ;;  %v3993_v4 = vld [vmem:[%s4513_s23 + $0x3c] sm:$0xf]  ;;  %v4008_v31 = vld [vmem:[%s4513_s23 + $0x94] sm:$0xf]  ;;  %v4007_v34 = vld [vmem:[%s4513_s23 + $0x90] sm:$0xf] }
  0x84   : > { %v4017_v35 = vld [vmem:[%s4513_s23 + $0xc] sm:$0xf]  ;;  %v4010_v39 = vld [vmem:[%s4513_s23 + $0xa0] sm:$0xf] }
  0x85   : > { %v1442_v40 = vshrl.u32 %v4017_v35, 16 }
  0x86   : > { %1113 = vrot.lane.b32.xlu1 %v1038_v9, %s4454_s25 }
  0x87   : > { %1111 = vrot.lane.b32.xlu0 %v1035_v13, %s4454_s25 }
  0x8a   : > { %1117 = vrot.lane.b32.xlu1 %v1045_v18, %s4454_s25  ;;  %v4002_v18 = vld [vmem:[%s4513_s23 + $0x70] sm:$0xf] }
  0x8b   : > { %1115 = vrot.lane.b32.xlu0 %v1042_v22, %s4454_s25  ;;  %v4004_v22 = vld [vmem:[%s4513_s23 + $0x7c] sm:$0xf] }
  0x8c   : > { %v732_v32 = vpop.permute.xlu1 %731 }
  0x8d   : > { %826 = vst.msk [vmem:[#allocation2 + $0x8] sm:$0xf] %vm823_vm7, %v732_v32  ;;  %v728_v36 = vpop.permute.xlu0 %727  ;;  %v4018_v32 = vld [vmem:[%s4513_s23 + $0x10] sm:$0xf] }
  0x8e   : > { %824 = vst.msk [vmem:[#allocation2] sm:$0xf] %vm823_vm7, %v728_v36  ;;  %1121 = vrot.lane.b32.xlu1 %v1052_v28, %s4454_s25  ;;  %v1451_v37 = vshll.u32 %v4018_v32, 16 }
  0x8f   : > { %1119 = vrot.lane.b32.xlu0 %v1049_v33, %s4454_s25 }
  0x90   : > { %v734_v41 = vpop.permute.xlu1 %733 }
  0x91   : > { %827 = vst.msk [vmem:[#allocation2 + $0xc] sm:$0xf] %vm823_vm7, %v734_v41  ;;  %v730_v44 = vpop.permute.xlu0 %729  ;;  %v1445_v41 = vshll.u32 %v4017_v35, 16 }
  0x92   : > { %825 = vst.msk [vmem:[#allocation2 + $0x4] sm:$0xf] %vm823_vm7, %v730_v44  ;;  %1125 = vrot.lane.b32.xlu1 %v1059_v38, %s4454_s25  ;;  %v1455_v38 = vshrl.u32 %v4018_v32, 16  ;;  %v4009_v44 = vld [vmem:[%s4513_s23 + $0x9c] sm:$0xf] }
  0x93   : > { %1123 = vrot.lane.b32.xlu0 %v1056_v42, %s4454_s25  ;;  %v4021_v42 = vld [vmem:[%s4513_s23 + $0x1c] sm:$0xf] }
  0x94   : > { %v738_v46 = vpop.permute.xlu1 %737 }
  0x95   : > { %829 = vst.msk [vmem:[#allocation2 + $0x14] sm:$0xf] %vm823_vm7, %v738_v46  ;;  %v736_v48 = vpop.permute.xlu0 %735 }
  0x96   : > { %828 = vst.msk [vmem:[#allocation2 + $0x10] sm:$0xf] %vm823_vm7, %v736_v48  ;;  %1129 = vrot.lane.b32.xlu1 %v1066_v45, %s4454_s25  ;;  %v4020_v45 = vld [vmem:[%s4513_s23 + $0x18] sm:$0xf]  ;;  %v4023_v48 = vld [vmem:[%s4513_s23 + $0x24] sm:$0xf] }
  0x97   : > { %1127 = vrot.lane.b32.xlu0 %v1063_v47, %s4454_s25  ;;  %v4024_v47 = vld [vmem:[%s4513_s23 + $0x28] sm:$0xf] }
  0x98   : > { %v742_v50 = vpop.permute.xlu1 %741 }
  0x99   : > { %831 = vst.msk [vmem:[#allocation2 + $0x1c] sm:$0xf] %vm823_vm7, %v742_v50  ;;  %v740_v52 = vpop.permute.xlu0 %739  ;;  %v4970_v50 = vrot.slane %v1451_v37, 5 }
  0x9a   : > { %830 = vst.msk [vmem:[#allocation2 + $0x18] sm:$0xf] %vm823_vm7, %v740_v52  ;;  %1266 = vrot.lane.b32.xlu1 %v3986_v49, %s4455_s26  ;;  %v4012_v49 = vld [vmem:[%s4513_s23 + $0xac] sm:$0xf]  ;;  %v1475_v52 = vshll.u32 %v4021_v42, 16 }
  0x9b   : > { %1264 = vrot.lane.b32.xlu0 %v3985_v51, %s4455_s26  ;;  %v1457_v51 = vrot.slane %v1455_v38, 4 }
  0x9c   : > { %v746_v54 = vpop.permute.xlu1 %745 }
  0x9d   : > { %833 = vst.msk [vmem:[#allocation2 + $0x24] sm:$0xf] %vm823_vm7, %v746_v54  ;;  %v744_v56 = vpop.permute.xlu0 %743  ;;  %v4019_v54 = vld [vmem:[%s4513_s23 + $0x14] sm:$0x1] }
  0x9e   : > { %832 = vst.msk [vmem:[#allocation2 + $0x20] sm:$0xf] %vm823_vm7, %v744_v56  ;;  %1270 = vrot.lane.b32.xlu1 %v3988_v53, %s4455_s26  ;;  %v1479_v53 = vshrl.u32 %v4021_v42, 16  ;;  %v1447_v56 = vrot.slane %v1445_v41, 5 }
  0x9f   : > { %1268 = vrot.lane.b32.xlu0 %v3987_v55, %s4455_s26  ;;  %v1444_v55 = vrot.slane %v1442_v40, 4 }
  0xa0   : > { %v750_v58 = vpop.permute.xlu1 %749 }
  0xa1   : > { %835 = vst.msk [vmem:[#allocation2 + $0x2c] sm:$0xf] %vm823_vm7, %v750_v58  ;;  %v748_v60 = vpop.permute.xlu0 %747  ;;  %v1469_v58 = vshll.u32 %v4020_v45, 16 }
  0xa2   : > { %834 = vst.msk [vmem:[#allocation2 + $0x28] sm:$0xf] %vm823_vm7, %v748_v60  ;;  %1274 = vrot.lane.b32.xlu1 %v3990_v57, %s4455_s26  ;;  %v1466_v57 = vshrl.u32 %v4020_v45, 16  ;;  %v4011_v60 = vld [vmem:[%s4513_s23 + $0xa8] sm:$0xf] }
  0xa3   : > { %1272 = vrot.lane.b32.xlu0 %v3989_v59, %s4455_s26 }
  0xa4   : > { %v754_v63 = vpop.permute.xlu1 %753 }
  0xa5   : > { %837 = vst.msk [vmem:[#allocation2 + $0x34] sm:$0xf] %vm823_vm7, %v754_v63  ;;  %v752_v1 = vpop.permute.xlu0 %751  ;;  %v1503_v63 = vshrl.u32 %v4024_v47, 16 }
  0xa6   : > { %836 = vst.msk [vmem:[#allocation2 + $0x30] sm:$0xf] %vm823_vm7, %v752_v1  ;;  %1278 = vrot.lane.b32.xlu1 %v3992_v61, %s4455_s26  ;;  %v1499_v61 = vshll.u32 %v4024_v47, 16 }
  0xa7   : > { %1276 = vrot.lane.b32.xlu0 %v3991_v0, %s4455_s26  ;;  %v1490_v0 = vshrl.u32 %v4023_v48, 16 }
  0xa8   : > { %v758_v3 = vpop.permute.xlu1 %757 }
  0xa9   : > { %839 = vst.msk [vmem:[#allocation2 + $0x3c] sm:$0xf] %vm823_vm7, %v758_v3  ;;  %v756_v5 = vpop.permute.xlu0 %755  ;;  %v4027_v3 = vld [vmem:[%s4513_s23 + $0x34] sm:$0xf] }
  0xaa   : > { %838 = vst.msk [vmem:[#allocation2 + $0x38] sm:$0xf] %vm823_vm7, %v756_v5  ;;  %1282 = vrot.lane.b32.xlu1 %v3994_v2, %s4455_s26  ;;  %v1493_v2 = vshll.u32 %v4023_v48, 16  ;;  %v1458_v5 = vor.u32 %v1457_v51, %v4970_v50 }
  0xab   : > { %1280 = vrot.lane.b32.xlu0 %v3993_v4, %s4455_s26  ;;  %v4014_v4 = vld [vmem:[%s4513_s23 + $0xb8] sm:$0xf] }
  0xac   : > { %v762_v7 = vpop.permute.xlu1 %761 }
  0xad   : > { %841 = vst.msk [vmem:[#allocation2 + $0x44] sm:$0xf] %vm823_vm7, %v762_v7  ;;  %v760_v9 = vpop.permute.xlu0 %759  ;;  %v4981_v7 = vrot.slane %v1475_v52, 5 }
  0xae   : > { %840 = vst.msk [vmem:[#allocation2 + $0x40] sm:$0xf] %vm823_vm7, %v760_v9  ;;  %1286 = vrot.lane.b32.xlu1 %v3996_v6, %s4455_s26  ;;  %v1461_v6 = vshll.u32 %v4019_v54, 16  ;;  %v1448_v9 = vor.u32 %v1447_v56, %v1444_v55 }
  0xaf   : > { %1284 = vrot.lane.b32.xlu0 %v3995_v8, %s4455_s26  ;;  %v4026_v8 = vld [vmem:[%s4513_s23 + $0x30] sm:$0xf] }
  0xb0   : > { %v766_v11 = vpop.permute.xlu1 %765 }
  0xb1   : > { %843 = vst.msk [vmem:[#allocation2 + $0x4c] sm:$0xf] %vm823_vm7, %v766_v11  ;;  %v764_v13 = vpop.permute.xlu0 %763  ;;  %v1481_v11 = vrot.slane %v1479_v53, 4 }
  0xb2   : > { %842 = vst.msk [vmem:[#allocation2 + $0x48] sm:$0xf] %vm823_vm7, %v764_v13  ;;  %1290 = vrot.lane.b32.xlu1 %v3998_v10, %s4455_s26  ;;  %v4022_v10 = vld [vmem:[%s4513_s23 + $0x20] sm:$0x1]  ;;  %v1471_v13 = vrot.slane %v1469_v58, 5 }
  0xb3   : > { %1288 = vrot.lane.b32.xlu0 %v3997_v12, %s4455_s26  ;;  %v1468_v12 = vrot.slane %v1466_v57, 4  ;;  %v1482_v32 = vor.u32 %v1481_v11, %v4981_v7 }
  0xb4   : > { %v770_v15 = vpop.permute.xlu1 %769 }
  0xb5   : > { %845 = vst.msk [vmem:[#allocation2 + $0x54] sm:$0xf] %vm823_vm7, %v770_v15  ;;  %v768_v17 = vpop.permute.xlu0 %767  ;;  %v4013_v15 = vld [vmem:[%s4513_s23 + $0xb4] sm:$0xf]  ;;  %v1472_v37 = vor.u32 %v1471_v13, %v1468_v12  ;;  %v1483_v53 = vrot.slane %v1482_v32, 4 }
  0xb6   : > { %844 = vst.msk [vmem:[#allocation2 + $0x50] sm:$0xf] %vm823_vm7, %v768_v17  ;;  %1294 = vrot.lane.b32.xlu1 %v4000_v14, %s4455_s26  ;;  %v1505_v17 = vrot.slane %v1503_v63, 4 }
  0xb7   : > { %1292 = vrot.lane.b32.xlu0 %v3999_v16, %s4455_s26  ;;  %v4987_v16 = vrot.slane %v1499_v61, 5  ;;  %v1473_v57 = vrot.slane %v1472_v37, 4 }
  0xb8   : > { %v774_v19 = vpop.permute.xlu1 %773 }
  0xb9   : > { %847 = vst.msk [vmem:[#allocation2 + $0x5c] sm:$0xf] %vm823_vm7, %v774_v19  ;;  %v772_v21 = vpop.permute.xlu0 %771  ;;  %v1523_v19 = vshll.u32 %v4027_v3, 16  ;;  %v1506_v38 = vor.u32 %v1505_v17, %v4987_v16  ;;  %v1478_v13 = vsel %vm4524_vm2, %v1473_v57, %v4981_v7  ;;  %v4045_v17 = vld [vmem:[%s4513_s23 + $0x7c] sm:$0xf] }
  0xba   : > { %846 = vst.msk [vmem:[#allocation2 + $0x58] sm:$0xf] %vm823_vm7, %v772_v21  ;;  %1298 = vrot.lane.b32.xlu1 %v4002_v18, %s4455_s26  ;;  %v1492_v18 = vrot.slane %v1490_v0, 4  ;;  %v4025_v21 = vld [vmem:[%s4513_s23 + $0x2c] sm:$0x1]  ;;  %v1671_v32 = vshrl.u32 %v4045_v17, 16 }
  0xbb   : > { %1296 = vrot.lane.b32.xlu0 %v4001_v20, %s4455_s26  ;;  %v5000_v40 = vrot.slane %v1523_v19, 5  ;;  %v1507_v63 = vrot.slane %v1506_v38, 4 }
  0xbc   : > { %v778_v23 = vpop.permute.xlu1 %777 }
  0xbd   : > { %849 = vst.msk [vmem:[#allocation2 + $0x64] sm:$0xf] %vm823_vm7, %v778_v23  ;;  %v776_v25 = vpop.permute.xlu0 %775  ;;  %v1527_v23 = vshrl.u32 %v4027_v3, 16  ;;  %v4041_v3 = vld [vmem:[%s4513_s23 + $0x6c] sm:$0xf] }
  0xbe   : > { %848 = vst.msk [vmem:[#allocation2 + $0x60] sm:$0xf] %vm823_vm7, %v776_v25  ;;  %1302 = vrot.lane.b32.xlu1 %v4004_v22, %s4455_s26  ;;  %v1495_v22 = vrot.slane %v1493_v2, 5  ;;  %v1517_v25 = vshll.u32 %v4026_v8, 16 }
  0xbf   : > { %1300 = vrot.lane.b32.xlu0 %v4003_v24, %s4455_s26  ;;  %v1514_v24 = vshrl.u32 %v4026_v8, 16 }
  0xc0   : > { %v782_v28 = vpop.permute.xlu1 %781  ;;  %v1496_v42 = vor.u32 %v1495_v22, %v1492_v18 }
  0xc1   : > { %851 = vst.msk [vmem:[#allocation2 + $0x6c] sm:$0xf] %vm823_vm7, %v782_v28  ;;  %v780_v30 = vpop.permute.xlu0 %779  ;;  %v1463_v28 = vrot.slane %v1461_v6, 5  ;;  %v1516_v45 = vrot.slane %v1514_v24, 4 }
  0xc2   : > { %850 = vst.msk [vmem:[#allocation2 + $0x68] sm:$0xf] %vm823_vm7, %v780_v30  ;;  %1306 = vrot.lane.b32.xlu1 %v4006_v26, %s4455_s26  ;;  %v4016_v26 = vld [vmem:[%s4513_s23 + $0xc4] sm:$0xf]  ;;  %v1459_v30 = vrot.slane %v1458_v5, 4  ;;  %v1497_v0 = vrot.slane %v1496_v42, 4 }
  0xc3   : > { %1304 = vrot.lane.b32.xlu0 %v4005_v29, %s4455_s26  ;;  %v1485_v29 = vshll.u32 %v4022_v10, 16 }
  0xc4   : > { %v786_v33 = vpop.permute.xlu1 %785  ;;  %v1464_v52 = vsel %vm4524_vm2, %v1459_v30, %v1463_v28  ;;  %v4043_v28 = vld [vmem:[%s4513_s23 + $0x74] sm:$0x1] }
  0xc5   : > { %853 = vst.msk [vmem:[#allocation2 + $0x74] sm:$0xf] %vm823_vm7, %v786_v33  ;;  %v784_v36 = vpop.permute.xlu0 %783  ;;  %v4030_v33 = vld [vmem:[%s4513_s23 + $0x40] sm:$0xf]  ;;  %v1487_v54 = vrot.slane %v1485_v29, 5  ;;  %v1653_v42 = vshll.u32 %v4043_v28, 16 }
  0xc6   : > { %852 = vst.msk [vmem:[#allocation2 + $0x70] sm:$0xf] %vm823_vm7, %v784_v36  ;;  %1310 = vrot.lane.b32.xlu1 %v4008_v31, %s4455_s26  ;;  %v1449_v31 = vrot.slane %v1448_v9, 4  ;;  %v4015_v36 = vld [vmem:[%s4513_s23 + $0xc0] sm:$0xf]  ;;  %v1547_v47 = vshll.u32 %v4030_v33, 16 }
  0xc7   : > { %1308 = vrot.lane.b32.xlu0 %v4007_v34, %s4455_s26  ;;  %v4029_v34 = vld [vmem:[%s4513_s23 + $0x3c] sm:$0xf]  ;;  %v1551_v48 = vshrl.u32 %v4030_v33, 16  ;;  %v1488_v9 = vsel %vm4524_vm2, %v1483_v53, %v1487_v54 }
  0xc8   : > { %v790_v43 = vpop.permute.xlu1 %789  ;;  %v1541_v51 = vshll.u32 %v4029_v34, 16  ;;  %v1454_v56 = vsel %vm4524_vm2, %v1449_v31, %v4970_v50  ;;  %v4031_v50 = vld [vmem:[%s4513_s23 + $0x44] sm:$0x1]  ;;  %v1667_v31 = vshll.u32 %v4045_v17, 16 }
  0xc9   : > { %855 = vst.msk [vmem:[#allocation2 + $0x7c] sm:$0xf] %vm823_vm7, %v790_v43  ;;  %v788_v46 = vpop.permute.xlu0 %787  ;;  %v4028_v43 = vld [vmem:[%s4513_s23 + $0x38] sm:$0x1]  ;;  %v1553_v5 = vrot.slane %v1551_v48, 4  ;;  %v1557_v22 = vshll.u32 %v4031_v50, 16 }
  0xca   : > { %854 = vst.msk [vmem:[#allocation2 + $0x78] sm:$0xf] %vm823_vm7, %v788_v46  ;;  %1314 = vrot.lane.b32.xlu1 %v4010_v39, %s4455_s26  ;;  %v1509_v39 = vshll.u32 %v4025_v21, 16  ;;  %v1519_v46 = vrot.slane %v1517_v25, 5  ;;  %v1543_v8 = vrot.slane %v1541_v51, 5 }
  0xcb   : > { %1312 = vrot.lane.b32.xlu0 %v4009_v44, %s4455_s26  ;;  %v1529_v44 = vrot.slane %v1527_v23, 4  ;;  %v4044_v23 = vld [vmem:[%s4513_s23 + $0x78] sm:$0xf]  ;;  %v4046_v51 = vld [vmem:[%s4513_s23 + $0x80] sm:$0x1] }
  0xcc   : > { %v1070_v59 = vpop.permute.xlu1 %1069  ;;  %v1511_v58 = vrot.slane %v1509_v39, 5  ;;  %v1520_v2 = vor.u32 %v1519_v46, %v1516_v45  ;;  %v1669_v45 = vrot.slane %v1667_v31, 5  ;;  %v1673_v46 = vrot.slane %v1671_v32, 4  ;;  %v4070_v32 = vld [vmem:[%s4513_s23 + $0x20] sm:$0x1] }
  0xcd   : > { %1165 = vst.msk [vmem:[#allocation2 + $0x4] sm:$0xf] %vm1163_vm8, %v1070_v59  ;;  %v1068_v1 = vpop.permute.xlu0 %1067  ;;  %v1533_v59 = vshll.u32 %v4028_v43, 16 }
  0xce   : > { %1164 = vst.msk [vmem:[#allocation2] sm:$0xf] %vm1163_vm8, %v1068_v1  ;;  %1318 = vrot.lane.b32.xlu1 %v4012_v49, %s4455_s26  ;;  %v1538_v49 = vshrl.u32 %v4029_v34, 16  ;;  %v1530_v1 = vor.u32 %v1529_v44, %v5000_v40  ;;  %v1512_v19 = vsel %vm4524_vm2, %v1507_v63, %v1511_v58  ;;  %v1521_v24 = vrot.slane %v1520_v2, 4 }
  0xcf   : > { %1316 = vrot.lane.b32.xlu0 %v4011_v60, %s4455_s26  ;;  %v4042_v60 = vld [vmem:[%s4513_s23 + $0x70] sm:$0xf]  ;;  %v1535_v21 = vrot.slane %v1533_v59, 5  ;;  %v1674_v57 = vor.u32 %v1673_v46, %v1669_v45  ;;  %v1677_v58 = vshll.u32 %v4046_v51, 16 }
  0xd0   : > { %v1074_v14 = vpop.permute.xlu1 %1073  ;;  %v1540_v6 = vrot.slane %v1538_v49, 4  ;;  %v1643_v10 = vshll.u32 %v4042_v60, 16  ;;  %v1647_v11 = vshrl.u32 %v4042_v60, 16  ;;  %v1531_v7 = vrot.slane %v1530_v1, 4 }
  0xd1   : > { %1167 = vst.msk [vmem:[#allocation2 + $0xc] sm:$0xf] %vm1163_vm8, %v1074_v14  ;;  %v1072_v20 = vpop.permute.xlu0 %1071  ;;  %v1634_v14 = vshrl.u32 %v4041_v3, 16  ;;  %v1526_v39 = vsel %vm4524_vm2, %v1521_v24, %v5000_v40  ;;  %v1655_v40 = vrot.slane %v1653_v42, 5  ;;  %v1679_v50 = vrot.slane %v1677_v58, 5 }
  0xd2   : > { %1166 = vst.msk [vmem:[#allocation2 + $0x8] sm:$0xf] %vm1163_vm8, %v1072_v20  ;;  %1322 = vrot.lane.b32.xlu1 %v4014_v4, %s4455_s26  ;;  %v5019_v4 = vrot.slane %v1547_v47, 5  ;;  %v1502_v20 = vsel %vm4524_vm2, %v1497_v0, %v4987_v16  ;;  %v1645_v29 = vrot.slane %v1643_v10, 5  ;;  %v1649_v30 = vrot.slane %v1647_v11, 4 }
  0xd3   : > { %1320 = vrot.lane.b32.xlu0 %v4013_v15, %s4455_s26  ;;  %v1637_v15 = vshll.u32 %v4041_v3, 16  ;;  %v1636_v33 = vrot.slane %v1634_v14, 4  ;;  %v1536_v38 = vsel %vm4524_vm2, %v1531_v7, %v1535_v21  ;;  %v4066_v0 = vld [vmem:[%s4513_s23 + $0x10] sm:$0xf]  ;;  %v1675_v3 = vrot.slane %v1674_v57, 4 }
  0xd4   : > { %v1078_v35 = vpop.permute.xlu1 %1077  ;;  %v1554_v25 = vor.u32 %v1553_v5, %v5019_v4  ;;  %v1650_v44 = vor.u32 %v1649_v30, %v1645_v29  ;;  %v4090_v10 = vld [vmem:[%s4513_s23 + $0x70] sm:$0xf]  ;;  %v4091_v21 = vld [vmem:[%s4513_s23 + $0x74] sm:$0x1]  ;;  %v4089_v7 = vld [vmem:[%s4513_s23 + $0x6c] sm:$0xe] }
  0xd5   : > { %1169 = vst.msk [vmem:[#allocation2 + $0x14] sm:$0xf] %vm1163_vm8, %v1078_v35  ;;  %v1076_v41 = vpop.permute.xlu0 %1075  ;;  %v1639_v34 = vrot.slane %v1637_v15, 5  ;;  %v1658_v35 = vshrl.u32 %v4044_v23, 16  ;;  %v2108_v17 = vrot.slane %v4090_v10, 5  ;;  %v4121_v31 = vrot.slane %v4089_v7, 9 }
  0xd6   : > { %1168 = vst.msk [vmem:[#allocation2 + $0x10] sm:$0xf] %vm1163_vm8, %v1076_v41  ;;  %1326 = vrot.lane.b32.xlu1 %v4016_v26, %s4455_s26  ;;  %v1544_v26 = vor.u32 %v1543_v8, %v1540_v6  ;;  %v1559_v41 = vrot.slane %v1557_v22, 5  ;;  %v1555_v43 = vrot.slane %v1554_v25, 4  ;;  %v4069_v22 = vld [vmem:[%s4513_s23 + $0x1c] sm:$0xf] }
  0xd7   : > { %1324 = vrot.lane.b32.xlu0 %v4015_v36, %s4455_s26  ;;  %v1661_v36 = vshll.u32 %v4044_v23, 16  ;;  %v1640_v49 = vor.u32 %v1639_v34, %v1636_v33  ;;  %v2110_v25 = vrot.slane %v2108_v17, 4  ;;  %v2059_v28 = vrot.slane %v4069_v22, 5  ;;  %v4068_v34 = vld [vmem:[%s4513_s23 + $0x18] sm:$0xe] }
  0xd8   : > { %v1082_v55 = vpop.permute.xlu1 %1081  ;;  %v1545_v48 = vrot.slane %v1544_v26, 4  ;;  %v2111_v26 = vrot.slane %v4091_v21, 5  ;;  %v4114_v42 = vrot.slane %v4068_v34, 9 }
  0xd9   : > { %1171 = vst.msk [vmem:[#allocation2 + $0x1c] sm:$0xf] %vm1163_vm8, %v1082_v55  ;;  %v1080_v61 = vpop.permute.xlu0 %1079  ;;  %v1663_v53 = vrot.slane %v1661_v36, 5  ;;  %v1560_v55 = vsel %vm4524_vm2, %v1555_v43, %v1559_v41  ;;  %v2061_v36 = vrot.slane %v2059_v28, 4  ;;  %v2109_v41 = vsel %vm4668_vm6, %v4121_v31, %v2108_v17  ;;  %v4094_v43 = vld [vmem:[%s4513_s23 + $0x80] sm:$0x1] }
  0xda   : > { %1170 = vst.msk [vmem:[#allocation2 + $0x18] sm:$0xf] %vm1163_vm8, %v1080_v61  ;;  %1827 = vrot.lane.b32.xlu1 %v1464_v52, %s4456_s27  ;;  %v1660_v52 = vrot.slane %v1658_v35, 4  ;;  %v1550_v60 = vsel %vm4524_vm2, %v1545_v48, %v5019_v4  ;;  %v1641_v61 = vrot.slane %v1640_v49, 4  ;;  %v2052_v4 = vrot.slane %v4066_v0, 5 }
  0xdb   : > { %1825 = vrot.lane.b32.xlu0 %v1454_v56, %s4456_s27  ;;  %v1651_v56 = vrot.slane %v1650_v44, 4  ;;  %v2112_v35 = vsel %vm4668_vm6, %v2110_v25, %v2111_v26  ;;  %v2118_v48 = vrot.slane %v4094_v43, 5  ;;  %v2060_v51 = vsel %vm4668_vm6, %v4114_v42, %v2059_v28  ;;  %v4130_v0 = vld [vmem:[%s4513_s23 + $0x1c] sm:$0xf]  ;;  %v4165_v17 = vld [vmem:[%s4513_s23 + $0x28] sm:$0xf] }
  0xdc   : > { %v1086_v12 = vpop.permute.xlu1 %1085  ;;  %v1664_v63 = vor.u32 %v1663_v53, %v1660_v52  ;;  %v1646_v6 = vsel %vm4524_vm2, %v1641_v61, %v1645_v29  ;;  %v2054_v14 = vrot.slane %v2052_v4, 4  ;;  %v2570_v28 = vshll.u32 %v4165_v17, 16  ;;  %v4148_v42 = vld [vmem:[%s4513_s23 + $0x88] sm:$0xf] }
  0xdd   : > { %1173 = vst.msk [vmem:[#allocation2 + $0x24] sm:$0xf] %vm1163_vm8, %v1086_v12  ;;  %v1084_v18 = vpop.permute.xlu0 %1083  ;;  %v1656_v2 = vsel %vm4524_vm2, %v1651_v56, %v1655_v40  ;;  %v4065_v12 = vld [vmem:[%s4513_s23 + $0xc] sm:$0xe] }
  0xde   : > { %1172 = vst.msk [vmem:[#allocation2 + $0x20] sm:$0xf] %vm1163_vm8, %v1084_v18  ;;  %1831 = vrot.lane.b32.xlu1 %v1488_v9, %s4456_s27  ;;  %v1665_v8 = vrot.slane %v1664_v63, 4  ;;  %v4067_v9 = vld [vmem:[%s4513_s23 + $0x14] sm:$0x1] }
  0xdf   : > { %1829 = vrot.lane.b32.xlu0 %v1478_v13, %s4456_s27  ;;  %v1680_v13 = vsel %vm4524_vm2, %v1675_v3, %v1679_v50  ;;  %v2055_v15 = vrot.slane %v4067_v9, 5  ;;  %v4129_v3 = vld [vmem:[%s4513_s23 + $0x18] sm:$0xf] }
  0xe0   : > { %v1090_v16 = vpop.permute.xlu1 %1089  ;;  %v4185_v50 = vld [vmem:[%s4513_s23 + $0x78] sm:$0xf] }
  0xe1   : > { %1175 = vst.msk [vmem:[#allocation2 + $0x2c] sm:$0xf] %vm1163_vm8, %v1090_v16  ;;  %v1088_v37 = vpop.permute.xlu0 %1087  ;;  %v2056_v24 = vsel %vm4668_vm6, %v2054_v14, %v2055_v15  ;;  %v4093_v16 = vld [vmem:[%s4513_s23 + $0x7c] sm:$0xf]  ;;  %v2729_v14 = vshrl.u32 %v4185_v50, 16  ;;  %v2732_v15 = vshll.u32 %v4185_v50, 16 }
  0xe2   : > { %1174 = vst.msk [vmem:[#allocation2 + $0x28] sm:$0xf] %vm1163_vm8, %v1088_v37  ;;  %1835 = vrot.lane.b32.xlu1 %v1512_v19, %s4456_s27  ;;  %v1670_v19 = vsel %vm4524_vm2, %v1665_v8, %v1669_v45  ;;  %v2062_v37 = vrot.slane %v4070_v32, 5  ;;  %v4092_v45 = vld [vmem:[%s4513_s23 + $0x78] sm:$0xe]  ;;  %v2574_v32 = vshrl.u32 %v4165_v17, 16 }
  0xe3   : > { %1833 = vrot.lane.b32.xlu0 %v1502_v20, %s4456_s27  ;;  %v4113_v20 = vrot.slane %v4065_v12, 9  ;;  %v4122_v52 = vrot.slane %v4092_v45, 9  ;;  %v4163_v8 = vld [vmem:[%s4513_s23 + $0x20] sm:$0x1]  ;;  %v2734_v31 = vrot.slane %v2732_v15, 5 }
  0xe4   : > { %v1094_v47 = vpop.permute.xlu1 %1093  ;;  %v2063_v46 = vsel %vm4668_vm6, %v2061_v36, %v2062_v37  ;;  %v2556_v22 = vshll.u32 %v4163_v8, 16  ;;  %v4189_v36 = vld [vmem:[%s4513_s23 + $0x88] sm:$0xf]  ;;  %v4190_v8 = vld [vmem:[%s4513_s23 + $0x8c] sm:$0x1] }
  0xe5   : > { %1177 = vst.msk [vmem:[#allocation2 + $0x34] sm:$0xf] %vm1163_vm8, %v1094_v47  ;;  %v1092_v54 = vpop.permute.xlu0 %1091  ;;  %v2053_v30 = vsel %vm4668_vm6, %v4113_v20, %v2052_v4  ;;  %v2772_v15 = vshll.u32 %v4190_v8, 16 }
  0xe6   : > { %1176 = vst.msk [vmem:[#allocation2 + $0x30] sm:$0xf] %vm1163_vm8, %v1092_v54  ;;  %1839 = vrot.lane.b32.xlu1 %v1536_v38, %s4456_s27  ;;  %v2115_v38 = vrot.slane %v4093_v16, 5  ;;  %v4162_v54 = vld [vmem:[%s4513_s23 + $0x1c] sm:$0xf] }
  0xe7   : > { %1837 = vrot.lane.b32.xlu0 %v1526_v39, %s4456_s27 }
  0xe8   : > { %v1098_v59 = vpop.permute.xlu1 %1097  ;;  %v2117_v47 = vrot.slane %v2115_v38, 4  ;;  %v2116_v57 = vsel %vm4668_vm6, %v4122_v52, %v2115_v38  ;;  %v2558_v38 = vrot.slane %v2556_v22, 5  ;;  %v2766_v52 = vshrl.u32 %v4189_v36, 16 }
  0xe9   : > { %1179 = vst.msk [vmem:[#allocation2 + $0x3c] sm:$0xf] %vm1163_vm8, %v1098_v59  ;;  %v1096_v1 = vpop.permute.xlu0 %1095  ;;  %v2546_v59 = vshll.u32 %v4162_v54, 16 }
  0xea   : > { %1178 = vst.msk [vmem:[#allocation2 + $0x38] sm:$0xf] %vm1163_vm8, %v1096_v1  ;;  %1843 = vrot.lane.b32.xlu1 %v1560_v55, %s4456_s27  ;;  %v2119_v40 = vsel %vm4668_vm6, %v2117_v47, %v2118_v48  ;;  %v4161_v55 = vld [vmem:[%s4513_s23 + $0x18] sm:$0xf]  ;;  %v4186_v1 = vld [vmem:[%s4513_s23 + $0x7c] sm:$0xf] }
  0xeb   : > { %1841 = vrot.lane.b32.xlu0 %v1550_v60, %s4456_s27  ;;  %v2550_v60 = vshrl.u32 %v4162_v54, 16  ;;  %v2537_v61 = vshrl.u32 %v4161_v55, 16  ;;  %v2540_v63 = vshll.u32 %v4161_v55, 16  ;;  %v2742_v12 = vshrl.u32 %v4186_v1, 16  ;;  %v4166_v48 = vld [vmem:[%s4513_s23 + $0x2c] sm:$0x1] }
  0xec   : > { %v1102_v5 = vpop.permute.xlu1 %1101  ;;  %v4147_v54 = vld [vmem:[%s4513_s23 + $0x84] sm:$0xf] }
  0xed   : > { %1181 = vst.msk [vmem:[#allocation2 + $0x44] sm:$0xf] %vm1163_vm8, %v1102_v5  ;;  %v1100_v11 = vpop.permute.xlu0 %1099  ;;  %v5130_v5 = vrot.slane %v2546_v59, 5  ;;  %v2539_v9 = vrot.slane %v2537_v61, 4  ;;  %v2542_v10 = vrot.slane %v2540_v63, 5  ;;  %v2744_v26 = vrot.slane %v2742_v12, 4 }
  0xee   : > { %1180 = vst.msk [vmem:[#allocation2 + $0x40] sm:$0xf] %vm1163_vm8, %v1100_v11  ;;  %1859 = vrot.lane.b32.xlu1 %v1656_v2, %s4456_s27  ;;  %v2738_v11 = vshll.u32 %v4186_v1, 16  ;;  %v2580_v63 = vshll.u32 %v4166_v48, 16 }
  0xef   : > { %1857 = vrot.lane.b32.xlu0 %v1646_v6, %s4456_s27  ;;  %v2552_v6 = vrot.slane %v2550_v60, 4  ;;  %v2543_v7 = vor.u32 %v2542_v10, %v2539_v9 }
  0xf0   : > { %v1106_v18 = vpop.permute.xlu1 %1105  ;;  %v5145_v25 = vrot.slane %v2738_v11, 5  ;;  %v2582_v11 = vrot.slane %v2580_v63, 5 }
  0xf1   : > { %1183 = vst.msk [vmem:[#allocation2 + $0x4c] sm:$0xf] %vm1163_vm8, %v1106_v18  ;;  %v1104_v23 = vpop.permute.xlu0 %1103  ;;  %v2553_v21 = vor.u32 %v2552_v6, %v5130_v5 }
  0xf2   : > { %1182 = vst.msk [vmem:[#allocation2 + $0x48] sm:$0xf] %vm1163_vm8, %v1104_v23  ;;  %1863 = vrot.lane.b32.xlu1 %v1680_v13, %s4456_s27  ;;  %v4146_v13 = vld [vmem:[%s4513_s23 + $0x7c] sm:$0xf]  ;;  %v4164_v23 = vld [vmem:[%s4513_s23 + $0x24] sm:$0xf]  ;;  %v2745_v45 = vor.u32 %v2744_v26, %v5145_v25 }
  0xf3   : > { %1861 = vrot.lane.b32.xlu0 %v1670_v19, %s4456_s27  ;;  %v4145_v19 = vld [vmem:[%s4513_s23 + $0x78] sm:$0xf]  ;;  %v2561_v34 = vshrl.u32 %v4164_v23, 16  ;;  %v2554_v43 = vrot.slane %v2553_v21, 4  ;;  %v4210_v21 = vld [vmem:[%s4513_s23 + $0x1c] sm:$0xf] }
  0xf4   : > { %v1110_v29 = vpop.permute.xlu1 %1109  ;;  %v4234_v26 = vld [vmem:[%s4513_s23 + $0x7c] sm:$0xf] }
  0xf5   : > { %1185 = vst.msk [vmem:[#allocation2 + $0x54] sm:$0xf] %vm1163_vm8, %v1110_v29  ;;  %v1108_v33 = vpop.permute.xlu0 %1107  ;;  %v4132_v29 = vld [vmem:[%s4513_s23 + $0x28] sm:$0xf]  ;;  %v2559_v59 = vsel %vm4524_vm2, %v2554_v43, %v2558_v38 }
  0xf6   : > { %1184 = vst.msk [vmem:[#allocation2 + $0x50] sm:$0xf] %vm1163_vm8, %v1108_v33  ;;  %2164 = vrot.lane.b32.xlu1 %v2056_v24, %s4457_s28  ;;  %v4187_v24 = vld [vmem:[%s4513_s23 + $0x80] sm:$0x1]  ;;  %v4131_v33 = vld [vmem:[%s4513_s23 + $0x24] sm:$0xf] }
  0xf7   : > { %2162 = vrot.lane.b32.xlu0 %v2053_v30, %s4457_s28  ;;  %v2731_v30 = vrot.slane %v2729_v14, 4 }
  0xf8   : > { %v1114_v39 = vpop.permute.xlu1 %1113 }
  0xf9   : > { %1187 = vst.msk [vmem:[#allocation2 + $0x5c] sm:$0xf] %vm1163_vm8, %v1114_v39  ;;  %v1112_v44 = vpop.permute.xlu0 %1111  ;;  %v2748_v39 = vshll.u32 %v4187_v24, 16  ;;  %v2735_v47 = vor.u32 %v2734_v31, %v2731_v30  ;;  %v2774_v24 = vrot.slane %v2772_v15, 5  ;;  %v4211_v31 = vld [vmem:[%s4513_s23 + $0x20] sm:$0x1] }
  0xfa   : > { %1186 = vst.msk [vmem:[#allocation2 + $0x58] sm:$0xf] %vm1163_vm8, %v1112_v44  ;;  %2196 = vrot.lane.b32.xlu1 %v2112_v35, %s4457_s28  ;;  %v2564_v35 = vshll.u32 %v4164_v23, 16  ;;  %v2544_v44 = vrot.slane %v2543_v7, 4 }
  0xfb   : > { %2194 = vrot.lane.b32.xlu0 %v2109_v41, %s4457_s28  ;;  %v4188_v41 = vld [vmem:[%s4513_s23 + $0x84] sm:$0xf]  ;;  %v2750_v61 = vrot.slane %v2748_v39, 5  ;;  %v3150_v39 = vrot.slane %v4211_v31, 5 }
  0xfc   : > { %v1118_v49 = vpop.permute.xlu1 %1117  ;;  %v2566_v55 = vrot.slane %v2564_v35, 5  ;;  %v2549_v60 = vsel %vm4524_vm2, %v2544_v44, %v5130_v5  ;;  %v3203_v35 = vrot.slane %v4234_v26, 5 }
  0xfd   : > { %1189 = vst.msk [vmem:[#allocation2 + $0x64] sm:$0xf] %vm1163_vm8, %v1118_v49  ;;  %v1116_v53 = vpop.permute.xlu0 %1115  ;;  %v2576_v49 = vrot.slane %v2574_v32, 4 }
  0xfe   : > { %1188 = vst.msk [vmem:[#allocation2 + $0x60] sm:$0xf] %vm1163_vm8, %v1116_v53  ;;  %2168 = vrot.lane.b32.xlu1 %v2063_v46, %s4457_s28  ;;  %v5157_v46 = vrot.slane %v2570_v28, 5 }
  0xff   : > { %2166 = vrot.lane.b32.xlu0 %v2060_v51, %s4457_s28  ;;  %v2762_v51 = vshll.u32 %v4189_v36, 16  ;;  %v4233_v36 = vld [vmem:[%s4513_s23 + $0x78] sm:$0xe] }
 0x100   : > { %v1122_v56 = vpop.permute.xlu1 %1121  ;;  %v2577_v1 = vor.u32 %v2576_v49, %v5157_v46  ;;  %v4265_v48 = vrot.slane %v4233_v36, 9  ;;  %v4047_v49 = vld [vmem:[%s4513_s23 + $0x84] sm:$0xf] }
 0x101   : > { %1191 = vst.msk [vmem:[#allocation2 + $0x6c] sm:$0xf] %vm1163_vm8, %v1122_v56  ;;  %v1120_v58 = vpop.permute.xlu0 %1119  ;;  %v2753_v56 = vshrl.u32 %v4188_v41, 16  ;;  %v1682_v63 = vshrl.u32 %v4047_v49, 16 }
 0x102   : > { %1190 = vst.msk [vmem:[#allocation2 + $0x68] sm:$0xf] %vm1163_vm8, %v1120_v58  ;;  %2200 = vrot.lane.b32.xlu1 %v2119_v40, %s4457_s28  ;;  %v2563_v40 = vrot.slane %v2561_v34, 4  ;;  %v4235_v34 = vld [vmem:[%s4513_s23 + $0x80] sm:$0x1] }
 0x103   : > { %2198 = vrot.lane.b32.xlu0 %v2116_v57, %s4457_s28  ;;  %v2756_v57 = vshll.u32 %v4188_v41, 16  ;;  %v2755_v9 = vrot.slane %v2753_v56, 4  ;;  %v5210_v41 = vld [vmem:[%s4513_s23 + $0x28] sm:$0xf]  ;;  %v4212_v56 = vld [vmem:[%s4513_s23 + $0x24] sm:$0xe] }
 0x104   : > { %v1126_v2 = vpop.permute.xlu1 %1125  ;;  %v2567_v6 = vor.u32 %v2566_v55, %v2563_v40  ;;  %v3154_v40 = vrot.slane %v5210_v41, 5 }
 0x105   : > { %1193 = vst.msk [vmem:[#allocation2 + $0x74] sm:$0xf] %vm1163_vm8, %v1126_v2  ;;  %v1124_v4 = vpop.permute.xlu0 %1123  ;;  %v5172_v2 = vrot.slane %v2762_v51, 5  ;;  %v2758_v10 = vrot.slane %v2756_v57, 5  ;;  %v4411_v51 = vld [vmem:[%s6141_s1 + $0x8] sm:$0xff]  }
 0x106   : > { %1192 = vst.msk [vmem:[#allocation2 + $0x70] sm:$0xf] %vm1163_vm8, %v1124_v4  ;;  %2361 = vrot.lane.b32.xlu1 %v4130_v0, %s4458_s29  ;;  %v2746_v0 = vrot.slane %v2745_v45, 4  ;;  %v2736_v4 = vrot.slane %v2735_v47, 4  ;;  %v5230_v57 = vld [vmem:[%s4513_s23 + $0x88] sm:$0xf] }
 0x107   : > { %2359 = vrot.lane.b32.xlu0 %v4129_v3, %s4458_s29  ;;  %v2768_v3 = vrot.slane %v2766_v52, 4  ;;  %v3205_v52 = vrot.slane %v3203_v35, 4 }
 0x108   : > { %v1130_v18 = vpop.permute.xlu1 %1129  ;;  %v2751_v12 = vsel %vm4524_vm2, %v2746_v0, %v2750_v61  ;;  %v1685_v0 = vshll.u32 %v4047_v49, 16  ;;  %v4072_v49 = vld [vmem:[%s4513_s23 + $0x28] sm:$0xf] }
 0x109   : > { %1195 = vst.msk [vmem:[#allocation2 + $0x7c] sm:$0xf] %vm1163_vm8, %v1130_v18  ;;  %v1128_v20 = vpop.permute.xlu0 %1127  ;;  %v2769_v14 = vor.u32 %v2768_v3, %v5172_v2  ;;  %v2741_v18 = vsel %vm4524_vm2, %v2736_v4, %v5145_v25  ;;  %v3147_v25 = vrot.slane %v4210_v21, 5  ;;  %v3204_v3 = vsel %vm4668_vm6, %v4265_v48, %v3203_v35  ;;  %v4050_v4 = vld [vmem:[%s4513_s23 + $0x90] sm:$0xf] }
 0x10a   : > { %1194 = vst.msk [vmem:[#allocation2 + $0x78] sm:$0xf] %vm1163_vm8, %v1128_v20  ;;  %2393 = vrot.lane.b32.xlu1 %v4146_v13, %s4458_s29  ;;  %v2578_v13 = vrot.slane %v2577_v1, 4  ;;  %v2759_v20 = vor.u32 %v2758_v10, %v2755_v9  ;;  %v4051_v1 = vld [vmem:[%s4513_s23 + $0x94] sm:$0xf]  ;;  %v3156_v9 = vrot.slane %v3154_v40, 4 }
 0x10b   : > { %2391 = vrot.lane.b32.xlu0 %v4145_v19, %s4458_s29  ;;  %v2568_v19 = vrot.slane %v2567_v6, 4  ;;  %v2770_v7 = vrot.slane %v2769_v14, 4  ;;  %v3149_v38 = vrot.slane %v3147_v25, 4  ;;  %v4413_v6 = vld [vmem:[%s6141_s1] sm:$0xff]   ;;  %v4258_v10 = vrot.slane %v4212_v56, 9 }
 0x10c   : > { %v1267_v16 = vpop.permute.xlu1 %1266  ;;  %v2583_v23 = vsel %vm4524_vm2, %v2578_v13, %v2582_v11  ;;  %v2760_v30 = vrot.slane %v2759_v20, 4  ;;  %v4238_v11 = vld [vmem:[%s4513_s23 + $0x8c] sm:$0x1]  ;;  %v1715_v14 = vshll.u32 %v4051_v1, 16  ;;  %v1719_v15 = vshrl.u32 %v4051_v1, 16 }
 0x10d   : > { %1362 = vst.msk [vmem:[#allocation2 + $0x4] sm:$0xf] %vm1360_vm9, %v1267_v16  ;;  %v1265_v37 = vpop.permute.xlu0 %1264  ;;  %v4209_v16 = vld [vmem:[%s4513_s23 + $0x18] sm:$0xe]  ;;  %v3151_v55 = vsel %vm4668_vm6, %v3149_v38, %v3150_v39  ;;  %v1687_v20 = vrot.slane %v1685_v0, 5  ;;  %v1706_v21 = vshrl.u32 %v4050_v4, 16 }
 0x10e   : > { %1361 = vst.msk [vmem:[#allocation2] sm:$0xf] %vm1360_vm9, %v1265_v37  ;;  %2365 = vrot.lane.b32.xlu1 %v4132_v29, %s4458_s29  ;;  %v2573_v29 = vsel %vm4524_vm2, %v2568_v19, %v5157_v46  ;;  %v2775_v37 = vsel %vm4524_vm2, %v2770_v7, %v2774_v24  ;;  %v2765_v44 = vsel %vm4524_vm2, %v2760_v30, %v5172_v2  ;;  %v4257_v45 = vrot.slane %v4209_v16, 9  ;;  %v4048_v46 = vld [vmem:[%s4513_s23 + $0x88] sm:$0xf] }
 0x10f   : > { %2363 = vrot.lane.b32.xlu0 %v4131_v33, %s4458_s29  ;;  %v4410_v33 = vld [vmem:[%s6141_s1 + $0x10] ss:$0 sps:$4 sm:$0x33]   ;;  %v1684_v19 = vrot.slane %v1682_v63, 4  ;;  %v4236_v7 = vld [vmem:[%s4513_s23 + $0x84] sm:$0xe] }
 0x110   : > { %v1271_v53 = vpop.permute.xlu1 %1270  ;;  %4375 = vmatprep.subr.msk.bf16.mxu0 %vm3574_vm10, %v4410_v33  ;;  %4376 = vmatprep.subr.msk.bf16.mxu1 %vm3574_vm10, %v4410_v33  ;;  %v3148_v61 = vsel %vm4668_vm6, %v4257_v45, %v3147_v25  ;;  %v3155_v25 = vsel %vm4668_vm6, %v4258_v10, %v3154_v40  ;;  %v1717_v31 = vrot.slane %v1715_v14, 5  ;;  %v4052_v35 = vld [vmem:[%s4513_s23 + $0x98] sm:$0x1]  ;;  %v1708_v36 = vrot.slane %v1706_v21, 4  ;;  %v4095_v10 = vld [vmem:[%s4513_s23 + $0x84] sm:$0xe] }
 0x111   : > { %1364 = vst.msk [vmem:[#allocation2 + $0xc] sm:$0xf] %vm1360_vm9, %v1271_v53  ;;  %v1269_v58 = vpop.permute.xlu0 %1268  ;;  %v3206_v53 = vrot.slane %v4235_v34, 5  ;;  %v1688_v34 = vor.u32 %v1687_v20, %v1684_v19  ;;  %v2066_v40 = vrot.slane %v4072_v49, 5  ;;  %v4099_v19 = vld [vmem:[%s4513_s23 + $0x94] sm:$0xf] }
 0x112   : > { %1363 = vst.msk [vmem:[#allocation2 + $0x8] sm:$0xf] %vm1360_vm9, %v1269_v58  ;;  %2397 = vrot.lane.b32.xlu1 %v4148_v42, %s4458_s29  ;;  %v3576_v42 = vsel %vm3574_vm10, %v4410_v33, 0  ;;  %v1691_v58 = vshll.u32 %v4048_v46, 16  ;;  %v4266_v33 = vrot.slane %v4236_v7, 9 }
 0x113   : > { %2395 = vrot.lane.b32.xlu0 %v4147_v54, %s4458_s29  ;;  %4332 = vmatpush3.bf16.msra.mxu0 %v3576_v42  ;;  %v4214_v54 = vld [vmem:[%s4513_s23 + $0x2c] sm:$0x1]  ;;  %v3207_v8 = vsel %vm4668_vm6, %v3205_v52, %v3206_v53  ;;  %v2068_v0 = vrot.slane %v2066_v40, 4  ;;  %v4074_v21 = vld [vmem:[%s4513_s23 + $0x30] sm:$0xe] }
 0x114   : > { %v1275_v50 = vpop.permute.xlu1 %1274  ;;  %4372 = vmatpush3.bf16.msra.mxu1 %v3576_v42  ;;  %4333 = vmatprep.subr.bf16.mxu0 %v4411_v51  ;;  %v4134_v49 = vld [vmem:[%s4513_s23 + $0x34] sm:$0xf] }
 0x115   : > { %1366 = vst.msk [vmem:[#allocation2 + $0x14] sm:$0xf] %vm1360_vm9, %v1275_v50  ;;  %v1273_v5 = vpop.permute.xlu0 %1272  ;;  %4370 = vmatprep.subr.bf16.mxu1 %v4411_v51  ;;  %v3157_v50 = vrot.slane %v4214_v54, 5 }
 0x116   : > { %1365 = vst.msk [vmem:[#allocation2 + $0x10] sm:$0xf] %vm1360_vm9, %v1273_v5  ;;  %2922 = vrot.lane.b32.xlu1 %v2559_v59, %s4459_s30  ;;  %v1695_v59 = vshrl.u32 %v4048_v46, 16  ;;  %v3210_v5 = vrot.slane %v5230_v57, 5 }
 0x117   : > { %2920 = vrot.lane.b32.xlu0 %v2549_v60, %s4459_s30  ;;  %4334 = vmatpush3.bf16.msra.mxu0 %v4411_v51  ;;  %v3158_v24 = vsel %vm4668_vm6, %v3156_v9, %v3157_v50 }
 0x118   : > { %v1279_v17 = vpop.permute.xlu1 %1278  ;;  %4373 = vmatpush3.bf16.msra.mxu1 %v4411_v51  ;;  %v1697_v13 = vrot.slane %v1695_v59, 4  ;;  %4335 = vmatprep.subr.bf16.mxu0 %v4413_v6  ;;  %v3212_v26 = vrot.slane %v3210_v5, 4  ;;  %v3211_v46 = vsel %vm4668_vm6, %v4266_v33, %v3210_v5  ;;  %v4096_v59 = vld [vmem:[%s4513_s23 + $0x88] sm:$0xf] }
 0x119   : > { %1368 = vst.msk [vmem:[#allocation2 + $0x1c] sm:$0xf] %vm1360_vm9, %v1279_v17  ;;  %v1277_v22 = vpop.permute.xlu0 %1276  ;;  %4371 = vmatprep.subr.bf16.mxu1 %v4413_v6 }
 0x11a   : > { %1367 = vst.msk [vmem:[#allocation2 + $0x18] sm:$0xf] %vm1360_vm9, %v1277_v22  ;;  %2954 = vrot.lane.b32.xlu1 %v2751_v12, %s4459_s30  ;;  %v5249_v12 = vrot.slane %v1691_v58, 5  ;;  %v1709_v22 = vshll.u32 %v4050_v4, 16  ;;  %v4073_v58 = vld [vmem:[%s4513_s23 + $0x2c] sm:$0x1] }
 0x11b   : > { %2952 = vrot.lane.b32.xlu0 %v2741_v18, %s4459_s30  ;;  %v4049_v18 = vld [vmem:[%s4513_s23 + $0x8c] sm:$0x1]  ;;  %4336 = vmatpush3.bf16.msra.mxu0 %v4413_v6  ;;  %v2069_v1 = vrot.slane %v4073_v58, 5 }
 0x11c   : > { %v1283_v28 = vpop.permute.xlu1 %1282  ;;  %4374 = vmatpush3.bf16.msra.mxu1 %v4413_v6  ;;  %v1701_v30 = vshll.u32 %v4049_v18, 16  ;;  %v4097_v6 = vld [vmem:[%s4513_s23 + $0x8c] sm:$0x1]  ;;  %v4076_v18 = vld [vmem:[%s4513_s23 + $0x38] sm:$0x1] }
 0x11d   : > { %1370 = vst.msk [vmem:[#allocation2 + $0x24] sm:$0xf] %vm1360_vm9, %v1283_v28  ;;  %v1281_v32 = vpop.permute.xlu0 %1280  ;;  %v3213_v28 = vrot.slane %v4238_v11, 5  ;;  %v2070_v5 = vsel %vm4668_vm6, %v2068_v0, %v2069_v1  ;;  %v2076_v7 = vrot.slane %v4076_v18, 5  ;;  %v4150_v1 = vld [vmem:[%s4513_s23 + $0x94] sm:$0xf] }
 0x11e   : > { %1369 = vst.msk [vmem:[#allocation2 + $0x20] sm:$0xf] %vm1360_vm9, %v1281_v32  ;;  %2926 = vrot.lane.b32.xlu1 %v2583_v23, %s4459_s30  ;;  %v1721_v32 = vrot.slane %v1719_v15, 4  ;;  %v1703_v42 = vrot.slane %v1701_v30, 5 }
 0x11f   : > { %2924 = vrot.lane.b32.xlu0 %v2573_v29, %s4459_s30  ;;  %v1698_v29 = vor.u32 %v1697_v13, %v5249_v12  ;;  %v3214_v39 = vsel %vm4668_vm6, %v3212_v26, %v3213_v28  ;;  %v4116_v28 = vrot.slane %v4074_v21, 9 }
 0x120   : > { %v1287_v43 = vpop.permute.xlu1 %1286 }
 0x121   : > { %1372 = vst.msk [vmem:[#allocation2 + $0x2c] sm:$0xf] %vm1360_vm9, %v1287_v43  ;;  %v1285_v47 = vpop.permute.xlu0 %1284  ;;  %v1699_v41 = vrot.slane %v1698_v29, 4  ;;  %v1722_v43 = vor.u32 %v1721_v32, %v1717_v31  ;;  %v4100_v29 = vld [vmem:[%s4513_s23 + $0x98] sm:$0x1] }
 0x122   : > { %1371 = vst.msk [vmem:[#allocation2 + $0x28] sm:$0xf] %vm1360_vm9, %v1285_v47  ;;  %2958 = vrot.lane.b32.xlu1 %v2775_v37, %s4459_s30  ;;  %v1711_v37 = vrot.slane %v1709_v22, 5  ;;  %v1689_v47 = vrot.slane %v1688_v34, 4  ;;  %v2132_v33 = vrot.slane %v4100_v29, 5 }
 0x123   : > { %2956 = vrot.lane.b32.xlu0 %v2765_v44, %s4459_s30  ;;  %v1725_v44 = vshll.u32 %v4052_v35, 16  ;;  %v1704_v52 = vsel %vm4524_vm2, %v1699_v41, %v1703_v42  ;;  %v1723_v53 = vrot.slane %v1722_v43, 4 }
 0x124   : > { %v1291_v60 = vpop.permute.xlu1 %1290  ;;  %v1712_v48 = vor.u32 %v1711_v37, %v1708_v36  ;;  %v1694_v56 = vsel %vm4524_vm2, %v1689_v47, %v5249_v12  ;;  %v2125_v12 = vrot.slane %v4097_v6, 5 }
 0x125   : > { %1374 = vst.msk [vmem:[#allocation2 + $0x34] sm:$0xf] %vm1360_vm9, %v1291_v60  ;;  %v1289_v2 = vpop.permute.xlu0 %1288  ;;  %v1727_v54 = vrot.slane %v1725_v44, 5 }
 0x126   : > { %1373 = vst.msk [vmem:[#allocation2 + $0x30] sm:$0xf] %vm1360_vm9, %v1289_v2  ;;  %3259 = vrot.lane.b32.xlu1 %v3151_v55, %s4460_s11  ;;  %v1713_v57 = vrot.slane %v1712_v48, 4  ;;  %v2122_v2 = vrot.slane %v4096_v59, 5  ;;  %v4169_v59 = vld [vmem:[%s4513_s23 + $0x38] sm:$0x1] }
 0x127   : > { %3257 = vrot.lane.b32.xlu0 %v3148_v61, %s4460_s11  ;;  %v4071_v61 = vld [vmem:[%s4513_s23 + $0x24] sm:$0xe]  ;;  %v1728_v63 = vsel %vm4524_vm2, %v1723_v53, %v1727_v54  ;;  %v4133_v54 = vld [vmem:[%s4513_s23 + $0x30] sm:$0xf] }
 0x128   : > { %v1295_v17 = vpop.permute.xlu1 %1294  ;;  %v1718_v50 = vsel %vm4524_vm2, %v1713_v57, %v1717_v31  ;;  %v4115_v4 = vrot.slane %v4071_v61, 9  ;;  %v2124_v11 = vrot.slane %v2122_v2, 4  ;;  %v4098_v31 = vld [vmem:[%s4513_s23 + $0x90] sm:$0xe] }
 0x129   : > { %1376 = vst.msk [vmem:[#allocation2 + $0x3c] sm:$0xf] %vm1360_vm9, %v1295_v17  ;;  %v1293_v23 = vpop.permute.xlu0 %1292  ;;  %v4123_v17 = vrot.slane %v4095_v10, 9  ;;  %v4124_v36 = vrot.slane %v4098_v31, 9  ;;  %v4170_v10 = vld [vmem:[%s4513_s23 + $0x3c] sm:$0xf] }
 0x12a   : > { %1375 = vst.msk [vmem:[#allocation2 + $0x38] sm:$0xf] %vm1360_vm9, %v1293_v23  ;;  %3291 = vrot.lane.b32.xlu1 %v3207_v8, %s4460_s11  ;;  %v4075_v8 = vld [vmem:[%s4513_s23 + $0x34] sm:$0xf]  ;;  %v2067_v15 = vsel %vm4668_vm6, %v4115_v4, %v2066_v40  ;;  %v2126_v22 = vsel %vm4668_vm6, %v2124_v11, %v2125_v12  ;;  %v2609_v21 = vshrl.u32 %v4170_v10, 16 }
 0x12b   : > { %3289 = vrot.lane.b32.xlu0 %v3204_v3, %s4460_s11  ;;  %v2073_v13 = vrot.slane %v4075_v8, 5  ;;  %v2123_v26 = vsel %vm4668_vm6, %v4123_v17, %v2122_v2  ;;  %v2604_v8 = vshll.u32 %v4169_v59, 16 }
 0x12c   : > { %v1299_v16 = vpop.permute.xlu1 %1298 }
 0x12d   : > { %1378 = vst.msk [vmem:[#allocation2 + $0x44] sm:$0xf] %vm1360_vm9, %v1299_v16  ;;  %v1297_v38 = vpop.permute.xlu0 %1296  ;;  %v2075_v23 = vrot.slane %v2073_v13, 4  ;;  %v2074_v35 = vsel %vm4668_vm6, %v4116_v28, %v2073_v13  ;;  %v4152_v28 = vld [vmem:[%s4513_s23 + $0xa0] sm:$0xf] }
 0x12e   : > { %1377 = vst.msk [vmem:[#allocation2 + $0x40] sm:$0xf] %vm1360_vm9, %v1297_v38  ;;  %3263 = vrot.lane.b32.xlu1 %v3158_v24, %s4460_s11  ;;  %v2129_v24 = vrot.slane %v4099_v19, 5  ;;  %v4168_v38 = vld [vmem:[%s4513_s23 + $0x34] sm:$0xf] }
 0x12f   : > { %3261 = vrot.lane.b32.xlu0 %v3155_v25, %s4460_s11  ;;  %v2077_v32 = vsel %vm4668_vm6, %v2075_v23, %v2076_v7  ;;  %v4195_v23 = vld [vmem:[%s4513_s23 + $0xa0] sm:$0xf] }
 0x130   : > { %v1303_v45 = vpop.permute.xlu1 %1302  ;;  %v2131_v16 = vrot.slane %v2129_v24, 4  ;;  %v2130_v43 = vsel %vm4668_vm6, %v4124_v36, %v2129_v24  ;;  %v2814_v36 = vshrl.u32 %v4195_v23, 16 }
 0x131   : > { %1380 = vst.msk [vmem:[#allocation2 + $0x4c] sm:$0xf] %vm1360_vm9, %v1303_v45  ;;  %v1301_v51 = vpop.permute.xlu0 %1300  ;;  %v2594_v45 = vshll.u32 %v4168_v38, 16 }
 0x132   : > { %1379 = vst.msk [vmem:[#allocation2 + $0x48] sm:$0xf] %vm1360_vm9, %v1301_v51  ;;  %3295 = vrot.lane.b32.xlu1 %v3214_v39, %s4460_s11  ;;  %v4167_v39 = vld [vmem:[%s4513_s23 + $0x30] sm:$0xf]  ;;  %v2133_v41 = vsel %vm4668_vm6, %v2131_v16, %v2132_v33  ;;  %v4192_v51 = vld [vmem:[%s4513_s23 + $0x94] sm:$0xf] }
 0x133   : > { %3293 = vrot.lane.b32.xlu0 %v3211_v46, %s4460_s11  ;;  %v2598_v46 = vshrl.u32 %v4168_v38, 16  ;;  %v2585_v47 = vshrl.u32 %v4167_v39, 16  ;;  %v2588_v48 = vshll.u32 %v4167_v39, 16  ;;  %v2790_v61 = vshrl.u32 %v4192_v51, 16  ;;  %v4151_v16 = vld [vmem:[%s4513_s23 + $0x9c] sm:$0xf] }
 0x134   : > { %v1307_v55 = vpop.permute.xlu1 %1306  ;;  %v4172_v38 = vld [vmem:[%s4513_s23 + $0x44] sm:$0x1]  ;;  %v2611_v39 = vrot.slane %v2609_v21, 4  ;;  %v4219_v21 = vld [vmem:[%s4513_s23 + $0x40] sm:$0xf] }
 0x135   : > { %1382 = vst.msk [vmem:[#allocation2 + $0x54] sm:$0xf] %vm1360_vm9, %v1307_v55  ;;  %v1305_v60 = vpop.permute.xlu0 %1304  ;;  %v5343_v55 = vrot.slane %v2594_v45, 5  ;;  %v2587_v57 = vrot.slane %v2585_v47, 4  ;;  %v2590_v58 = vrot.slane %v2588_v48, 5  ;;  %v2792_v11 = vrot.slane %v2790_v61, 4 }
 0x136   : > { %1381 = vst.msk [vmem:[#allocation2 + $0x50] sm:$0xf] %vm1360_vm9, %v1305_v60  ;;  %1867 = vrot.lane.b32.xlu1 %v1704_v52, %s4456_s27  ;;  %v4191_v52 = vld [vmem:[%s4513_s23 + $0x90] sm:$0xf]  ;;  %v2786_v60 = vshll.u32 %v4192_v51, 16  ;;  %v2628_v51 = vshll.u32 %v4172_v38, 16 }
 0x137   : > { %1865 = vrot.lane.b32.xlu0 %v1694_v56, %s4456_s27  ;;  %v2600_v56 = vrot.slane %v2598_v46, 4  ;;  %v2780_v0 = vshll.u32 %v4191_v52, 16 }
 0x138   : > { %v1311_v3 = vpop.permute.xlu1 %1310 }
 0x139   : > { %1384 = vst.msk [vmem:[#allocation2 + $0x5c] sm:$0xf] %vm1360_vm9, %v1311_v3  ;;  %v1309_v9 = vpop.permute.xlu0 %1308  ;;  %v4149_v3 = vld [vmem:[%s4513_s23 + $0x90] sm:$0xf]  ;;  %v2601_v6 = vor.u32 %v2600_v56, %v5343_v55  ;;  %v2782_v13 = vrot.slane %v2780_v0, 5 }
 0x13a   : > { %1383 = vst.msk [vmem:[#allocation2 + $0x58] sm:$0xf] %vm1360_vm9, %v1309_v9  ;;  %1871 = vrot.lane.b32.xlu1 %v1728_v63, %s4456_s27  ;;  %v2777_v63 = vshrl.u32 %v4191_v52, 16  ;;  %v2591_v9 = vor.u32 %v2590_v58, %v2587_v57  ;;  %v4196_v57 = vld [vmem:[%s4513_s23 + $0xa4] sm:$0x1] }
 0x13b   : > { %1869 = vrot.lane.b32.xlu0 %v1718_v50, %s4456_s27  ;;  %v4171_v50 = vld [vmem:[%s4513_s23 + $0x40] sm:$0xf]  ;;  %v2602_v24 = vrot.slane %v2601_v6, 4 }
 0x13c   : > { %v1315_v14 = vpop.permute.xlu1 %1314  ;;  %v2779_v12 = vrot.slane %v2777_v63, 4  ;;  %v2618_v17 = vshll.u32 %v4171_v50, 16  ;;  %v2622_v18 = vshrl.u32 %v4171_v50, 16  ;;  %v2592_v29 = vrot.slane %v2591_v9, 4 }
 0x13d   : > { %1386 = vst.msk [vmem:[#allocation2 + $0x64] sm:$0xf] %vm1360_vm9, %v1315_v14  ;;  %v1313_v20 = vpop.permute.xlu0 %1312  ;;  %v4136_v14 = vld [vmem:[%s4513_s23 + $0x40] sm:$0xf]  ;;  %v2630_v63 = vrot.slane %v2628_v51, 5 }
 0x13e   : > { %1385 = vst.msk [vmem:[#allocation2 + $0x60] sm:$0xf] %vm1360_vm9, %v1313_v20  ;;  %2172 = vrot.lane.b32.xlu1 %v2070_v5, %s4457_s28  ;;  %v5357_v5 = vrot.slane %v2786_v60, 5  ;;  %v4135_v20 = vld [vmem:[%s4513_s23 + $0x3c] sm:$0xf]  ;;  %v5372_v33 = vrot.slane %v2618_v17, 5  ;;  %v2597_v46 = vsel %vm4524_vm2, %v2592_v29, %v5343_v55 }
 0x13f   : > { %2170 = vrot.lane.b32.xlu0 %v2067_v15, %s4457_s28  ;;  %v4193_v15 = vld [vmem:[%s4513_s23 + $0x98] sm:$0x1]  ;;  %v5410_v17 = vld [vmem:[%s4513_s23 + $0x94] sm:$0xf] }
 0x140   : > { %v1319_v25 = vpop.permute.xlu1 %1318  ;;  %v2796_v31 = vshll.u32 %v4193_v15, 16  ;;  %v4217_v15 = vld [vmem:[%s4513_s23 + $0x38] sm:$0x1] }
 0x141   : > { %1388 = vst.msk [vmem:[#allocation2 + $0x6c] sm:$0xf] %vm1360_vm9, %v1319_v25  ;;  %v1317_v30 = vpop.permute.xlu0 %1316  ;;  %v2606_v25 = vrot.slane %v2604_v8, 5 }
 0x142   : > { %1387 = vst.msk [vmem:[#allocation2 + $0x68] sm:$0xf] %vm1360_vm9, %v1317_v30  ;;  %2204 = vrot.lane.b32.xlu1 %v2126_v22, %s4457_s28  ;;  %v2612_v22 = vshll.u32 %v4170_v10, 16  ;;  %v2793_v30 = vor.u32 %v2792_v11, %v5357_v5  ;;  %v2798_v48 = vrot.slane %v2796_v31, 5  ;;  %v4239_v31 = vld [vmem:[%s4513_s23 + $0x90] sm:$0xe] }
 0x143   : > { %2202 = vrot.lane.b32.xlu0 %v2123_v26, %s4457_s28  ;;  %v4194_v26 = vld [vmem:[%s4513_s23 + $0x9c] sm:$0xf]  ;;  %v2607_v45 = vsel %vm4524_vm2, %v2602_v24, %v2606_v25  ;;  %v4054_v24 = vld [vmem:[%s4513_s23 + $0xa0] sm:$0xf] }
 0x144   : > { %v1323_v34 = vpop.permute.xlu1 %1322  ;;  %v2794_v47 = vrot.slane %v2793_v30, 4  ;;  %v4053_v25 = vld [vmem:[%s4513_s23 + $0x9c] sm:$0xf]  ;;  %v4241_v30 = vld [vmem:[%s4513_s23 + $0x98] sm:$0x1] }
 0x145   : > { %1390 = vst.msk [vmem:[#allocation2 + $0x74] sm:$0xf] %vm1360_vm9, %v1323_v34  ;;  %v1321_v37 = vpop.permute.xlu0 %1320  ;;  %v2624_v34 = vrot.slane %v2622_v18, 4  ;;  %v1730_v38 = vshrl.u32 %v4053_v25, 16 }
 0x146   : > { %1389 = vst.msk [vmem:[#allocation2 + $0x70] sm:$0xf] %vm1360_vm9, %v1321_v37  ;;  %2176 = vrot.lane.b32.xlu1 %v2077_v32, %s4457_s28  ;;  %v2783_v32 = vor.u32 %v2782_v13, %v2779_v12  ;;  %v2799_v60 = vsel %vm4524_vm2, %v2794_v47, %v2798_v48  ;;  %v4033_v47 = vld [vmem:[%s4513_s23 + $0x4c] sm:$0xf] }
 0x147   : > { %2174 = vrot.lane.b32.xlu0 %v2074_v35, %s4457_s28  ;;  %v2810_v35 = vshll.u32 %v4195_v23, 16  ;;  %v3164_v23 = vrot.slane %v4217_v15, 5 }
 0x148   : > { %v1327_v42 = vpop.permute.xlu1 %1326 }
 0x149   : > { %1392 = vst.msk [vmem:[#allocation2 + $0x7c] sm:$0xf] %vm1360_vm9, %v1327_v42  ;;  %v1325_v44 = vpop.permute.xlu0 %1324  ;;  %v2801_v42 = vshrl.u32 %v4194_v26, 16  ;;  %v5385_v52 = vrot.slane %v2810_v35, 5  ;;  %v5434_v35 = vld [vmem:[%s4513_s23 + $0xa0] sm:$0xf] }
 0x14a   : > { %1391 = vst.msk [vmem:[#allocation2 + $0x78] sm:$0xf] %vm1360_vm9, %v1325_v44  ;;  %2208 = vrot.lane.b32.xlu1 %v2133_v41, %s4457_s28  ;;  %v2614_v41 = vrot.slane %v2612_v22, 5 }
 0x14b   : > { %2206 = vrot.lane.b32.xlu0 %v2130_v43, %s4457_s28  ;;  %v2804_v43 = vshll.u32 %v4194_v26, 16  ;;  %v2803_v58 = vrot.slane %v2801_v42, 4 }
 0x14c   : > { %v1828_v53 = vpop.permute.xlu1 %1827  ;;  %v2615_v56 = vor.u32 %v2614_v41, %v2611_v39  ;;  %v1733_v39 = vshll.u32 %v4053_v25, 16 }
 0x14d   : > { %1923 = vst.msk [vmem:[#allocation2 + $0x4] sm:$0xf] %vm1921_vm11, %v1828_v53  ;;  %v1826_v40 = vpop.permute.xlu0 %1825  ;;  %v2816_v53 = vrot.slane %v2814_v36, 4  ;;  %v2806_v59 = vrot.slane %v2804_v43, 5  ;;  %v1739_v36 = vshll.u32 %v4054_v24, 16  ;;  %v3220_v43 = vrot.slane %v4241_v30, 5 }
 0x14e   : > { %1922 = vst.msk [vmem:[#allocation2] sm:$0xf] %vm1921_vm11, %v1826_v40  ;;  %2369 = vrot.lane.b32.xlu1 %v4134_v49, %s4458_s29  ;;  %v2625_v49 = vor.u32 %v2624_v34, %v5372_v33  ;;  %v2784_v40 = vrot.slane %v2783_v32, 4  ;;  %v4218_v34 = vld [vmem:[%s4513_s23 + $0x3c] sm:$0xe] }
 0x14f   : > { %2367 = vrot.lane.b32.xlu0 %v4133_v54, %s4458_s29  ;;  %v2817_v0 = vor.u32 %v2816_v53, %v5385_v52  ;;  %v2807_v6 = vor.u32 %v2806_v59, %v2803_v58  ;;  %v3224_v53 = vrot.slane %v5434_v35, 5  ;;  %v1732_v58 = vrot.slane %v1730_v38, 4  ;;  %v4058_v38 = vld [vmem:[%s4513_s23 + $0xb0] sm:$0x1] }
 0x150   : > { %v1832_v2 = vpop.permute.xlu1 %1831  ;;  %v2626_v61 = vrot.slane %v2625_v49, 4  ;;  %v2789_v50 = vsel %vm4524_vm2, %v2784_v40, %v5357_v5  ;;  %v4244_v40 = vld [vmem:[%s4513_s23 + $0xa4] sm:$0x1]  ;;  %v1735_v59 = vrot.slane %v1733_v39, 5 }
 0x151   : > { %1925 = vst.msk [vmem:[#allocation2 + $0xc] sm:$0xf] %vm1921_vm11, %v1832_v2  ;;  %v1830_v4 = vpop.permute.xlu0 %1829  ;;  %v4216_v2 = vld [vmem:[%s4513_s23 + $0x34] sm:$0xf]  ;;  %v2818_v11 = vrot.slane %v2817_v0, 4  ;;  %v1575_v0 = vshrl.u32 %v4033_v47, 16 }
 0x152   : > { %1924 = vst.msk [vmem:[#allocation2 + $0x8] sm:$0xf] %vm1921_vm11, %v1830_v4  ;;  %2401 = vrot.lane.b32.xlu1 %v4150_v1, %s4458_s29  ;;  %v2820_v1 = vshll.u32 %v4196_v57, 16  ;;  %v2616_v4 = vrot.slane %v2615_v56, 4  ;;  %v3161_v9 = vrot.slane %v4216_v2, 5  ;;  %v2631_v10 = vsel %vm4524_vm2, %v2626_v61, %v2630_v63 }
 0x153   : > { %2399 = vrot.lane.b32.xlu0 %v4149_v3, %s4458_s29  ;;  %v5448_v56 = vrot.slane %v1739_v36, 5  ;;  %v4055_v61 = vld [vmem:[%s4513_s23 + $0xa4] sm:$0x1]  ;;  %v1571_v63 = vshll.u32 %v4033_v47, 16  ;;  %v1736_v15 = vor.u32 %v1735_v59, %v1732_v58  ;;  %v1773_v47 = vshll.u32 %v4058_v38, 16 }
 0x154   : > { %v1836_v19 = vpop.permute.xlu1 %1835  ;;  %v2822_v5 = vrot.slane %v2820_v1, 5  ;;  %v2621_v13 = vsel %vm4524_vm2, %v2616_v4, %v5372_v33  ;;  %v3168_v33 = vrot.slane %v4219_v21, 5  ;;  %v4057_v4 = vld [vmem:[%s4513_s23 + $0xac] sm:$0xf] }
 0x155   : > { %1927 = vst.msk [vmem:[#allocation2 + $0x14] sm:$0xf] %vm1921_vm11, %v1836_v19  ;;  %v1834_v7 = vpop.permute.xlu0 %1833  ;;  %v4215_v19 = vld [vmem:[%s4513_s23 + $0x30] sm:$0xe]  ;;  %v1737_v36 = vrot.slane %v1736_v15, 4 }
 0x156   : > { %1926 = vst.msk [vmem:[#allocation2 + $0x10] sm:$0xf] %vm1921_vm11, %v1834_v7  ;;  %2373 = vrot.lane.b32.xlu1 %v4136_v14, %s4458_s29  ;;  %v2808_v14 = vrot.slane %v2807_v6, 4  ;;  %v2823_v22 = vsel %vm4524_vm2, %v2818_v11, %v2822_v5  ;;  %v3217_v7 = vrot.slane %v5410_v17, 5  ;;  %v4259_v29 = vrot.slane %v4215_v19, 9 }
 0x157   : > { %2371 = vrot.lane.b32.xlu0 %v4135_v20, %s4458_s29  ;;  %v3163_v20 = vrot.slane %v3161_v9, 4  ;;  %v3170_v49 = vrot.slane %v3168_v33, 4  ;;  %v3227_v11 = vrot.slane %v4244_v40, 5  ;;  %v4056_v5 = vld [vmem:[%s4513_s23 + $0xa8] sm:$0xf]  ;;  %v5468_v17 = vrot.slane %v1571_v63, 5 }
 0x158   : > { %v1840_v37 = vpop.permute.xlu1 %1839  ;;  %v3219_v42 = vrot.slane %v3217_v7, 4  ;;  %v1763_v19 = vshll.u32 %v4057_v4, 16  ;;  %v1757_v25 = vshll.u32 %v4056_v5, 16  ;;  %v4102_v63 = vld [vmem:[%s4513_s23 + $0xa0] sm:$0xf] }
 0x159   : > { %1929 = vst.msk [vmem:[#allocation2 + $0x1c] sm:$0xf] %vm1921_vm11, %v1840_v37  ;;  %v1838_v44 = vpop.permute.xlu0 %1837  ;;  %v1743_v37 = vshrl.u32 %v4054_v24, 16  ;;  %v3165_v41 = vsel %vm4668_vm6, %v3163_v20, %v3164_v23  ;;  %v1767_v20 = vshrl.u32 %v4057_v4, 16  ;;  %v1754_v24 = vshrl.u32 %v4056_v5, 16 }
 0x15a   : > { %1928 = vst.msk [vmem:[#allocation2 + $0x18] sm:$0xf] %vm1921_vm11, %v1838_v44  ;;  %2405 = vrot.lane.b32.xlu1 %v4152_v28, %s4458_s29  ;;  %v2813_v28 = vsel %vm4524_vm2, %v2808_v14, %v5385_v52  ;;  %v4260_v52 = vrot.slane %v4218_v34, 9  ;;  %v1749_v14 = vshll.u32 %v4055_v61, 16  ;;  %v4079_v61 = vld [vmem:[%s4513_s23 + $0x44] sm:$0x1] }
 0x15b   : > { %2403 = vrot.lane.b32.xlu0 %v4151_v16, %s4458_s29  ;;  %v4220_v16 = vld [vmem:[%s4513_s23 + $0x44] sm:$0x1]  ;;  %v1745_v57 = vrot.slane %v1743_v37, 4  ;;  %v1769_v34 = vrot.slane %v1767_v20, 4  ;;  %v1756_v39 = vrot.slane %v1754_v24, 4  ;;  %v2136_v4 = vrot.slane %v4102_v63, 5 }
 0x15c   : > { %v1844_v54 = vpop.permute.xlu1 %1843  ;;  %v3171_v51 = vrot.slane %v4220_v16, 5 }
 0x15d   : > { %1931 = vst.msk [vmem:[#allocation2 + $0x24] sm:$0xf] %vm1921_vm11, %v1844_v54  ;;  %v1842_v55 = vpop.permute.xlu0 %1841  ;;  %v4032_v54 = vld [vmem:[%s4513_s23 + $0x48] sm:$0xf] }
 0x15e   : > { %1930 = vst.msk [vmem:[#allocation2 + $0x20] sm:$0xf] %vm1921_vm11, %v1842_v55  ;;  %2930 = vrot.lane.b32.xlu1 %v2607_v45, %s4459_s30  ;;  %v3162_v45 = vsel %vm4668_vm6, %v4259_v29, %v3161_v9  ;;  %v3221_v55 = vsel %vm4668_vm6, %v3219_v42, %v3220_v43  ;;  %v3169_v9 = vsel %vm4668_vm6, %v4260_v52, %v3168_v33  ;;  %v1765_v33 = vrot.slane %v1763_v19, 5 }
 0x15f   : > { %2928 = vrot.lane.b32.xlu0 %v2597_v46, %s4459_s30  ;;  %v4267_v46 = vrot.slane %v4239_v31, 9  ;;  %v1751_v31 = vrot.slane %v1749_v14, 5  ;;  %v2138_v14 = vrot.slane %v2136_v4, 4 }
 0x160   : > { %v1860_v3 = vpop.permute.xlu1 %1859 }
 0x161   : > { %1939 = vst.msk [vmem:[#allocation2 + $0x44] sm:$0xf] %vm1921_vm11, %v1860_v3  ;;  %v1858_v8 = vpop.permute.xlu0 %1857  ;;  %v3218_v2 = vsel %vm4668_vm6, %v4267_v46, %v3217_v7  ;;  %v1562_v3 = vshrl.u32 %v4032_v54, 16  ;;  %v1770_v46 = vor.u32 %v1769_v34, %v1765_v33 }
 0x162   : > { %1938 = vst.msk [vmem:[#allocation2 + $0x40] sm:$0xf] %vm1921_vm11, %v1858_v8  ;;  %2962 = vrot.lane.b32.xlu1 %v2799_v60, %s4459_s30  ;;  %v4242_v60 = vld [vmem:[%s4513_s23 + $0x9c] sm:$0xe]  ;;  %v3172_v8 = vsel %vm4668_vm6, %v3170_v49, %v3171_v51  ;;  %v1742_v49 = vsel %vm4524_vm2, %v1737_v36, %v5448_v56 }
 0x163   : > { %2960 = vrot.lane.b32.xlu0 %v2789_v50, %s4459_s30  ;;  %v1565_v50 = vshll.u32 %v4032_v54, 16  ;;  %v1564_v23 = vrot.slane %v1562_v3, 4 }
 0x164   : > { %v1864_v12 = vpop.permute.xlu1 %1863 }
 0x165   : > { %1941 = vst.msk [vmem:[#allocation2 + $0x4c] sm:$0xf] %vm1921_vm11, %v1864_v12  ;;  %v1862_v18 = vpop.permute.xlu0 %1861  ;;  %v4268_v12 = vrot.slane %v4242_v60, 9  ;;  %v1567_v7 = vrot.slane %v1565_v50, 5  ;;  %v2083_v50 = vrot.slane %v4079_v61, 5 }
 0x166   : > { %1940 = vst.msk [vmem:[#allocation2 + $0x48] sm:$0xf] %vm1921_vm11, %v1862_v18  ;;  %2934 = vrot.lane.b32.xlu1 %v2631_v10, %s4459_s30  ;;  %v3226_v10 = vrot.slane %v3224_v53, 4  ;;  %v1577_v18 = vrot.slane %v1575_v0, 4 }
 0x167   : > { %2932 = vrot.lane.b32.xlu0 %v2621_v13, %s4459_s30  ;;  %v1746_v13 = vor.u32 %v1745_v57, %v5448_v56  ;;  %v3225_v29 = vsel %vm4668_vm6, %v4268_v12, %v3224_v53  ;;  %v1568_v37 = vor.u32 %v1567_v7, %v1564_v23  ;;  %v4078_v53 = vld [vmem:[%s4513_s23 + $0x40] sm:$0xf]  ;;  %v1771_v57 = vrot.slane %v1770_v46, 4  ;;  %v4101_v12 = vld [vmem:[%s4513_s23 + $0x9c] sm:$0xe] }
 0x168   : > { %v2165_v26 = vpop.permute.xlu1 %2164  ;;  %v1775_v56 = vrot.slane %v1773_v47, 5  ;;  %v2080_v58 = vrot.slane %v4078_v53, 5  ;;  %v4125_v20 = vrot.slane %v4101_v12, 9  ;;  %v4080_v7 = vld [vmem:[%s4513_s23 + $0x48] sm:$0xe] }
 0x169   : > { %2260 = vst.msk [vmem:[#allocation2 + $0x4] sm:$0xf] %vm2258_vm12, %v2165_v26  ;;  %v2163_v32 = vpop.permute.xlu0 %2162  ;;  %v1747_v30 = vrot.slane %v1746_v13, 4  ;;  %v1569_v51 = vrot.slane %v1568_v37, 4  ;;  %v4138_v53 = vld [vmem:[%s4513_s23 + $0x4c] sm:$0xf] }
 0x16a   : > { %2259 = vst.msk [vmem:[#allocation2] sm:$0xf] %vm2258_vm12, %v2163_v32  ;;  %2966 = vrot.lane.b32.xlu1 %v2823_v22, %s4459_s30  ;;  %v4034_v22 = vld [vmem:[%s4513_s23 + $0x50] sm:$0x1]  ;;  %v1578_v32 = vor.u32 %v1577_v18, %v5468_v17  ;;  %v2082_v3 = vrot.slane %v2080_v58, 4 }
 0x16b   : > { %2964 = vrot.lane.b32.xlu0 %v2813_v28, %s4459_s30  ;;  %v3228_v28 = vsel %vm4668_vm6, %v3226_v10, %v3227_v11  ;;  %v1581_v16 = vshll.u32 %v4034_v22, 16  ;;  %v1752_v43 = vsel %vm4524_vm2, %v1747_v30, %v1751_v31  ;;  %v4103_v10 = vld [vmem:[%s4513_s23 + $0xa4] sm:$0x1]  ;;  %v4081_v11 = vld [vmem:[%s4513_s23 + $0x4c] sm:$0xf]  ;;  %v2137_v30 = vsel %vm4668_vm6, %v4125_v20, %v2136_v4 }
 0x16c   : > { %v2197_v44 = vpop.permute.xlu1 %2196  ;;  %v2084_v13 = vsel %vm4668_vm6, %v2082_v3, %v2083_v50  ;;  %v2139_v15 = vrot.slane %v4103_v10, 5  ;;  %v4105_v22 = vld [vmem:[%s4513_s23 + $0xac] sm:$0xf]  ;;  %v4118_v31 = vrot.slane %v4080_v7, 9 }
 0x16d   : > { %2276 = vst.msk [vmem:[#allocation2 + $0x44] sm:$0xf] %vm2258_vm12, %v2197_v44  ;;  %v2195_v48 = vpop.permute.xlu0 %2194  ;;  %v1579_v44 = vrot.slane %v1578_v32, 4  ;;  %v4106_v32 = vld [vmem:[%s4513_s23 + $0xb0] sm:$0x1] }
 0x16e   : > { %2275 = vst.msk [vmem:[#allocation2 + $0x40] sm:$0xf] %vm2258_vm12, %v2195_v48  ;;  %3267 = vrot.lane.b32.xlu1 %v3165_v41, %s4460_s11  ;;  %v1759_v41 = vrot.slane %v1757_v25, 5  ;;  %v2140_v24 = vsel %vm4668_vm6, %v2138_v14, %v2139_v15  ;;  %v2146_v36 = vrot.slane %v4106_v32, 5  ;;  %v4154_v50 = vld [vmem:[%s4513_s23 + $0xac] sm:$0xf] }
 0x16f   : > { %3265 = vrot.lane.b32.xlu0 %v3162_v45, %s4460_s11  ;;  %v1583_v45 = vrot.slane %v1581_v16, 5  ;;  %v4139_v14 = vld [vmem:[%s4513_s23 + $0x54] sm:$0xf]  ;;  %v4156_v32 = vld [vmem:[%s4513_s23 + $0xb8] sm:$0xf] }
 0x170   : > { %v2169_v1 = vpop.permute.xlu1 %2168  ;;  %v1760_v52 = vor.u32 %v1759_v41, %v1756_v39 }
 0x171   : > { %2262 = vst.msk [vmem:[#allocation2 + $0xc] sm:$0xf] %vm2258_vm12, %v2169_v1  ;;  %v2167_v6 = vpop.permute.xlu0 %2166  ;;  %v1584_v40 = vsel %vm4524_vm2, %v1579_v44, %v1583_v45  ;;  %v4077_v1 = vld [vmem:[%s4513_s23 + $0x3c] sm:$0xe] }
 0x172   : > { %2261 = vst.msk [vmem:[#allocation2 + $0x8] sm:$0xf] %vm2258_vm12, %v2167_v6  ;;  %3299 = vrot.lane.b32.xlu1 %v3221_v55, %s4460_s11  ;;  %v1574_v55 = vsel %vm4524_vm2, %v1569_v51, %v5468_v17  ;;  %v1761_v60 = vrot.slane %v1760_v52, 4  ;;  %v2087_v17 = vrot.slane %v4081_v11, 5  ;;  %v4140_v11 = vld [vmem:[%s4513_s23 + $0x58] sm:$0xf] }
 0x173   : > { %3297 = vrot.lane.b32.xlu0 %v3218_v2, %s4460_s11  ;;  %v1776_v2 = vsel %vm4524_vm2, %v1771_v57, %v1775_v56  ;;  %v4137_v56 = vld [vmem:[%s4513_s23 + $0x48] sm:$0xf] }
 0x174   : > { %v2201_v21 = vpop.permute.xlu1 %2200  ;;  %v2089_v25 = vrot.slane %v2087_v17, 4  ;;  %v2088_v38 = vsel %vm4668_vm6, %v4118_v31, %v2087_v17  ;;  %v4200_v31 = vld [vmem:[%s4513_s23 + $0xb4] sm:$0xf] }
 0x175   : > { %2278 = vst.msk [vmem:[#allocation2 + $0x4c] sm:$0xf] %vm2258_vm12, %v2201_v21  ;;  %v2199_v26 = vpop.permute.xlu0 %2198  ;;  %v4082_v21 = vld [vmem:[%s4513_s23 + $0x50] sm:$0x1] }
 0x176   : > { %2277 = vst.msk [vmem:[#allocation2 + $0x48] sm:$0xf] %vm2258_vm12, %v2199_v26  ;;  %3271 = vrot.lane.b32.xlu1 %v3172_v8, %s4460_s11  ;;  %v1766_v8 = vsel %vm4524_vm2, %v1761_v60, %v1765_v33  ;;  %v2090_v26 = vrot.slane %v4082_v21, 5  ;;  %v4104_v33 = vld [vmem:[%s4513_s23 + $0xa8] sm:$0xe] }
 0x177   : > { %3269 = vrot.lane.b32.xlu0 %v3169_v9, %s4460_s11  ;;  %v4117_v9 = vrot.slane %v4077_v1, 9  ;;  %v4126_v39 = vrot.slane %v4104_v33, 9  ;;  %v4199_v21 = vld [vmem:[%s4513_s23 + $0xb0] sm:$0x1] }
 0x178   : > { %v2362_v35 = vpop.permute.xlu1 %2361  ;;  %v2091_v34 = vsel %vm4668_vm6, %v2089_v25, %v2090_v26  ;;  %v4201_v26 = vld [vmem:[%s4513_s23 + $0xb8] sm:$0xf] }
 0x179   : > { %2457 = vst.msk [vmem:[#allocation2 + $0x4] sm:$0xf] %vm2455_vm13, %v2362_v35  ;;  %v2360_v42 = vpop.permute.xlu0 %2359  ;;  %v2081_v19 = vsel %vm4668_vm6, %v4117_v9, %v2080_v58  ;;  %v4175_v58 = vld [vmem:[%s4513_s23 + $0x50] sm:$0x1]  ;;  %v4177_v9 = vld [vmem:[%s4513_s23 + $0x58] sm:$0xf] }
 0x17a   : > { %2456 = vst.msk [vmem:[#allocation2] sm:$0xf] %vm2455_vm13, %v2360_v42  ;;  %3303 = vrot.lane.b32.xlu1 %v3228_v28, %s4460_s11  ;;  %v2143_v28 = vrot.slane %v4105_v22, 5  ;;  %v4174_v42 = vld [vmem:[%s4513_s23 + $0x4c] sm:$0xf]  ;;  %v2652_v4 = vshll.u32 %v4175_v58, 16 }
 0x17b   : > { %3301 = vrot.lane.b32.xlu0 %v3225_v29, %s4460_s11  ;;  %v2666_v22 = vshll.u32 %v4177_v9, 16 }
 0x17c   : > { %v2394_v48 = vpop.permute.xlu1 %2393  ;;  %v2145_v35 = vrot.slane %v2143_v28, 4  ;;  %v2144_v46 = vsel %vm4668_vm6, %v4126_v39, %v2143_v28  ;;  %v2654_v20 = vrot.slane %v2652_v4, 5 }
 0x17d   : > { %2473 = vst.msk [vmem:[#allocation2 + $0x44] sm:$0xf] %vm2455_vm13, %v2394_v48  ;;  %v2392_v54 = vpop.permute.xlu0 %2391  ;;  %v2642_v48 = vshll.u32 %v4174_v42, 16 }
 0x17e   : > { %2472 = vst.msk [vmem:[#allocation2 + $0x40] sm:$0xf] %vm2455_vm13, %v2392_v54  ;;  %1875 = vrot.lane.b32.xlu1 %v1752_v43, %s4456_s27  ;;  %v4173_v43 = vld [vmem:[%s4513_s23 + $0x48] sm:$0xf]  ;;  %v2147_v44 = vsel %vm4668_vm6, %v2145_v35, %v2146_v36  ;;  %v4198_v54 = vld [vmem:[%s4513_s23 + $0xac] sm:$0xf] }
 0x17f   : > { %1873 = vrot.lane.b32.xlu0 %v1742_v49, %s4456_s27  ;;  %v2646_v49 = vshrl.u32 %v4174_v42, 16  ;;  %v2633_v51 = vshrl.u32 %v4173_v43, 16  ;;  %v2636_v52 = vshll.u32 %v4173_v43, 16  ;;  %v2838_v1 = vshrl.u32 %v4198_v54, 16 }
 0x180   : > { %v2366_v59 = vpop.permute.xlu1 %2365  ;;  %v2844_v35 = vshll.u32 %v4199_v21, 16  ;;  %v2862_v42 = vshrl.u32 %v4201_v26, 16 }
 0x181   : > { %2459 = vst.msk [vmem:[#allocation2 + $0xc] sm:$0xf] %vm2455_vm13, %v2366_v59  ;;  %v2364_v0 = vpop.permute.xlu0 %2363  ;;  %v2648_v60 = vrot.slane %v2646_v49, 4  ;;  %v2635_v61 = vrot.slane %v2633_v51, 4  ;;  %v2638_v63 = vrot.slane %v2636_v52, 5  ;;  %v2840_v17 = vrot.slane %v2838_v1, 4 }
 0x182   : > { %2458 = vst.msk [vmem:[#allocation2 + $0x8] sm:$0xf] %vm2455_vm13, %v2364_v0  ;;  %1847 = vrot.lane.b32.xlu1 %v1584_v40, %s4456_s27  ;;  %v4197_v40 = vld [vmem:[%s4513_s23 + $0xa8] sm:$0xf]  ;;  %v2834_v0 = vshll.u32 %v4198_v54, 16  ;;  %v2864_v58 = vrot.slane %v2862_v42, 4 }
 0x183   : > { %1845 = vrot.lane.b32.xlu0 %v1574_v55, %s4456_s27  ;;  %v5563_v55 = vrot.slane %v2642_v48, 5  ;;  %v2828_v3 = vshll.u32 %v4197_v40, 16  ;;  %v2639_v12 = vor.u32 %v2638_v63, %v2635_v61  ;;  %v4202_v63 = vld [vmem:[%s4513_s23 + $0xbc] sm:$0x1] }
 0x184   : > { %v2398_v6 = vpop.permute.xlu1 %2397  ;;  %v5578_v15 = vrot.slane %v2834_v0, 5 }
 0x185   : > { %2475 = vst.msk [vmem:[#allocation2 + $0x4c] sm:$0xf] %vm2455_vm13, %v2398_v6  ;;  %v2396_v5 = vpop.permute.xlu0 %2395  ;;  %v2640_v33 = vrot.slane %v2639_v12, 4  ;;  %v4222_v12 = vld [vmem:[%s4513_s23 + $0x4c] sm:$0xf] }
 0x186   : > { %2474 = vst.msk [vmem:[#allocation2 + $0x48] sm:$0xf] %vm2455_vm13, %v2396_v5  ;;  %1879 = vrot.lane.b32.xlu1 %v1776_v2, %s4456_s27  ;;  %v2825_v2 = vshrl.u32 %v4197_v40, 16  ;;  %v2649_v5 = vor.u32 %v2648_v60, %v5563_v55 }
 0x187   : > { %1877 = vrot.lane.b32.xlu0 %v1766_v8, %s4456_s27  ;;  %v4153_v8 = vld [vmem:[%s4513_s23 + $0xa8] sm:$0xf]  ;;  %v2645_v60 = vsel %vm4524_vm2, %v2640_v33, %v5563_v55  ;;  %v5647_v33 = vld [vmem:[%s4513_s23 + $0x58] sm:$0xf] }
 0x188   : > { %v2923_v18 = vpop.permute.xlu1 %2922 }
 0x189   : > { %3018 = vst.msk [vmem:[#allocation2 + $0x4] sm:$0xf] %vm3016_vm14, %v2923_v18  ;;  %v2921_v23 = vpop.permute.xlu0 %2920  ;;  %v2827_v18 = vrot.slane %v2825_v2, 4 }
 0x18a   : > { %3017 = vst.msk [vmem:[#allocation2] sm:$0xf] %vm3016_vm14, %v2921_v23  ;;  %2180 = vrot.lane.b32.xlu1 %v2084_v13, %s4457_s28  ;;  %v4176_v13 = vld [vmem:[%s4513_s23 + $0x54] sm:$0xf]  ;;  %v2670_v23 = vshrl.u32 %v4177_v9, 16 }
 0x18b   : > { %2178 = vrot.lane.b32.xlu0 %v2081_v19, %s4457_s28  ;;  %v2830_v19 = vrot.slane %v2828_v3, 5  ;;  %v2660_v25 = vshll.u32 %v4176_v13, 16 }
 0x18c   : > { %v2955_v29 = vpop.permute.xlu1 %2954  ;;  %v2672_v39 = vrot.slane %v2670_v23, 4 }
 0x18d   : > { %3034 = vst.msk [vmem:[#allocation2 + $0x44] sm:$0xf] %vm3016_vm14, %v2955_v29  ;;  %v2953_v16 = vpop.permute.xlu0 %2952  ;;  %v2831_v36 = vor.u32 %v2830_v19, %v2827_v18  ;;  %v3175_v19 = vrot.slane %v4222_v12, 5 }
 0x18e   : > { %3033 = vst.msk [vmem:[#allocation2 + $0x40] sm:$0xf] %vm3016_vm14, %v2953_v16  ;;  %2212 = vrot.lane.b32.xlu1 %v2140_v24, %s4457_s28  ;;  %v2657_v24 = vshrl.u32 %v4176_v13, 16  ;;  %v4155_v16 = vld [vmem:[%s4513_s23 + $0xb4] sm:$0xf] }
 0x18f   : > { %2210 = vrot.lane.b32.xlu0 %v2137_v30, %s4457_s28  ;;  %v2650_v30 = vrot.slane %v2649_v5, 4  ;;  %v2832_v40 = vrot.slane %v2831_v36, 4 }
 0x190   : > { %v2927_v37 = vpop.permute.xlu1 %2926 }
 0x191   : > { %3020 = vst.msk [vmem:[#allocation2 + $0xc] sm:$0xf] %vm3016_vm14, %v2927_v37  ;;  %v2925_v41 = vpop.permute.xlu0 %2924  ;;  %v4178_v37 = vld [vmem:[%s4513_s23 + $0x5c] sm:$0x1]  ;;  %v2655_v51 = vsel %vm4524_vm2, %v2650_v30, %v2654_v20  ;;  %v5629_v20 = vld [vmem:[%s4513_s23 + $0xac] sm:$0xf] }
 0x192   : > { %3019 = vst.msk [vmem:[#allocation2 + $0x8] sm:$0xf] %vm3016_vm14, %v2925_v41  ;;  %2184 = vrot.lane.b32.xlu1 %v2091_v34, %s4457_s28  ;;  %v2841_v34 = vor.u32 %v2840_v17, %v5578_v15  ;;  %v2858_v41 = vshll.u32 %v4201_v26, 16  ;;  %v2676_v54 = vshll.u32 %v4178_v37, 16  ;;  %v3231_v26 = vrot.slane %v5629_v20, 5 }
 0x193   : > { %2182 = vrot.lane.b32.xlu0 %v2088_v38, %s4457_s28  ;;  %v5593_v38 = vrot.slane %v2666_v22, 5  ;;  %v4245_v37 = vld [vmem:[%s4513_s23 + $0xa8] sm:$0xe] }
 0x194   : > { %v2959_v45 = vpop.permute.xlu1 %2958  ;;  %v2842_v52 = vrot.slane %v2841_v34, 4  ;;  %v2678_v4 = vrot.slane %v2676_v54, 5 }
 0x195   : > { %3036 = vst.msk [vmem:[#allocation2 + $0x4c] sm:$0xf] %vm3016_vm14, %v2959_v45  ;;  %v2957_v47 = vpop.permute.xlu0 %2956  ;;  %v2662_v45 = vrot.slane %v2660_v25, 5  ;;  %v4221_v25 = vld [vmem:[%s4513_s23 + $0x48] sm:$0xe] }
 0x196   : > { %3035 = vst.msk [vmem:[#allocation2 + $0x48] sm:$0xf] %vm3016_vm14, %v2957_v47  ;;  %2216 = vrot.lane.b32.xlu1 %v2147_v44, %s4457_s28  ;;  %v2659_v44 = vrot.slane %v2657_v24, 4  ;;  %v2852_v47 = vshll.u32 %v4200_v31, 16  ;;  %v4261_v36 = vrot.slane %v4221_v25, 9 }
 0x197   : > { %2214 = vrot.lane.b32.xlu0 %v2144_v46, %s4457_s28  ;;  %v2849_v46 = vshrl.u32 %v4200_v31, 16  ;;  %v3177_v31 = vrot.slane %v3175_v19, 4 }
 0x198   : > { %v3260_v57 = vpop.permute.xlu1 %3259  ;;  %v2663_v61 = vor.u32 %v2662_v45, %v2659_v44  ;;  %v2854_v1 = vrot.slane %v2852_v47, 5  ;;  %v3233_v45 = vrot.slane %v3231_v26, 4  ;;  %v3182_v47 = vrot.slane %v5647_v33, 5  ;;  %v4063_v33 = vld [vmem:[%s4513_s23 + $0xc4] sm:$0xf] }
 0x199   : > { %3355 = vst.msk [vmem:[#allocation2 + $0x4] sm:$0xf] %vm3353_vm15, %v3260_v57  ;;  %v3258_v59 = vpop.permute.xlu0 %3257  ;;  %v2673_v57 = vor.u32 %v2672_v39, %v5593_v38  ;;  %v2851_v0 = vrot.slane %v2849_v46, 4  ;;  %v5655_v39 = vld [vmem:[%s4513_s23 + $0xb8] sm:$0xf]  ;;  %v3176_v54 = vsel %vm4668_vm6, %v4261_v36, %v3175_v19 }
 0x19a   : > { %3354 = vst.msk [vmem:[#allocation2] sm:$0xf] %vm3353_vm15, %v3258_v59  ;;  %2377 = vrot.lane.b32.xlu1 %v4138_v53, %s4458_s29  ;;  %v2846_v53 = vrot.slane %v2844_v35, 5 }
 0x19b   : > { %2375 = vrot.lane.b32.xlu0 %v4137_v56, %s4458_s29  ;;  %v5603_v56 = vrot.slane %v2858_v41, 5  ;;  %v2674_v55 = vrot.slane %v2673_v57, 4  ;;  %v2855_v5 = vor.u32 %v2854_v1, %v2851_v0  ;;  %v4224_v57 = vld [vmem:[%s4513_s23 + $0x54] sm:$0xe] }
 0x19c   : > { %v3292_v6 = vpop.permute.xlu1 %3291 }
 0x19d   : > { %3371 = vst.msk [vmem:[#allocation2 + $0x44] sm:$0xf] %vm3353_vm15, %v3292_v6  ;;  %v3290_v10 = vpop.permute.xlu0 %3289  ;;  %v2865_v6 = vor.u32 %v2864_v58, %v5603_v56  ;;  %v2856_v23 = vrot.slane %v2855_v5, 4  ;;  %v3238_v58 = vrot.slane %v5655_v39, 5  ;;  %v4262_v5 = vrot.slane %v4224_v57, 9 }
 0x19e   : > { %3370 = vst.msk [vmem:[#allocation2 + $0x40] sm:$0xf] %vm3353_vm15, %v3290_v10  ;;  %2409 = vrot.lane.b32.xlu1 %v4154_v50, %s4458_s29  ;;  %v2847_v50 = vsel %vm4524_vm2, %v2842_v52, %v2846_v53  ;;  %v2837_v10 = vsel %vm4524_vm2, %v2832_v40, %v5578_v15  ;;  %v2679_v15 = vsel %vm4524_vm2, %v2674_v55, %v2678_v4  ;;  %v4059_v52 = vld [vmem:[%s4513_s23 + $0xb4] sm:$0xf]  ;;  %v4269_v40 = vrot.slane %v4245_v37, 9 }
 0x19f   : > { %2407 = vrot.lane.b32.xlu0 %v4153_v8, %s4458_s29  ;;  %v2868_v8 = vshll.u32 %v4202_v63, 16  ;;  %v2866_v17 = vrot.slane %v2865_v6, 4  ;;  %v2861_v35 = vsel %vm4524_vm2, %v2856_v23, %v5603_v56  ;;  %v4250_v56 = vld [vmem:[%s4513_s23 + $0xbc] sm:$0x1]  ;;  %v1778_v55 = vshrl.u32 %v4059_v52, 16 }
 0x1a0   : > { %v3264_v7 = vpop.permute.xlu1 %3263  ;;  %v1781_v4 = vshll.u32 %v4059_v52, 16  ;;  %v3240_v12 = vrot.slane %v3238_v58, 4  ;;  %v4062_v39 = vld [vmem:[%s4513_s23 + $0xc0] sm:$0xf] }
 0x1a1   : > { %3357 = vst.msk [vmem:[#allocation2 + $0xc] sm:$0xf] %vm3353_vm15, %v3264_v7  ;;  %v3262_v28 = vpop.permute.xlu0 %3261  ;;  %v4412_v29 = vld [vmem:[#allocation2] sm:$0xff]   ;;  %v2870_v18 = vrot.slane %v2868_v8, 5  ;;  %v4223_v7 = vld [vmem:[%s4513_s23 + $0x50] sm:$0x1] }
 0x1a2   : > { %3356 = vst.msk [vmem:[#allocation2 + $0x8] sm:$0xf] %vm3353_vm15, %v3262_v28  ;;  %2381 = vrot.lane.b32.xlu1 %v4140_v11, %s4458_s29  ;;  %4337 = vmatprep.mubr.msk.bf16.mxu0 %vm3525_vm0, %v4412_v29  ;;  %v2664_v11 = vrot.slane %v2663_v61, 4  ;;  %v4036_v28 = vld [vmem:[%s4513_s23 + $0x58] sm:$0xf]  ;;  %v3184_v8 = vrot.slane %v3182_v47, 4 }
 0x1a3   : > { %2379 = vrot.lane.b32.xlu0 %v4139_v14, %s4458_s29  ;;  %v4035_v29 = vld [vmem:[%s4513_s23 + $0x54] sm:$0xf]  ;;  %v2871_v30 = vsel %vm4524_vm2, %v2866_v17, %v2870_v18  ;;  %v1595_v41 = vshll.u32 %v4036_v28, 16  ;;  %v1599_v42 = vshrl.u32 %v4036_v28, 16 }
 0x1a4   : > { %v3296_v43 = vpop.permute.xlu1 %3295  ;;  %v2669_v22 = vsel %vm4524_vm2, %v2664_v11, %v5593_v38  ;;  %v1589_v44 = vshll.u32 %v4035_v29, 16  ;;  %v3232_v11 = vsel %vm4668_vm6, %v4269_v40, %v3231_v26  ;;  %v4061_v26 = vld [vmem:[%s4513_s23 + $0xbc] sm:$0x1]  ;;  %v1805_v40 = vshll.u32 %v4062_v39, 16 }
 0x1a5   : > { %3373 = vst.msk [vmem:[#allocation2 + $0x4c] sm:$0xf] %vm3353_vm15, %v3296_v43  ;;  %v3294_v48 = vpop.permute.xlu0 %3293  ;;  %v4414_v49 = vld [vmem:[#allocation2 + $0x40] sm:$0xff]   ;;  %v1586_v43 = vshrl.u32 %v4035_v29, 16  ;;  %v5673_v61 = vrot.slane %v1595_v41, 5  ;;  %v1601_v63 = vrot.slane %v1599_v42, 4 }
 0x1a6   : > { %3372 = vst.msk [vmem:[#allocation2 + $0x48] sm:$0xf] %vm3353_vm15, %v3294_v48  ;;  %2413 = vrot.lane.b32.xlu1 %v4156_v32, %s4458_s29  ;;  %4353 = vmatprep.mubr.msk.bf16.mxu1 %vm3525_vm0, %v4414_v49  ;;  %v3178_v32 = vrot.slane %v4223_v7, 5  ;;  %v4226_v49 = vld [vmem:[%s4513_s23 + $0x5c] sm:$0x1]  ;;  %v1591_v1 = vrot.slane %v1589_v44, 5 }
 0x1a7   : > { %2411 = vrot.lane.b32.xlu0 %v4155_v16, %s4458_s29  ;;  %v4247_v16 = vld [vmem:[%s4513_s23 + $0xb0] sm:$0x1]  ;;  %v1588_v0 = vrot.slane %v1586_v43, 4  ;;  %v1602_v18 = vor.u32 %v1601_v63, %v5673_v61  ;;  %v1780_v7 = vrot.slane %v1778_v55, 4  ;;  %v1797_v43 = vshll.u32 %v4061_v26, 16 }
 0x1a8   : > { %v1868_v59 = vpop.permute.xlu1 %1867  ;;  %v3234_v46 = vrot.slane %v4247_v16, 5  ;;  %v3179_v48 = vsel %vm4668_vm6, %v3177_v31, %v3178_v32  ;;  %v3183_v31 = vsel %vm4668_vm6, %v4262_v5, %v3182_v47  ;;  %v1811_v47 = vshll.u32 %v4063_v33, 16  ;;  %v4085_v26 = vld [vmem:[%s4513_s23 + $0x5c] sm:$0x1] }
 0x1a9   : > { %1943 = vst.msk [vmem:[#allocation2 + $0x54] sm:$0xf] %vm1921_vm11, %v1868_v59  ;;  %v1866_v2 = vpop.permute.xlu0 %1865  ;;  %v4415_v3 = vld [vmem:[#allocation2 + $0x8] sm:$0xff]   ;;  %v1592_v20 = vor.u32 %v1591_v1, %v1588_v0  ;;  %v1603_v37 = vrot.slane %v1602_v18, 4  ;;  %v4084_v18 = vld [vmem:[%s4513_s23 + $0x58] sm:$0xf] }
 0x1aa   : > { %1942 = vst.msk [vmem:[#allocation2 + $0x50] sm:$0xf] %vm1921_vm11, %v1866_v2  ;;  %2938 = vrot.lane.b32.xlu1 %v2655_v51, %s4459_s30  ;;  %4338 = vmatmul.mubr.msk.bf16.vlgmr.msra.gmra.mxu0 %vm3525_vm0, %v4415_v3  ;;  %v4060_v51 = vld [vmem:[%s4513_s23 + $0xb8] sm:$0xf]  ;;  %v4037_v2 = vld [vmem:[%s4513_s23 + $0x5c] sm:$0x1]  ;;  %v3235_v6 = vsel %vm4668_vm6, %v3233_v45, %v3234_v46 }
 0x1ab   : > { %2936 = vrot.lane.b32.xlu0 %v2645_v60, %s4459_s30  ;;  %v4248_v60 = vld [vmem:[%s4513_s23 + $0xb4] sm:$0xe]  ;;  %v1787_v3 = vshll.u32 %v4060_v51, 16  ;;  %v1605_v19 = vshll.u32 %v4037_v2, 16  ;;  %v1593_v41 = vrot.slane %v1592_v20, 4  ;;  %v1813_v1 = vrot.slane %v1811_v47, 5 }
 0x1ac   : > { %v1872_v9 = vpop.permute.xlu1 %1871  ;;  %v4270_v17 = vrot.slane %v4248_v60, 9  ;;  %v1799_v60 = vrot.slane %v1797_v43, 5 }
 0x1ad   : > { %1945 = vst.msk [vmem:[#allocation2 + $0x5c] sm:$0xf] %vm1921_vm11, %v1872_v9  ;;  %v1870_v13 = vpop.permute.xlu0 %1869  ;;  %v4416_v14 = vld [vmem:[#allocation2 + $0x48] sm:$0xff]   ;;  %v3185_v9 = vrot.slane %v4226_v49, 5 }
 0x1ae   : > { %1944 = vst.msk [vmem:[#allocation2 + $0x58] sm:$0xf] %vm1921_vm11, %v1870_v13  ;;  %2970 = vrot.lane.b32.xlu1 %v2847_v50, %s4459_s30  ;;  %4354 = vmatmul.mubr.msk.bf16.vlgmr.msra.gmra.mxu1 %vm3525_vm0, %v4416_v14  ;;  %v1791_v50 = vshrl.u32 %v4060_v51, 16  ;;  %v3241_v13 = vrot.slane %v4250_v56, 5  ;;  %v4039_v14 = vld [vmem:[%s4513_s23 + $0x64] sm:$0xf]  ;;  %v3239_v36 = vsel %vm4668_vm6, %v4270_v17, %v3238_v58  ;;  %v1598_v58 = vsel %vm4524_vm2, %v1593_v41, %v5673_v61 }
 0x1af   : > { %2968 = vrot.lane.b32.xlu0 %v2837_v10, %s4459_s30  ;;  %v3186_v25 = vsel %vm4668_vm6, %v3184_v8, %v3185_v9  ;;  %v1619_v28 = vshll.u32 %v4039_v14, 16  ;;  %v1623_v29 = vshrl.u32 %v4039_v14, 16  ;;  %v4040_v51 = vld [vmem:[%s4513_s23 + $0x68] sm:$0x1]  ;;  %v1807_v8 = vrot.slane %v1805_v40, 5 }
 0x1b0   : > { %v2173_v21 = vpop.permute.xlu1 %2172  ;;  %v1793_v23 = vrot.slane %v1791_v50, 4  ;;  %v1629_v0 = vshll.u32 %v4040_v51, 16  ;;  %v4107_v41 = vld [vmem:[%s4513_s23 + $0xb4] sm:$0xe]  ;;  %v4111_v51 = vld [vmem:[%s4513_s23 + $0xc4] sm:$0xf] }
 0x1b1   : > { %2264 = vst.msk [vmem:[#allocation2 + $0x14] sm:$0xf] %vm2258_vm12, %v2173_v21  ;;  %v2171_v24 = vpop.permute.xlu0 %2170  ;;  %v4038_v21 = vld [vmem:[%s4513_s23 + $0x60] sm:$0xf]  ;;  %v5708_v45 = vrot.slane %v1619_v28, 5  ;;  %v1625_v46 = vrot.slane %v1623_v29, 4 }
 0x1b2   : > { %2263 = vst.msk [vmem:[#allocation2 + $0x10] sm:$0xf] %vm2258_vm12, %v2171_v24  ;;  %2942 = vrot.lane.b32.xlu1 %v2679_v15, %s4459_s30  ;;  %v1783_v24 = vrot.slane %v1781_v4, 5  ;;  %v1610_v32 = vshrl.u32 %v4038_v21, 16  ;;  %v1613_v16 = vshll.u32 %v4038_v21, 16 }
 0x1b3   : > { %2940 = vrot.lane.b32.xlu0 %v2669_v22, %s4459_s30  ;;  %v5689_v22 = vrot.slane %v1787_v3, 5  ;;  %v1626_v63 = vor.u32 %v1625_v46, %v5708_v45  ;;  %v4064_v4 = vld [vmem:[%s4513_s23 + $0xc8] sm:$0x1]  ;;  %v4108_v28 = vld [vmem:[%s4513_s23 + $0xb8] sm:$0xf] }
 0x1b4   : > { %v2205_v34 = vpop.permute.xlu1 %2204  ;;  %v1784_v44 = vor.u32 %v1783_v24, %v1780_v7  ;;  %v1612_v52 = vrot.slane %v1610_v32, 4 }
 0x1b5   : > { %2280 = vst.msk [vmem:[#allocation2 + $0x54] sm:$0xf] %vm2258_vm12, %v2205_v34  ;;  %v2203_v38 = vpop.permute.xlu0 %2202  ;;  %v1794_v42 = vor.u32 %v1793_v23, %v5689_v22  ;;  %v2094_v23 = vrot.slane %v4084_v18, 5  ;;  %v4142_v18 = vld [vmem:[%s4513_s23 + $0x64] sm:$0xf] }
 0x1b6   : > { %2279 = vst.msk [vmem:[#allocation2 + $0x50] sm:$0xf] %vm2258_vm12, %v2203_v38  ;;  %2974 = vrot.lane.b32.xlu1 %v2871_v30, %s4459_s30  ;;  %v1607_v38 = vrot.slane %v1605_v19, 5  ;;  %v1785_v50 = vrot.slane %v1784_v44, 4 }
 0x1b7   : > { %2972 = vrot.lane.b32.xlu0 %v2861_v35, %s4459_s30  ;;  %v3242_v35 = vsel %vm4668_vm6, %v3240_v12, %v3241_v13  ;;  %v1821_v12 = vshll.u32 %v4064_v4, 16  ;;  %v2096_v32 = vrot.slane %v2094_v23, 4 }
 0x1b8   : > { %v2177_v53 = vpop.permute.xlu1 %2176  ;;  %v1608_v56 = vsel %vm4524_vm2, %v1603_v37, %v1607_v38  ;;  %v1790_v14 = vsel %vm4524_vm2, %v1785_v50, %v5689_v22  ;;  %v4109_v37 = vld [vmem:[%s4513_s23 + $0xbc] sm:$0x1]  ;;  %v4087_v38 = vld [vmem:[%s4513_s23 + $0x64] sm:$0xf] }
 0x1b9   : > { %2266 = vst.msk [vmem:[#allocation2 + $0x1c] sm:$0xf] %vm2258_vm12, %v2177_v53  ;;  %v2175_v59 = vpop.permute.xlu0 %2174  ;;  %v1615_v53 = vrot.slane %v1613_v16, 5  ;;  %v1823_v22 = vrot.slane %v1821_v12, 5  ;;  %v2097_v16 = vrot.slane %v4085_v26, 5  ;;  %v2153_v44 = vrot.slane %v4109_v37, 5 }
 0x1ba   : > { %2265 = vst.msk [vmem:[#allocation2 + $0x18] sm:$0xf] %vm2258_vm12, %v2175_v59  ;;  %3275 = vrot.lane.b32.xlu1 %v3179_v48, %s4460_s11  ;;  %v1815_v48 = vshrl.u32 %v4063_v33, 16  ;;  %v1795_v59 = vrot.slane %v1794_v42, 4  ;;  %v2150_v33 = vrot.slane %v4108_v28, 5 }
 0x1bb   : > { %3273 = vrot.lane.b32.xlu0 %v3176_v54, %s4460_s11  ;;  %v1802_v54 = vshrl.u32 %v4062_v39, 16  ;;  %v1616_v55 = vor.u32 %v1615_v53, %v1612_v52  ;;  %v2098_v42 = vsel %vm4668_vm6, %v2096_v32, %v2097_v16  ;;  %v4086_v53 = vld [vmem:[%s4513_s23 + $0x60] sm:$0xe]  ;;  %v4183_v37 = vld [vmem:[%s4513_s23 + $0x70] sm:$0xf] }
 0x1bc   : > { %v2209_v10 = vpop.permute.xlu1 %2208  ;;  %v1817_v2 = vrot.slane %v1815_v48, 4  ;;  %v1800_v61 = vsel %vm4524_vm2, %v1795_v59, %v1799_v60  ;;  %v2152_v43 = vrot.slane %v2150_v33, 4  ;;  %v4127_v48 = vrot.slane %v4107_v41, 9  ;;  %v4144_v41 = vld [vmem:[%s4513_s23 + $0x70] sm:$0xf] }
 0x1bd   : > { %2282 = vst.msk [vmem:[#allocation2 + $0x5c] sm:$0xf] %vm2258_vm12, %v2209_v10  ;;  %v2207_v15 = vpop.permute.xlu0 %2206  ;;  %v1627_v10 = vrot.slane %v1626_v63, 4  ;;  %v4120_v60 = vrot.slane %v4086_v53, 9  ;;  %v4112_v63 = vld [vmem:[%s4513_s23 + $0xc8] sm:$0x1] }
 0x1be   : > { %2281 = vst.msk [vmem:[#allocation2 + $0x58] sm:$0xf] %vm2258_vm12, %v2207_v15  ;;  %3307 = vrot.lane.b32.xlu1 %v3235_v6, %s4460_s11  ;;  %v1804_v6 = vrot.slane %v1802_v54, 4  ;;  %v1818_v5 = vor.u32 %v1817_v2, %v1813_v1  ;;  %v1617_v15 = vrot.slane %v1616_v55, 4  ;;  %v2154_v54 = vsel %vm4668_vm6, %v2152_v43, %v2153_v44  ;;  %v4182_v44 = vld [vmem:[%s4513_s23 + $0x6c] sm:$0xf] }
 0x1bf   : > { %3305 = vrot.lane.b32.xlu0 %v3232_v11, %s4460_s11  ;;  %v1631_v11 = vrot.slane %v1629_v0, 5  ;;  %v2151_v59 = vsel %vm4668_vm6, %v4127_v48, %v2150_v33  ;;  %v2160_v50 = vrot.slane %v4112_v63, 5  ;;  %v4158_v33 = vld [vmem:[%s4513_s23 + $0xc4] sm:$0xf]  ;;  %v2714_v53 = vshll.u32 %v4183_v37, 16 }
 0x1c0   : > { %v2370_v30 = vpop.permute.xlu1 %2369  ;;  %v1808_v17 = vor.u32 %v1807_v8, %v1804_v6  ;;  %v1819_v21 = vrot.slane %v1818_v5, 4  ;;  %v1622_v24 = vsel %vm4524_vm2, %v1617_v15, %v5708_v45  ;;  %v2101_v45 = vrot.slane %v4087_v38, 5  ;;  %v4180_v8 = vld [vmem:[%s4513_s23 + $0x64] sm:$0xf] }
 0x1c1   : > { %2461 = vst.msk [vmem:[#allocation2 + $0x14] sm:$0xf] %vm2455_vm13, %v2370_v30  ;;  %v2368_v34 = vpop.permute.xlu0 %2367  ;;  %v1632_v20 = vsel %vm4524_vm2, %v1627_v10, %v1631_v11  ;;  %v4083_v30 = vld [vmem:[%s4513_s23 + $0x54] sm:$0xe]  ;;  %v2690_v11 = vshll.u32 %v4180_v8, 16  ;;  %v2694_v5 = vshrl.u32 %v4180_v8, 16 }
 0x1c2   : > { %2460 = vst.msk [vmem:[#allocation2 + $0x10] sm:$0xf] %vm2455_vm13, %v2368_v34  ;;  %3279 = vrot.lane.b32.xlu1 %v3186_v25, %s4460_s11  ;;  %v1809_v25 = vrot.slane %v1808_v17, 4  ;;  %v2103_v40 = vrot.slane %v2101_v45, 4  ;;  %v2102_v4 = vsel %vm4668_vm6, %v4120_v60, %v2101_v45  ;;  %v4143_v45 = vld [vmem:[%s4513_s23 + $0x6c] sm:$0xf] }
 0x1c3   : > { %3277 = vrot.lane.b32.xlu0 %v3183_v31, %s4460_s11  ;;  %v1824_v31 = vsel %vm4524_vm2, %v1819_v21, %v1823_v22  ;;  %v4204_v21 = vld [vmem:[%s4513_s23 + $0xc4] sm:$0xf]  ;;  %v4203_v22 = vld [vmem:[%s4513_s23 + $0xc0] sm:$0xf]  ;;  %v5836_v8 = vrot.slane %v2714_v53, 5 }
 0x1c4   : > { %v2402_v49 = vpop.permute.xlu1 %2401  ;;  %v2873_v32 = vshrl.u32 %v4203_v22, 16  ;;  %v2876_v16 = vshll.u32 %v4203_v22, 16  ;;  %v4252_v53 = vld [vmem:[%s4513_s23 + $0xc4] sm:$0xf] }
 0x1c5   : > { %2477 = vst.msk [vmem:[#allocation2 + $0x54] sm:$0xf] %vm2455_vm13, %v2402_v49  ;;  %v2400_v57 = vpop.permute.xlu0 %2399  ;;  %v4088_v49 = vld [vmem:[%s4513_s23 + $0x68] sm:$0x1] }
 0x1c6   : > { %2476 = vst.msk [vmem:[#allocation2 + $0x50] sm:$0xf] %vm2455_vm13, %v2400_v57  ;;  %3311 = vrot.lane.b32.xlu1 %v3242_v35, %s4460_s11  ;;  %v1814_v35 = vsel %vm4524_vm2, %v1809_v25, %v1813_v1  ;;  %v2104_v57 = vrot.slane %v4088_v49, 5  ;;  %v4110_v1 = vld [vmem:[%s4513_s23 + $0xc0] sm:$0xe]  ;;  %v2875_v48 = vrot.slane %v2873_v32, 4 }
 0x1c7   : > { %3309 = vrot.lane.b32.xlu0 %v3239_v36, %s4460_s11  ;;  %v4119_v36 = vrot.slane %v4083_v30, 9  ;;  %v4128_v6 = vrot.slane %v4110_v1, 9  ;;  %v2882_v30 = vshll.u32 %v4204_v21, 16  ;;  %v2878_v49 = vrot.slane %v2876_v16, 5  ;;  %v4160_v1 = vld [vmem:[%s4513_s23 + $0xd0] sm:$0xf] }
 0x1c8   : > { %v2374_v3 = vpop.permute.xlu1 %2373  ;;  %v2105_v2 = vsel %vm4668_vm6, %v2103_v40, %v2104_v57  ;;  %v2705_v57 = vshrl.u32 %v4182_v44, 16 }
 0x1c9   : > { %2463 = vst.msk [vmem:[#allocation2 + $0x1c] sm:$0xf] %vm2455_vm13, %v2374_v3  ;;  %v2372_v9 = vpop.permute.xlu0 %2371  ;;  %v2095_v47 = vsel %vm4668_vm6, %v4119_v36, %v2094_v23  ;;  %v4157_v36 = vld [vmem:[%s4513_s23 + $0xc0] sm:$0xf] }
 0x1ca   : > { %2462 = vst.msk [vmem:[#allocation2 + $0x18] sm:$0xf] %vm2455_vm13, %v2372_v9  ;;  %1851 = vrot.lane.b32.xlu1 %v1608_v56, %s4456_s27  ;;  %v2157_v56 = vrot.slane %v4111_v51, 5 }
 0x1cb   : > { %1849 = vrot.lane.b32.xlu0 %v1598_v58, %s4456_s27 }
 0x1cc   : > { %v2406_v13 = vpop.permute.xlu1 %2405  ;;  %v2159_v3 = vrot.slane %v2157_v56, 4 }
 0x1cd   : > { %2479 = vst.msk [vmem:[#allocation2 + $0x5c] sm:$0xf] %vm2455_vm13, %v2406_v13  ;;  %v2404_v19 = vpop.permute.xlu0 %2403  ;;  %v2158_v13 = vsel %vm4668_vm6, %v4128_v6, %v2157_v56  ;;  %v2708_v56 = vshll.u32 %v4182_v44, 16  ;;  %v4184_v6 = vld [vmem:[%s4513_s23 + $0x74] sm:$0x1] }
 0x1ce   : > { %2478 = vst.msk [vmem:[#allocation2 + $0x58] sm:$0xf] %vm2455_vm13, %v2404_v19  ;;  %1883 = vrot.lane.b32.xlu1 %v1800_v61, %s4456_s27  ;;  %v4179_v61 = vld [vmem:[%s4513_s23 + $0x60] sm:$0xf]  ;;  %v2161_v10 = vsel %vm4668_vm6, %v2159_v3, %v2160_v50  ;;  %v5799_v19 = vrot.slane %v2690_v11, 5 }
 0x1cf   : > { %1881 = vrot.lane.b32.xlu0 %v1790_v14, %s4456_s27  ;;  %v2681_v15 = vshrl.u32 %v4179_v61, 16  ;;  %v2684_v17 = vshll.u32 %v4179_v61, 16 }
 0x1d0   : > { %v2931_v7 = vpop.permute.xlu1 %2930 }
 0x1d1   : > { %3022 = vst.msk [vmem:[#allocation2 + $0x14] sm:$0xf] %vm3016_vm14, %v2931_v7  ;;  %v2929_v29 = vpop.permute.xlu0 %2928  ;;  %v4141_v7 = vld [vmem:[%s4513_s23 + $0x60] sm:$0xf]  ;;  %v2683_v26 = vrot.slane %v2681_v15, 4  ;;  %v2686_v28 = vrot.slane %v2684_v17, 5 }
 0x1d2   : > { %3021 = vst.msk [vmem:[#allocation2 + $0x10] sm:$0xf] %vm3016_vm14, %v2929_v29  ;;  %1855 = vrot.lane.b32.xlu1 %v1632_v20, %s4456_s27  ;;  %v2696_v20 = vrot.slane %v2694_v5, 4  ;;  %v4181_v29 = vld [vmem:[%s4513_s23 + $0x68] sm:$0x1]  ;;  %v2707_v5 = vrot.slane %v2705_v57, 4 }
 0x1d3   : > { %1853 = vrot.lane.b32.xlu0 %v1622_v24, %s4456_s27  ;;  %v2687_v43 = vor.u32 %v2686_v28, %v2683_v26 }
 0x1d4   : > { %v2963_v34 = vpop.permute.xlu1 %2962 }
 0x1d5   : > { %3038 = vst.msk [vmem:[#allocation2 + $0x54] sm:$0xf] %vm3016_vm14, %v2963_v34  ;;  %v2961_v39 = vpop.permute.xlu0 %2960  ;;  %v2697_v34 = vor.u32 %v2696_v20, %v5799_v19  ;;  %v2688_v3 = vrot.slane %v2687_v43, 4 }
 0x1d6   : > { %3037 = vst.msk [vmem:[#allocation2 + $0x50] sm:$0xf] %vm3016_vm14, %v2961_v39  ;;  %1887 = vrot.lane.b32.xlu1 %v1824_v31, %s4456_s27  ;;  %v2886_v31 = vshrl.u32 %v4204_v21, 16 }
 0x1d7   : > { %1885 = vrot.lane.b32.xlu0 %v1814_v35, %s4456_s27  ;;  %v2698_v51 = vrot.slane %v2697_v34, 4  ;;  %v2693_v20 = vsel %vm4524_vm2, %v2688_v3, %v5799_v19 }
 0x1d8   : > { %v2935_v46 = vpop.permute.xlu1 %2934 }
 0x1d9   : > { %3024 = vst.msk [vmem:[#allocation2 + $0x1c] sm:$0xf] %vm3016_vm14, %v2935_v46  ;;  %v2933_v52 = vpop.permute.xlu0 %2932  ;;  %v5820_v46 = vrot.slane %v2882_v30, 5  ;;  %v4208_v30 = vld [vmem:[%s4513_s23 + $0xd4] sm:$0x1] }
 0x1da   : > { %3023 = vst.msk [vmem:[#allocation2 + $0x18] sm:$0xf] %vm3016_vm14, %v2933_v52  ;;  %2188 = vrot.lane.b32.xlu1 %v2098_v42, %s4457_s28  ;;  %v2700_v42 = vshll.u32 %v4181_v29, 16  ;;  %v4205_v52 = vld [vmem:[%s4513_s23 + $0xc8] sm:$0x1] }
 0x1db   : > { %2186 = vrot.lane.b32.xlu0 %v2095_v47, %s4457_s28  ;;  %v2888_v47 = vrot.slane %v2886_v31, 4 }
 0x1dc   : > { %v2967_v58 = vpop.permute.xlu1 %2966  ;;  %v2702_v63 = vrot.slane %v2700_v42, 5  ;;  %v4228_v42 = vld [vmem:[%s4513_s23 + $0x64] sm:$0xf] }
 0x1dd   : > { %3040 = vst.msk [vmem:[#allocation2 + $0x5c] sm:$0xf] %vm3016_vm14, %v2967_v58  ;;  %v2965_v0 = vpop.permute.xlu0 %2964  ;;  %v4207_v58 = vld [vmem:[%s4513_s23 + $0xd0] sm:$0xf]  ;;  %v2889_v50 = vor.u32 %v2888_v47, %v5820_v46  ;;  %v3189_v47 = vrot.slane %v4228_v42, 5 }
 0x1de   : > { %3039 = vst.msk [vmem:[#allocation2 + $0x58] sm:$0xf] %vm3016_vm14, %v2965_v0  ;;  %2220 = vrot.lane.b32.xlu1 %v2154_v54, %s4457_s28  ;;  %v2718_v54 = vshrl.u32 %v4183_v37, 16  ;;  %v4206_v0 = vld [vmem:[%s4513_s23 + $0xcc] sm:$0xf]  ;;  %v2906_v61 = vshll.u32 %v4207_v58, 16 }
 0x1df   : > { %2218 = vrot.lane.b32.xlu0 %v2151_v59, %s4457_s28  ;;  %v2890_v21 = vrot.slane %v2889_v50, 4  ;;  %v4251_v50 = vld [vmem:[%s4513_s23 + $0xc0] sm:$0xe] }
 0x1e0   : > { %v3268_v55 = vpop.permute.xlu1 %3267 }
 0x1e1   : > { %3359 = vst.msk [vmem:[#allocation2 + $0x14] sm:$0xf] %vm3353_vm15, %v3268_v55  ;;  %v3266_v9 = vpop.permute.xlu0 %3265  ;;  %v2892_v55 = vshll.u32 %v4205_v52, 16  ;;  %v4229_v52 = vld [vmem:[%s4513_s23 + $0x68] sm:$0x1] }
 0x1e2   : > { %3358 = vst.msk [vmem:[#allocation2 + $0x10] sm:$0xf] %vm3353_vm15, %v3266_v9  ;;  %2192 = vrot.lane.b32.xlu1 %v2105_v2, %s4457_s28  ;;  %v4159_v2 = vld [vmem:[%s4513_s23 + $0xcc] sm:$0xf]  ;;  %v2720_v9 = vrot.slane %v2718_v54, 4 }
 0x1e3   : > { %2190 = vrot.lane.b32.xlu0 %v2102_v4, %s4457_s28  ;;  %v2879_v4 = vor.u32 %v2878_v49, %v2875_v48  ;;  %v2894_v22 = vrot.slane %v2892_v55, 5 }
 0x1e4   : > { %v3300_v12 = vpop.permute.xlu1 %3299 }
 0x1e5   : > { %3375 = vst.msk [vmem:[#allocation2 + $0x54] sm:$0xf] %vm3353_vm15, %v3300_v12  ;;  %v3298_v14 = vpop.permute.xlu0 %3297  ;;  %v2710_v12 = vrot.slane %v2708_v56, 5  ;;  %v2880_v28 = vrot.slane %v2879_v4, 4  ;;  %v2895_v16 = vsel %vm4524_vm2, %v2890_v21, %v2894_v22  ;;  %v3191_v56 = vrot.slane %v3189_v47, 4 }
 0x1e6   : > { %3374 = vst.msk [vmem:[#allocation2 + $0x50] sm:$0xf] %vm3353_vm15, %v3298_v14  ;;  %2224 = vrot.lane.b32.xlu1 %v2161_v10, %s4457_s28  ;;  %v2910_v10 = vshrl.u32 %v4207_v58, 16  ;;  %v2900_v14 = vshll.u32 %v4206_v0, 16  ;;  %v3192_v58 = vrot.slane %v4229_v52, 5 }
 0x1e7   : > { %2222 = vrot.lane.b32.xlu0 %v2158_v13, %s4457_s28  ;;  %v2897_v13 = vshrl.u32 %v4206_v0, 16  ;;  %v2711_v29 = vor.u32 %v2710_v12, %v2707_v5  ;;  %v4230_v12 = vld [vmem:[%s4513_s23 + $0x6c] sm:$0xe]  ;;  %v4256_v22 = vld [vmem:[%s4513_s23 + $0xd4] sm:$0x1] }
 0x1e8   : > { %v3272_v23 = vpop.permute.xlu1 %3271  ;;  %v2902_v32 = vrot.slane %v2900_v14, 5  ;;  %v3193_v27 = vsel %vm4668_vm6, %v3191_v56, %v3192_v58  ;;  %v4264_v21 = vrot.slane %v4230_v12, 9 }
 0x1e9   : > { %3361 = vst.msk [vmem:[#allocation2 + $0x1c] sm:$0xf] %vm3353_vm15, %v3272_v23  ;;  %v3270_v24 = vpop.permute.xlu0 %3269  ;;  %v4417_v25 = vld [vmem:[#allocation2 + $0x10] sm:$0xff]   ;;  %v2721_v23 = vor.u32 %v2720_v9, %v5836_v8  ;;  %v2899_v31 = vrot.slane %v2897_v13, 4 }
 0x1ea   : > { %3360 = vst.msk [vmem:[#allocation2 + $0x18] sm:$0xf] %vm3353_vm15, %v3270_v24  ;;  %2385 = vrot.lane.b32.xlu1 %v4142_v18, %s4458_s29  ;;  %4341 = vmatprep.mubr.msk.bf16.mxu0 %vm3525_vm0, %v4417_v25  ;;  %v2703_v18 = vsel %vm4524_vm2, %v2698_v51, %v2702_v63  ;;  %v2908_v24 = vrot.slane %v2906_v61, 5  ;;  %v2912_v25 = vrot.slane %v2910_v10, 4  ;;  %v4271_v61 = vrot.slane %v4251_v50, 9 }
 0x1eb   : > { %2383 = vrot.lane.b32.xlu0 %v4141_v7, %s4458_s29  ;;  %v2724_v7 = vshll.u32 %v4184_v6, 16  ;;  %v4232_v10 = vld [vmem:[%s4513_s23 + $0x74] sm:$0x1] }
 0x1ec   : > { %v3304_v35 = vpop.permute.xlu1 %3303 }
 0x1ed   : > { %3377 = vst.msk [vmem:[#allocation2 + $0x5c] sm:$0xf] %vm3353_vm15, %v3304_v35  ;;  %v3302_v38 = vpop.permute.xlu0 %3301  ;;  %v4418_v39 = vld [vmem:[#allocation2 + $0x50] sm:$0xff]   ;;  %v2726_v34 = vrot.slane %v2724_v7, 5  ;;  %v2913_v35 = vor.u32 %v2912_v25, %v2908_v24  ;;  %v4254_v7 = vld [vmem:[%s4513_s23 + $0xcc] sm:$0xe] }
 0x1ee   : > { %3376 = vst.msk [vmem:[#allocation2 + $0x58] sm:$0xf] %vm3353_vm15, %v3302_v38  ;;  %2417 = vrot.lane.b32.xlu1 %v4158_v33, %s4458_s29  ;;  %4357 = vmatprep.mubr.msk.bf16.mxu1 %vm3525_vm0, %v4418_v39  ;;  %v2722_v33 = vrot.slane %v2721_v23, 4  ;;  %v2885_v38 = vsel %vm4524_vm2, %v2880_v28, %v5820_v46  ;;  %v2712_v39 = vrot.slane %v2711_v29, 4 }
 0x1ef   : > { %2415 = vrot.lane.b32.xlu0 %v4157_v36, %s4458_s29  ;;  %v2916_v36 = vshll.u32 %v4208_v30, 16  ;;  %v4272_v30 = vrot.slane %v4254_v7, 9 }
 0x1f0   : > { %v1876_v40 = vpop.permute.xlu1 %1875  ;;  %v2727_v44 = vsel %vm4524_vm2, %v2722_v33, %v2726_v34  ;;  %v2717_v49 = vsel %vm4524_vm2, %v2712_v39, %v5836_v8 }
 0x1f1   : > { %1947 = vst.msk [vmem:[#allocation2 + $0x64] sm:$0xf] %vm1921_vm11, %v1876_v40  ;;  %v1874_v59 = vpop.permute.xlu0 %1873  ;;  %v4419_v60 = vld [vmem:[#allocation2 + $0x18] sm:$0xff]   ;;  %v2918_v46 = vrot.slane %v2916_v36, 5  ;;  %v4227_v40 = vld [vmem:[%s4513_s23 + $0x60] sm:$0xe] }
 0x1f2   : > { %1946 = vst.msk [vmem:[#allocation2 + $0x60] sm:$0xf] %vm1921_vm11, %v1874_v59  ;;  %2389 = vrot.lane.b32.xlu1 %v4144_v41, %s4458_s29  ;;  %4342 = vmatmul.mubr.msk.bf16.gmra.mxu0 %vm3525_vm0, %v4419_v60  ;;  %v2903_v41 = vor.u32 %v2902_v32, %v2899_v31  ;;  %v3245_v59 = vrot.slane %v4252_v53, 5  ;;  %v4263_v0 = vrot.slane %v4227_v40, 9 }
 0x1f3   : > { %2387 = vrot.lane.b32.xlu0 %v4143_v45, %s4458_s29  ;;  %v2914_v45 = vrot.slane %v2913_v35, 4 }
 0x1f4   : > { %v1848_v11 = vpop.permute.xlu1 %1847  ;;  %v2904_v51 = vrot.slane %v2903_v41, 4  ;;  %v3247_v55 = vrot.slane %v3245_v59, 4  ;;  %v3190_v9 = vsel %vm4668_vm6, %v4263_v0, %v3189_v47 }
 0x1f5   : > { %1933 = vst.msk [vmem:[#allocation2 + $0x2c] sm:$0xf] %vm1921_vm11, %v1848_v11  ;;  %v1846_v15 = vpop.permute.xlu0 %1845  ;;  %v4420_v17 = vld [vmem:[#allocation2 + $0x58] sm:$0xff]   ;;  %v2919_v57 = vsel %vm4524_vm2, %v2914_v45, %v2918_v46  ;;  %v4255_v11 = vld [vmem:[%s4513_s23 + $0xd0] sm:$0xf] }
 0x1f6   : > { %1932 = vst.msk [vmem:[#allocation2 + $0x28] sm:$0xf] %vm1921_vm11, %v1846_v15  ;;  %2421 = vrot.lane.b32.xlu1 %v4160_v1, %s4458_s29  ;;  %4358 = vmatmul.mubr.msk.bf16.gmra.mxu1 %vm3525_vm0, %v4420_v17  ;;  %v2909_v63 = vsel %vm4524_vm2, %v2904_v51, %v2908_v24  ;;  %v4253_v1 = vld [vmem:[%s4513_s23 + $0xc8] sm:$0x1]  ;;  %v3199_v15 = vrot.slane %v4232_v10, 5  ;;  %v3252_v17 = vrot.slane %v4255_v11, 5 }
 0x1f7   : > { %2419 = vrot.lane.b32.xlu0 %v4159_v2, %s4458_s29  ;;  %v4231_v2 = vld [vmem:[%s4513_s23 + $0x70] sm:$0xf]  ;;  %v3248_v4 = vrot.slane %v4253_v1, 5  ;;  %vm3837_vm2 = vcmask 130048  }
 0x1f8   : > { %v1880_v26 = vpop.permute.xlu1 %1879  ;;  %v3196_v6 = vrot.slane %v4231_v2, 5  ;;  %v3254_v25 = vrot.slane %v3252_v17, 4 }
 0x1f9   : > { %1949 = vst.msk [vmem:[#allocation2 + $0x6c] sm:$0xf] %vm1921_vm11, %v1880_v26  ;;  %v1878_v19 = vpop.permute.xlu0 %1877  ;;  %v3249_v13 = vsel %vm4668_vm6, %v3247_v55, %v3248_v4  ;;  %v3255_v26 = vrot.slane %v4256_v22, 5 }
 0x1fa   : > { %1948 = vst.msk [vmem:[#allocation2 + $0x68] sm:$0xf] %vm1921_vm11, %v1878_v19  ;;  %2946 = vrot.lane.b32.xlu1 %v2703_v18, %s4459_s30  ;;  %v3198_v14 = vrot.slane %v3196_v6, 4  ;;  %v3197_v29 = vsel %vm4668_vm6, %v4264_v21, %v3196_v6 }
 0x1fb   : > { %2944 = vrot.lane.b32.xlu0 %v2693_v20, %s4459_s30  ;;  %v3246_v20 = vsel %vm4668_vm6, %v4271_v61, %v3245_v59  ;;  %v3256_v32 = vsel %vm4668_vm6, %v3254_v25, %v3255_v26 }
 0x1fc   : > { %v2181_v37 = vpop.permute.xlu1 %2180  ;;  %v3200_v24 = vsel %vm4668_vm6, %v3198_v14, %v3199_v15 }
 0x1fd   : > { %2268 = vst.msk [vmem:[#allocation2 + $0x24] sm:$0xf] %vm2258_vm12, %v2181_v37  ;;  %v2179_v43 = vpop.permute.xlu0 %2178 }
 0x1fe   : > { %2267 = vst.msk [vmem:[#allocation2 + $0x20] sm:$0xf] %vm2258_vm12, %v2179_v43  ;;  %2978 = vrot.lane.b32.xlu1 %v2895_v16, %s4459_s30  ;;  %v3253_v16 = vsel %vm4668_vm6, %v4272_v30, %v3252_v17  ;;  %v5972_v17 = vld [vmem:[%s6142_s2] ss:$0 sm:$0xff] }
 0x1ff   : > { %2976 = vrot.lane.b32.xlu0 %v2885_v38, %s4459_s30 }
 0x200   : > { %v2213_v48 = vpop.permute.xlu1 %2212 }
 0x201   : > { %2284 = vst.msk [vmem:[#allocation2 + $0x64] sm:$0xf] %vm2258_vm12, %v2213_v48  ;;  %v2211_v54 = vpop.permute.xlu0 %2210 }
 0x202   : > { %2283 = vst.msk [vmem:[#allocation2 + $0x60] sm:$0xf] %vm2258_vm12, %v2211_v54  ;;  %2950 = vrot.lane.b32.xlu1 %v2727_v44, %s4459_s30 }
 0x203   : > { %2948 = vrot.lane.b32.xlu0 %v2717_v49, %s4459_s30 }
 0x204   : > { %v2185_v60 = vpop.permute.xlu1 %2184 }
 0x205   : > { %2270 = vst.msk [vmem:[#allocation2 + $0x2c] sm:$0xf] %vm2258_vm12, %v2185_v60  ;;  %v2183_v3 = vpop.permute.xlu0 %2182 }
 0x206   : > { %2269 = vst.msk [vmem:[#allocation2 + $0x28] sm:$0xf] %vm2258_vm12, %v2183_v3  ;;  %2982 = vrot.lane.b32.xlu1 %v2919_v57, %s4459_s30 }
 0x207   : > { %2980 = vrot.lane.b32.xlu0 %v2909_v63, %s4459_s30 }
 0x208   : > { %v2217_v8 = vpop.permute.xlu1 %2216 }
 0x209   : > { %2286 = vst.msk [vmem:[#allocation2 + $0x6c] sm:$0xf] %vm2258_vm12, %v2217_v8  ;;  %v2215_v5 = vpop.permute.xlu0 %2214 }
 0x20a   : > { %2285 = vst.msk [vmem:[#allocation2 + $0x68] sm:$0xf] %vm2258_vm12, %v2215_v5  ;;  %3283 = vrot.lane.b32.xlu1 %v3193_v27, %s4460_s11 }
 0x20b   : > { %3281 = vrot.lane.b32.xlu0 %v3190_v9, %s4460_s11 }
 0x20c   : > { %v2378_v18 = vpop.permute.xlu1 %2377 }
 0x20d   : > { %2465 = vst.msk [vmem:[#allocation2 + $0x24] sm:$0xf] %vm2455_vm13, %v2378_v18  ;;  %v2376_v23 = vpop.permute.xlu0 %2375 }
 0x20e   : > { %2464 = vst.msk [vmem:[#allocation2 + $0x20] sm:$0xf] %vm2455_vm13, %v2376_v23  ;;  %3315 = vrot.lane.b32.xlu1 %v3249_v13, %s4460_s11 }
 0x20f   : > { %3313 = vrot.lane.b32.xlu0 %v3246_v20, %s4460_s11  ;;  %v5976_v20 = vstv %s3739_s12 }
 0x210   : > { %v2410_v28 = vpop.permute.xlu1 %2409 }
 0x211   : > { %2481 = vst.msk [vmem:[#allocation2 + $0x64] sm:$0xf] %vm2455_vm13, %v2410_v28  ;;  %v2408_v31 = vpop.permute.xlu0 %2407 }
 0x212   : > { %2480 = vst.msk [vmem:[#allocation2 + $0x60] sm:$0xf] %vm2455_vm13, %v2408_v31  ;;  %3287 = vrot.lane.b32.xlu1 %v3200_v24, %s4460_s11 }
 0x213   : > { %3285 = vrot.lane.b32.xlu0 %v3197_v29, %s4460_s11 }
 0x214   : > { %v2382_v19 = vpop.permute.xlu1 %2381 }
 0x215   : > { %2467 = vst.msk [vmem:[#allocation2 + $0x2c] sm:$0xf] %vm2455_vm13, %v2382_v19  ;;  %v2380_v33 = vpop.permute.xlu0 %2379 }
 0x216   : > { %2466 = vst.msk [vmem:[#allocation2 + $0x28] sm:$0xf] %vm2455_vm13, %v2380_v33  ;;  %3319 = vrot.lane.b32.xlu1 %v3256_v32, %s4460_s11 }
 0x217   : > { %3317 = vrot.lane.b32.xlu0 %v3253_v16, %s4460_s11 }
 0x218   : > { %v2414_v34 = vpop.permute.xlu1 %2413 }
 0x219   : > { %2483 = vst.msk [vmem:[#allocation2 + $0x6c] sm:$0xf] %vm2455_vm13, %v2414_v34  ;;  %v2412_v35 = vpop.permute.xlu0 %2411 }
 0x21a   : > { %2482 = vst.msk [vmem:[#allocation2 + $0x68] sm:$0xf] %vm2455_vm13, %v2412_v35 }
 0x21c   : > { %v2939_v36 = vpop.permute.xlu1 %2938 }
 0x21d   : > { %3026 = vst.msk [vmem:[#allocation2 + $0x24] sm:$0xf] %vm3016_vm14, %v2939_v36  ;;  %v2937_v62 = vpop.permute.xlu0 %2936 }
 0x21e   : > { %3025 = vst.msk [vmem:[#allocation2 + $0x20] sm:$0xf] %vm3016_vm14, %v2937_v62 }
 0x220   : > { %v2971_v37 = vpop.permute.xlu1 %2970 }
 0x221   : > { %3042 = vst.msk [vmem:[#allocation2 + $0x64] sm:$0xf] %vm3016_vm14, %v2971_v37  ;;  %v2969_v38 = vpop.permute.xlu0 %2968 }
 0x222   : > { %3041 = vst.msk [vmem:[#allocation2 + $0x60] sm:$0xf] %vm3016_vm14, %v2969_v38 }
 0x224   : > { %v2943_v39 = vpop.permute.xlu1 %2942 }
 0x225   : > { %3028 = vst.msk [vmem:[#allocation2 + $0x2c] sm:$0xf] %vm3016_vm14, %v2943_v39  ;;  %v2941_v41 = vpop.permute.xlu0 %2940 }
 0x226   : > { %3027 = vst.msk [vmem:[#allocation2 + $0x28] sm:$0xf] %vm3016_vm14, %v2941_v41 }
 0x228   : > { %v2975_v42 = vpop.permute.xlu1 %2974 }
 0x229   : > { %3044 = vst.msk [vmem:[#allocation2 + $0x6c] sm:$0xf] %vm3016_vm14, %v2975_v42  ;;  %v2973_v43 = vpop.permute.xlu0 %2972 }
 0x22a   : > { %3043 = vst.msk [vmem:[#allocation2 + $0x68] sm:$0xf] %vm3016_vm14, %v2973_v43 }
 0x22c   : > { %v3276_v44 = vpop.permute.xlu1 %3275 }
 0x22d   : > { %3363 = vst.msk [vmem:[#allocation2 + $0x24] sm:$0xf] %vm3353_vm15, %v3276_v44  ;;  %v3274_v45 = vpop.permute.xlu0 %3273 }
 0x22e   : > { %3362 = vst.msk [vmem:[#allocation2 + $0x20] sm:$0xf] %vm3353_vm15, %v3274_v45 }
 0x230   : > { %v3308_v46 = vpop.permute.xlu1 %3307 }
 0x231   : > { %3379 = vst.msk [vmem:[#allocation2 + $0x64] sm:$0xf] %vm3353_vm15, %v3308_v46  ;;  %v3306_v47 = vpop.permute.xlu0 %3305 }
 0x232   : > { %3378 = vst.msk [vmem:[#allocation2 + $0x60] sm:$0xf] %vm3353_vm15, %v3306_v47 }
 0x234   : > { %v3280_v48 = vpop.permute.xlu1 %3279 }
 0x235   : > { %3365 = vst.msk [vmem:[#allocation2 + $0x2c] sm:$0xf] %vm3353_vm15, %v3280_v48  ;;  %v3278_v49 = vpop.permute.xlu0 %3277  ;;  %v4421_v51 = vld [vmem:[#allocation2 + $0x20] sm:$0xff]  }
 0x236   : > { %3364 = vst.msk [vmem:[#allocation2 + $0x28] sm:$0xf] %vm3353_vm15, %v3278_v49  ;;  %4345 = vmatprep.mubr.msk.bf16.mxu0 %vm3525_vm0, %v4421_v51 }
 0x238   : > { %v3312_v52 = vpop.permute.xlu1 %3311 }
 0x239   : > { %3381 = vst.msk [vmem:[#allocation2 + $0x6c] sm:$0xf] %vm3353_vm15, %v3312_v52  ;;  %v3310_v53 = vpop.permute.xlu0 %3309  ;;  %v4422_v54 = vld [vmem:[#allocation2 + $0x60] sm:$0xff]  }
 0x23a   : > { %3380 = vst.msk [vmem:[#allocation2 + $0x68] sm:$0xf] %vm3353_vm15, %v3310_v53  ;;  %4361 = vmatprep.mubr.msk.bf16.mxu1 %vm3525_vm0, %v4422_v54 }
 0x23c   : > { %v1852_v40 = vpop.permute.xlu1 %1851 }
 0x23d   : > { %1935 = vst.msk [vmem:[#allocation2 + $0x34] sm:$0xf] %vm1921_vm11, %v1852_v40  ;;  %v1850_v57 = vpop.permute.xlu0 %1849  ;;  %v4423_v56 = vld [vmem:[#allocation2 + $0x28] sm:$0xff]  }
 0x23e   : > { %1934 = vst.msk [vmem:[#allocation2 + $0x30] sm:$0xf] %vm1921_vm11, %v1850_v57  ;;  %4346 = vmatmul.mubr.msk.bf16.gmra.mxu0 %vm3525_vm0, %v4423_v56 }
 0x240   : > { %v1884_v58 = vpop.permute.xlu1 %1883 }
 0x241   : > { %1951 = vst.msk [vmem:[#allocation2 + $0x74] sm:$0xf] %vm1921_vm11, %v1884_v58  ;;  %v1882_v59 = vpop.permute.xlu0 %1881  ;;  %v4424_v60 = vld [vmem:[#allocation2 + $0x68] sm:$0xff]  }
 0x242   : > { %1950 = vst.msk [vmem:[#allocation2 + $0x70] sm:$0xf] %vm1921_vm11, %v1882_v59  ;;  %4362 = vmatmul.mubr.msk.bf16.gmra.mxu1 %vm3525_vm0, %v4424_v60 }
 0x244   : > { %v1856_v63 = vpop.permute.xlu1 %1855 }
 0x245   : > { %1937 = vst.msk [vmem:[#allocation2 + $0x3c] sm:$0xf] %vm1921_vm11, %v1856_v63  ;;  %v1854_v0 = vpop.permute.xlu0 %1853 }
 0x246   : > { %1936 = vst.msk [vmem:[#allocation2 + $0x38] sm:$0xf] %vm1921_vm11, %v1854_v0 }
 0x248   : > { %v1888_v1 = vpop.permute.xlu1 %1887 }
 0x249   : > { %1953 = vst.msk [vmem:[#allocation2 + $0x7c] sm:$0xf] %vm1921_vm11, %v1888_v1  ;;  %v1886_v2 = vpop.permute.xlu0 %1885 }
 0x24a   : > { %1952 = vst.msk [vmem:[#allocation2 + $0x78] sm:$0xf] %vm1921_vm11, %v1886_v2 }
 0x24c   : > { %v2189_v3 = vpop.permute.xlu1 %2188 }
 0x24d   : > { %2272 = vst.msk [vmem:[#allocation2 + $0x34] sm:$0xf] %vm2258_vm12, %v2189_v3  ;;  %v2187_v50 = vpop.permute.xlu0 %2186 }
 0x24e   : > { %2271 = vst.msk [vmem:[#allocation2 + $0x30] sm:$0xf] %vm2258_vm12, %v2187_v50 }
 0x250   : > { %v2221_v27 = vpop.permute.xlu1 %2220 }
 0x251   : > { %2288 = vst.msk [vmem:[#allocation2 + $0x74] sm:$0xf] %vm2258_vm12, %v2221_v27  ;;  %v2219_v55 = vpop.permute.xlu0 %2218 }
 0x252   : > { %2287 = vst.msk [vmem:[#allocation2 + $0x70] sm:$0xf] %vm2258_vm12, %v2219_v55 }
 0x254   : > { %v2193_v4 = vpop.permute.xlu1 %2192 }
 0x255   : > { %2274 = vst.msk [vmem:[#allocation2 + $0x3c] sm:$0xf] %vm2258_vm12, %v2193_v4  ;;  %v2191_v6 = vpop.permute.xlu0 %2190 }
 0x256   : > { %2273 = vst.msk [vmem:[#allocation2 + $0x38] sm:$0xf] %vm2258_vm12, %v2191_v6 }
 0x258   : > { %v2225_v8 = vpop.permute.xlu1 %2224 }
 0x259   : > { %2290 = vst.msk [vmem:[#allocation2 + $0x7c] sm:$0xf] %vm2258_vm12, %v2225_v8  ;;  %v2223_v9 = vpop.permute.xlu0 %2222 }
 0x25a   : > { %2289 = vst.msk [vmem:[#allocation2 + $0x78] sm:$0xf] %vm2258_vm12, %v2223_v9 }
 0x25c   : > { %v2386_v61 = vpop.permute.xlu1 %2385 }
 0x25d   : > { %2469 = vst.msk [vmem:[#allocation2 + $0x34] sm:$0xf] %vm2455_vm13, %v2386_v61  ;;  %v2384_v10 = vpop.permute.xlu0 %2383 }
 0x25e   : > { %2468 = vst.msk [vmem:[#allocation2 + $0x30] sm:$0xf] %vm2455_vm13, %v2384_v10 }
 0x260   : > { %v2418_v11 = vpop.permute.xlu1 %2417 }
 0x261   : > { %2485 = vst.msk [vmem:[#allocation2 + $0x74] sm:$0xf] %vm2455_vm13, %v2418_v11  ;;  %v2416_v5 = vpop.permute.xlu0 %2415 }
 0x262   : > { %2484 = vst.msk [vmem:[#allocation2 + $0x70] sm:$0xf] %vm2455_vm13, %v2416_v5 }
 0x264   : > { %v2390_v12 = vpop.permute.xlu1 %2389 }
 0x265   : > { %2471 = vst.msk [vmem:[#allocation2 + $0x3c] sm:$0xf] %vm2455_vm13, %v2390_v12  ;;  %v2388_v13 = vpop.permute.xlu0 %2387 }
 0x266   : > { %2470 = vst.msk [vmem:[#allocation2 + $0x38] sm:$0xf] %vm2455_vm13, %v2388_v13 }
 0x268   : > { %v2422_v14 = vpop.permute.xlu1 %2421 }
 0x269   : > { %2487 = vst.msk [vmem:[#allocation2 + $0x7c] sm:$0xf] %vm2455_vm13, %v2422_v14  ;;  %v2420_v15 = vpop.permute.xlu0 %2419 }
 0x26a   : > { %2486 = vst.msk [vmem:[#allocation2 + $0x78] sm:$0xf] %vm2455_vm13, %v2420_v15  ;;  %v4339_v18 = vpop.f32.mrf.mxu0 }
 0x26b   : > { %v3621_v21 = vadd.f32 %v4339_v18, %v5972_v17 }
 0x26c   : > { %v2947_v22 = vpop.permute.xlu1 %2946  ;;  %v3612_v7 = vpop.f32.mrf.mxu0 }
 0x26d   : > { %3030 = vst.msk [vmem:[#allocation2 + $0x34] sm:$0xf] %vm3016_vm14, %v2947_v22  ;;  %v2945_v23 = vpop.permute.xlu0 %2944  ;;  %vm3742_vm1 = vcmp.ge.f32.partialorder %v3621_v21, 0.0  ;;  %v3775_v24 = vmul.f32 %v5976_v20, %v3621_v21  ;;  %v3613_v25 = vadd.f32 %v5972_v17, %v3612_v7 }
 0x26e   : > { %3029 = vst.msk [vmem:[#allocation2 + $0x30] sm:$0xf] %vm3016_vm14, %v2945_v23  ;;  %v4340_v26 = vpop.f32.mrf.mxu0  ;;  %v4355_v28 = vpop.f32.mrf.mxu1 }
 0x26f   : > { %v3807_v29 = vsel %vm3742_vm1, %v3621_v21, %v3775_v24  ;;  %vm3740_vm3 = vcmp.ge.f32.partialorder %v3613_v25, 0.0  ;;  %v3773_v30 = vmul.f32 %v5976_v20, %v3613_v25  ;;  %v3624_v31 = vadd.f32 %v4340_v26, %v5972_v17 }
 0x270   : > { %v2979_v32 = vpop.permute.xlu1 %2978  ;;  %3840 = vst.msk [vmem:[%s5983_s21 + $0x10] sm:$0xff] %vm3837_vm2, %v3807_v29  ;;  %v3685_v19 = vadd.f32 %v4355_v28, %v5972_v17  ;;  %v3615_v33 = vpop.f32.mrf.mxu0 }
 0x271   : > { %3046 = vst.msk [vmem:[#allocation2 + $0x74] sm:$0xf] %vm3016_vm14, %v2979_v32  ;;  %v2977_v16 = vpop.permute.xlu0 %2976  ;;  %v3805_v34 = vsel %vm3740_vm3, %v3613_v25, %v3773_v30  ;;  %vm3743_vm4 = vcmp.ge.f32.partialorder %v3624_v31, 0.0  ;;  %v3776_v35 = vmul.f32 %v5976_v20, %v3624_v31  ;;  %v3616_v36 = vadd.f32 %v5972_v17, %v3615_v33  ;;  %v3676_v62 = vpop.f32.mrf.mxu1 }
 0x272   : > { %3045 = vst.msk [vmem:[#allocation2 + $0x70] sm:$0xf] %vm3016_vm14, %v2977_v16  ;;  %vm3758_vm5 = vcmp.ge.f32.partialorder %v3685_v19, 0.0  ;;  %v3791_v37 = vmul.f32 %v5976_v20, %v3685_v19  ;;  %v3677_v38 = vadd.f32 %v5972_v17, %v3676_v62 }
 0x273   : > { %3838 = vst.msk [vmem:[%s5983_s21] sm:$0xff] %vm3837_vm2, %v3805_v34  ;;  %v3808_v39 = vsel %vm3743_vm4, %v3624_v31, %v3776_v35  ;;  %vm3741_vm6 = vcmp.ge.f32.partialorder %v3616_v36, 0.0  ;;  %v3774_v41 = vmul.f32 %v5976_v20, %v3616_v36  ;;  %v4356_v42 = vpop.f32.mrf.mxu1 }
 0x274   : > { %v2951_v43 = vpop.permute.xlu1 %2950  ;;  %3841 = vst.msk [vmem:[%s5983_s21 + $0x18] sm:$0xff] %vm3837_vm2, %v3808_v39  ;;  %v3823_v44 = vsel %vm3758_vm5, %v3685_v19, %v3791_v37  ;;  %vm3756_vm7 = vcmp.ge.f32.partialorder %v3677_v38, 0.0  ;;  %v3789_v45 = vmul.f32 %v5976_v20, %v3677_v38  ;;  %v3688_v46 = vadd.f32 %v4356_v42, %v5972_v17 }
 0x275   : > { %3032 = vst.msk [vmem:[#allocation2 + $0x3c] sm:$0xf] %vm3016_vm14, %v2951_v43  ;;  %v2949_v47 = vpop.permute.xlu0 %2948  ;;  %v3806_v48 = vsel %vm3741_vm6, %v3616_v36, %v3774_v41  ;;  %v3679_v49 = vpop.f32.mrf.mxu1 }
 0x276   : > { %3856 = vst.msk [vmem:[%s5983_s21 + $0x90] sm:$0xff] %vm3837_vm2, %v3823_v44  ;;  %3839 = vst.msk [vmem:[%s5983_s21 + $0x8] sm:$0xff] %vm3837_vm2, %v3806_v48  ;;  %v3821_v51 = vsel %vm3756_vm7, %v3677_v38, %v3789_v45  ;;  %vm3759_vm8 = vcmp.ge.f32.partialorder %v3688_v46, 0.0  ;;  %v3792_v52 = vmul.f32 %v5976_v20, %v3688_v46  ;;  %v3680_v53 = vadd.f32 %v5972_v17, %v3679_v49 }
 0x277   : > { %3031 = vst.msk [vmem:[#allocation2 + $0x38] sm:$0xf] %vm3016_vm14, %v2949_v47 }
 0x278   : > { %3854 = vst.msk [vmem:[%s5983_s21 + $0x80] sm:$0xff] %vm3837_vm2, %v3821_v51  ;;  %v2983_v54 = vpop.permute.xlu1 %2982  ;;  %v3824_v40 = vsel %vm3759_vm8, %v3688_v46, %v3792_v52  ;;  %vm3757_vm9 = vcmp.ge.f32.partialorder %v3680_v53, 0.0  ;;  %v3790_v57 = vmul.f32 %v5976_v20, %v3680_v53 }
 0x279   : > { %3048 = vst.msk [vmem:[#allocation2 + $0x7c] sm:$0xf] %vm3016_vm14, %v2983_v54  ;;  %v2981_v56 = vpop.permute.xlu0 %2980 }
 0x27a   : > { %3857 = vst.msk [vmem:[%s5983_s21 + $0x98] sm:$0xff] %vm3837_vm2, %v3824_v40  ;;  %v3822_v58 = vsel %vm3757_vm9, %v3680_v53, %v3790_v57 }
 0x27b   : > { %3047 = vst.msk [vmem:[#allocation2 + $0x78] sm:$0xf] %vm3016_vm14, %v2981_v56 }
 0x27c   : > { %3855 = vst.msk [vmem:[%s5983_s21 + $0x88] sm:$0xff] %vm3837_vm2, %v3822_v58  ;;  %v3284_v59 = vpop.permute.xlu1 %3283 }
 0x27d   : > { %3367 = vst.msk [vmem:[#allocation2 + $0x34] sm:$0xf] %vm3353_vm15, %v3284_v59  ;;  %v3282_v60 = vpop.permute.xlu0 %3281 }
 0x27e   : > { %3366 = vst.msk [vmem:[#allocation2 + $0x30] sm:$0xf] %vm3353_vm15, %v3282_v60 }
 0x280   : > { %v3316_v63 = vpop.permute.xlu1 %3315 }
 0x281   : > { %3383 = vst.msk [vmem:[#allocation2 + $0x74] sm:$0xf] %vm3353_vm15, %v3316_v63  ;;  %v3314_v0 = vpop.permute.xlu0 %3313 }
 0x282   : > { %3382 = vst.msk [vmem:[#allocation2 + $0x70] sm:$0xf] %vm3353_vm15, %v3314_v0 }
 0x284   : > { %v3288_v1 = vpop.permute.xlu1 %3287 }
 0x285   : > { %3369 = vst.msk [vmem:[#allocation2 + $0x3c] sm:$0xf] %vm3353_vm15, %v3288_v1  ;;  %v3286_v2 = vpop.permute.xlu0 %3285  ;;  %v4425_v3 = vld [vmem:[#allocation2 + $0x30] sm:$0xff]  }
 0x286   : > { %3368 = vst.msk [vmem:[#allocation2 + $0x38] sm:$0xf] %vm3353_vm15, %v3286_v2  ;;  %4349 = vmatprep.mubr.msk.bf16.mxu0 %vm3525_vm0, %v4425_v3 }
 0x288   : > { %v3320_v50 = vpop.permute.xlu1 %3319 }
 0x289   : > { %3385 = vst.msk [vmem:[#allocation2 + $0x7c] sm:$0xf] %vm3353_vm15, %v3320_v50  ;;  %v3318_v27 = vpop.permute.xlu0 %3317  ;;  %v4426_v55 = vld [vmem:[#allocation2 + $0x70] sm:$0xff]  }
 0x28a   : > { %3384 = vst.msk [vmem:[#allocation2 + $0x78] sm:$0xf] %vm3353_vm15, %v3318_v27  ;;  %4365 = vmatprep.mubr.msk.bf16.mxu1 %vm3525_vm0, %v4426_v55 }
 0x28d   : > { %v4427_v4 = vld [vmem:[#allocation2 + $0x38] sm:$0xff]  }
 0x28e   : > { %4350 = vmatmul.mubr.msk.bf16.gmra.mxu0 %vm3525_vm0, %v4427_v4 }
 0x291   : > { %v4428_v6 = vld [vmem:[#allocation2 + $0x78] sm:$0xff]  }
 0x292   : > { %4366 = vmatmul.mubr.msk.bf16.gmra.mxu1 %vm3525_vm0, %v4428_v6 }
 0x2b2   : > { %v4343_v8 = vpop.f32.mrf.mxu0 }
 0x2b3   : > { %v3637_v9 = vadd.f32 %v4343_v8, %v5972_v17 }
 0x2b4   : > { %v3628_v61 = vpop.f32.mrf.mxu0 }
 0x2b5   : > { %vm3746_vm10 = vcmp.ge.f32.partialorder %v3637_v9, 0.0  ;;  %v3779_v10 = vmul.f32 %v5976_v20, %v3637_v9  ;;  %v3629_v11 = vadd.f32 %v5972_v17, %v3628_v61 }
 0x2b6   : > { %v4344_v5 = vpop.f32.mrf.mxu0  ;;  %v4359_v12 = vpop.f32.mrf.mxu1 }
 0x2b7   : > { %v3811_v13 = vsel %vm3746_vm10, %v3637_v9, %v3779_v10  ;;  %vm3744_vm11 = vcmp.ge.f32.partialorder %v3629_v11, 0.0  ;;  %v3777_v14 = vmul.f32 %v5976_v20, %v3629_v11  ;;  %v3640_v15 = vadd.f32 %v4344_v5, %v5972_v17 }
 0x2b8   : > { %3844 = vst.msk [vmem:[%s5983_s21 + $0x30] sm:$0xff] %vm3837_vm2, %v3811_v13  ;;  %v3701_v18 = vadd.f32 %v4359_v12, %v5972_v17  ;;  %v3631_v21 = vpop.f32.mrf.mxu0  ;;  %v3692_v22 = vpop.f32.mrf.mxu1 }
 0x2b9   : > { %v3809_v23 = vsel %vm3744_vm11, %v3629_v11, %v3777_v14  ;;  %vm3747_vm12 = vcmp.ge.f32.partialorder %v3640_v15, 0.0  ;;  %v3780_v7 = vmul.f32 %v5976_v20, %v3640_v15  ;;  %v3632_v24 = vadd.f32 %v5972_v17, %v3631_v21 }
 0x2ba   : > { %3842 = vst.msk [vmem:[%s5983_s21 + $0x20] sm:$0xff] %vm3837_vm2, %v3809_v23  ;;  %vm3762_vm13 = vcmp.ge.f32.partialorder %v3701_v18, 0.0  ;;  %v3795_v25 = vmul.f32 %v5976_v20, %v3701_v18  ;;  %v3693_v26 = vadd.f32 %v5972_v17, %v3692_v22  ;;  %v4360_v28 = vpop.f32.mrf.mxu1 }
 0x2bb   : > { %v3812_v29 = vsel %vm3747_vm12, %v3640_v15, %v3780_v7  ;;  %vm3745_vm14 = vcmp.ge.f32.partialorder %v3632_v24, 0.0  ;;  %v3778_v30 = vmul.f32 %v5976_v20, %v3632_v24  ;;  %v3704_v31 = vadd.f32 %v4360_v28, %v5972_v17 }
 0x2bc   : > { %3845 = vst.msk [vmem:[%s5983_s21 + $0x38] sm:$0xff] %vm3837_vm2, %v3812_v29  ;;  %v3827_v32 = vsel %vm3762_vm13, %v3701_v18, %v3795_v25  ;;  %vm3760_vm15 = vcmp.ge.f32.partialorder %v3693_v26, 0.0  ;;  %v3793_v19 = vmul.f32 %v5976_v20, %v3693_v26  ;;  %v3695_v16 = vpop.f32.mrf.mxu1 }
 0x2bd   : > { %3860 = vst.msk [vmem:[%s5983_s21 + $0xb0] sm:$0xff] %vm3837_vm2, %v3827_v32  ;;  %v3810_v33 = vsel %vm3745_vm14, %v3632_v24, %v3778_v30  ;;  %vm3763_vm0 = vcmp.ge.f32.partialorder %v3704_v31, 0.0  ;;  %v3796_v34 = vmul.f32 %v5976_v20, %v3704_v31  ;;  %v3696_v35 = vadd.f32 %v5972_v17, %v3695_v16 }
 0x2be   : > { %3843 = vst.msk [vmem:[%s5983_s21 + $0x28] sm:$0xff] %vm3837_vm2, %v3810_v33  ;;  %v3825_v36 = vsel %vm3760_vm15, %v3693_v26, %v3793_v19 }
 0x2bf   : > { %3858 = vst.msk [vmem:[%s5983_s21 + $0xa0] sm:$0xff] %vm3837_vm2, %v3825_v36  ;;  %v3828_v62 = vsel %vm3763_vm0, %v3704_v31, %v3796_v34  ;;  %vm3761_vm1 = vcmp.ge.f32.partialorder %v3696_v35, 0.0  ;;  %v3794_v37 = vmul.f32 %v5976_v20, %v3696_v35 }
 0x2c0   : > { %3861 = vst.msk [vmem:[%s5983_s21 + $0xb8] sm:$0xff] %vm3837_vm2, %v3828_v62 }
 0x2c1   : > { %v3826_v38 = vsel %vm3761_vm1, %v3696_v35, %v3794_v37 }
 0x2c2   : > { %3859 = vst.msk [vmem:[%s5983_s21 + $0xa8] sm:$0xff] %vm3837_vm2, %v3826_v38 }
 0x2fe   : > { %v4347_v39 = vpop.f32.mrf.mxu0 }
 0x2ff   : > { %v3653_v41 = vadd.f32 %v4347_v39, %v5972_v17 }
 0x300   : > { %v3644_v42 = vpop.f32.mrf.mxu0 }
 0x301   : > { %vm3750_vm3 = vcmp.ge.f32.partialorder %v3653_v41, 0.0  ;;  %v3783_v43 = vmul.f32 %v5976_v20, %v3653_v41  ;;  %v3645_v44 = vadd.f32 %v5972_v17, %v3644_v42 }
 0x302   : > { %v4348_v45 = vpop.f32.mrf.mxu0  ;;  %v4363_v46 = vpop.f32.mrf.mxu1 }
 0x303   : > { %v3815_v47 = vsel %vm3750_vm3, %v3653_v41, %v3783_v43  ;;  %vm3748_vm4 = vcmp.ge.f32.partialorder %v3645_v44, 0.0  ;;  %v3781_v48 = vmul.f32 %v5976_v20, %v3645_v44  ;;  %v3656_v49 = vadd.f32 %v4348_v45, %v5972_v17 }
 0x304   : > { %3848 = vst.msk [vmem:[%s5983_s21 + $0x50] sm:$0xff] %vm3837_vm2, %v3815_v47  ;;  %v3717_v51 = vadd.f32 %v4363_v46, %v5972_v17  ;;  %v3647_v52 = vpop.f32.mrf.mxu0  ;;  %v3708_v53 = vpop.f32.mrf.mxu1 }
 0x305   : > { %v3813_v54 = vsel %vm3748_vm4, %v3645_v44, %v3781_v48  ;;  %vm3751_vm5 = vcmp.ge.f32.partialorder %v3656_v49, 0.0  ;;  %v3784_v40 = vmul.f32 %v5976_v20, %v3656_v49  ;;  %v3648_v57 = vadd.f32 %v5972_v17, %v3647_v52 }
 0x306   : > { %3846 = vst.msk [vmem:[%s5983_s21 + $0x40] sm:$0xff] %vm3837_vm2, %v3813_v54  ;;  %vm3766_vm6 = vcmp.ge.f32.partialorder %v3717_v51, 0.0  ;;  %v3799_v56 = vmul.f32 %v5976_v20, %v3717_v51  ;;  %v3709_v58 = vadd.f32 %v5972_v17, %v3708_v53  ;;  %v4364_v59 = vpop.f32.mrf.mxu1 }
 0x307   : > { %v3816_v60 = vsel %vm3751_vm5, %v3656_v49, %v3784_v40  ;;  %vm3749_vm7 = vcmp.ge.f32.partialorder %v3648_v57, 0.0  ;;  %v3782_v63 = vmul.f32 %v5976_v20, %v3648_v57  ;;  %v3720_v0 = vadd.f32 %v4364_v59, %v5972_v17 }
 0x308   : > { %3849 = vst.msk [vmem:[%s5983_s21 + $0x58] sm:$0xff] %vm3837_vm2, %v3816_v60  ;;  %v3831_v1 = vsel %vm3766_vm6, %v3717_v51, %v3799_v56  ;;  %vm3764_vm8 = vcmp.ge.f32.partialorder %v3709_v58, 0.0  ;;  %v3797_v2 = vmul.f32 %v5976_v20, %v3709_v58  ;;  %v3711_v3 = vpop.f32.mrf.mxu1 }
 0x309   : > { %3864 = vst.msk [vmem:[%s5983_s21 + $0xd0] sm:$0xff] %vm3837_vm2, %v3831_v1  ;;  %v3814_v50 = vsel %vm3749_vm7, %v3648_v57, %v3782_v63  ;;  %vm3767_vm9 = vcmp.ge.f32.partialorder %v3720_v0, 0.0  ;;  %v3800_v27 = vmul.f32 %v5976_v20, %v3720_v0  ;;  %v3712_v55 = vadd.f32 %v5972_v17, %v3711_v3 }
 0x30a   : > { %3847 = vst.msk [vmem:[%s5983_s21 + $0x48] sm:$0xff] %vm3837_vm2, %v3814_v50  ;;  %v3829_v4 = vsel %vm3764_vm8, %v3709_v58, %v3797_v2 }
 0x30b   : > { %3862 = vst.msk [vmem:[%s5983_s21 + $0xc0] sm:$0xff] %vm3837_vm2, %v3829_v4  ;;  %v3832_v6 = vsel %vm3767_vm9, %v3720_v0, %v3800_v27  ;;  %vm3765_vm10 = vcmp.ge.f32.partialorder %v3712_v55, 0.0  ;;  %v3798_v8 = vmul.f32 %v5976_v20, %v3712_v55 }
 0x30c   : > { %3865 = vst.msk [vmem:[%s5983_s21 + $0xd8] sm:$0xff] %vm3837_vm2, %v3832_v6 }
 0x30d   : > { %v3830_v9 = vsel %vm3765_vm10, %v3712_v55, %v3798_v8 }
 0x30e   : > { %3863 = vst.msk [vmem:[%s5983_s21 + $0xc8] sm:$0xff] %vm3837_vm2, %v3830_v9 }
 0x34e   : > { %v4351_v61 = vpop.f32.mrf.mxu0 }
 0x34f   : > { %v3669_v10 = vadd.f32 %v4351_v61, %v5972_v17 }
 0x350   : > { %v3660_v11 = vpop.f32.mrf.mxu0 }
 0x351   : > { %vm3754_vm11 = vcmp.ge.f32.partialorder %v3669_v10, 0.0  ;;  %v3787_v5 = vmul.f32 %v5976_v20, %v3669_v10  ;;  %v3661_v12 = vadd.f32 %v5972_v17, %v3660_v11 }
 0x352   : > { %v4352_v13 = vpop.f32.mrf.mxu0  ;;  %v4367_v14 = vpop.f32.mrf.mxu1 }
 0x353   : > { %v3819_v15 = vsel %vm3754_vm11, %v3669_v10, %v3787_v5  ;;  %vm3752_vm12 = vcmp.ge.f32.partialorder %v3661_v12, 0.0  ;;  %v3785_v18 = vmul.f32 %v5976_v20, %v3661_v12  ;;  %v3672_v21 = vadd.f32 %v4352_v13, %v5972_v17 }
 0x354   : > { %3852 = vst.msk [vmem:[%s5983_s21 + $0x70] sm:$0xff] %vm3837_vm2, %v3819_v15  ;;  %v3733_v22 = vadd.f32 %v4367_v14, %v5972_v17  ;;  %v3663_v23 = vpop.f32.mrf.mxu0  ;;  %v3724_v7 = vpop.f32.mrf.mxu1 }
 0x355   : > { %v3817_v24 = vsel %vm3752_vm12, %v3661_v12, %v3785_v18  ;;  %vm3755_vm13 = vcmp.ge.f32.partialorder %v3672_v21, 0.0  ;;  %v3788_v25 = vmul.f32 %v5976_v20, %v3672_v21  ;;  %v3664_v26 = vadd.f32 %v5972_v17, %v3663_v23 }
 0x356   : > { %3850 = vst.msk [vmem:[%s5983_s21 + $0x60] sm:$0xff] %vm3837_vm2, %v3817_v24  ;;  %vm3770_vm14 = vcmp.ge.f32.partialorder %v3733_v22, 0.0  ;;  %v3803_v28 = vmul.f32 %v5976_v20, %v3733_v22  ;;  %v3725_v29 = vadd.f32 %v5972_v17, %v3724_v7  ;;  %v4368_v30 = vpop.f32.mrf.mxu1 }
 0x357   : > { %v3820_v31 = vsel %vm3755_vm13, %v3672_v21, %v3788_v25  ;;  %vm3753_vm15 = vcmp.ge.f32.partialorder %v3664_v26, 0.0  ;;  %v3786_v32 = vmul.f32 %v5976_v20, %v3664_v26  ;;  %v3736_v19 = vadd.f32 %v4368_v30, %v5972_v17 }
 0x358   : > { %3853 = vst.msk [vmem:[%s5983_s21 + $0x78] sm:$0xff] %vm3837_vm2, %v3820_v31  ;;  %v3835_v16 = vsel %vm3770_vm14, %v3733_v22, %v3803_v28  ;;  %vm3768_vm0 = vcmp.ge.f32.partialorder %v3725_v29, 0.0  ;;  %v3801_v33 = vmul.f32 %v5976_v20, %v3725_v29  ;;  %v3727_v34 = vpop.f32.mrf.mxu1 }
 0x359   : > { %3868 = vst.msk [vmem:[%s5983_s21 + $0xf0] sm:$0xff] %vm3837_vm2, %v3835_v16  ;;  %v3818_v35 = vsel %vm3753_vm15, %v3664_v26, %v3786_v32  ;;  %vm3771_vm1 = vcmp.ge.f32.partialorder %v3736_v19, 0.0  ;;  %v3804_v36 = vmul.f32 %v5976_v20, %v3736_v19  ;;  %v3728_v62 = vadd.f32 %v5972_v17, %v3727_v34 }
 0x35a   : > { %3851 = vst.msk [vmem:[%s5983_s21 + $0x68] sm:$0xff] %vm3837_vm2, %v3818_v35  ;;  %v3833_v37 = vsel %vm3768_vm0, %v3725_v29, %v3801_v33 }
 0x35b   : > { %3866 = vst.msk [vmem:[%s5983_s21 + $0xe0] sm:$0xff] %vm3837_vm2, %v3833_v37  ;;  %v3836_v38 = vsel %vm3771_vm1, %v3736_v19, %v3804_v36  ;;  %vm3769_vm3 = vcmp.ge.f32.partialorder %v3728_v62, 0.0  ;;  %v3802_v39 = vmul.f32 %v5976_v20, %v3728_v62 }
 0x35c   : > { %3869 = vst.msk [vmem:[%s5983_s21 + $0xf8] sm:$0xff] %vm3837_vm2, %v3836_v38 }
 0x35d   : > { %v3834_v41 = vsel %vm3769_vm3, %v3728_v62, %v3802_v39 }
 0x35e   : > { %3867 = vst.msk [vmem:[%s5983_s21 + $0xe8] sm:$0xff] %vm3837_vm2, %v3834_v41 }
 0x35f PF: > { %s15_s19 = sadd.s32 1, %s4451_s19   ;;  %s6149_s17 = smov %s4447_s18 }
 0x360   : > { %p12_p5 = scmp.ge.s32.totalorder %s15_s19, 4   ;;  %s6150_s18 = smov %s6152_s3 }
 0x362   :  { %14 = sbr.rel (!%p12_p5) target bundleno = 2 (0x2), region = 69 }

</bundles_post_ra>
